<compile_context>
chip_gen: v7x
topology: tpu7x:2x2x1
jax: 0.10.0
libtpu: 0.0.40
codegen_flags: <defaults>
</compile_context>

<pallas_src>
import math
import functools

import jax
import jax.numpy as jnp
from jax import lax
from jax.experimental import pallas as pl
from jax.experimental.pallas import tpu as pltpu


def _cross_attn_kernel(x_ref, enc_ref,
                       wq_ref, bq_ref, wk_ref, bk_ref, wv_ref, bv_ref,
                       wp_ref, bp_ref,
                       y_ref, att_ref,
                       k_sc, v_sc, q_sc, y_sc,
                       *, n_head):
    t_idx = pl.program_id(1)

    C = wq_ref.shape[1]
    hd = C // n_head
    scale = 1.0 / math.sqrt(hd)

    # --- K / V projections: once per batch element, cached head-major in bf16 VMEM scratch.
    #     K is stored pre-transposed (H, hd, T_E) so no transpose is needed per query tile.
    @pl.when(t_idx == 0)
    def _():
        enc = enc_ref[0].astype(jnp.bfloat16)                                        # (T_E, E)
        kf = jnp.dot(enc, wk_ref[...], preferred_element_type=jnp.float32) + bk_ref[...]
        vf = jnp.dot(enc, wv_ref[...], preferred_element_type=jnp.float32) + bv_ref[...]
        for h in range(n_head):                                   # static; once per batch element
            sl = slice(h * hd, (h + 1) * hd)
            k_sc[h] = jnp.transpose(kf[:, sl]).astype(jnp.bfloat16)                  # (hd, T_E)
            v_sc[h] = vf[:, sl].astype(jnp.bfloat16)                                 # (T_E, hd)

    # --- Q projection for this query tile; fold the attention scale into q once.
    x = x_ref[0].astype(jnp.bfloat16)                                                # (tq, C)
    q = jnp.dot(x, wq_ref[...], preferred_element_type=jnp.float32) + bq_ref[...]    # f32 acc
    q = (q * scale).astype(jnp.bfloat16)
    for h in range(n_head):                                        # lane-aligned sliced stores
        q_sc[h] = q[:, h * hd:(h + 1) * hd]

    q_hm = q_sc[...]                                               # (H, tq, hd)  bf16
    k_hm = k_sc[...]                                               # (H, hd, T_E) bf16
    v_hm = v_sc[...]                                               # (H, T_E, hd) bf16

    # --- heads-batched scores + numerically stable softmax (f32 statistics).
    s = jnp.einsum('hqd,hdk->hqk', q_hm, k_hm,
                   preferred_element_type=jnp.float32)             # (H, tq, T_E) f32
    s = s - jnp.max(s, axis=-1, keepdims=True)
    p = jnp.exp(s)
    p = p * pl.reciprocal(jnp.sum(p, axis=-1, keepdims=True), approx=True)

    # att output = mean over heads (explicit static sum over the small head axis).
    att = p[0]
    for h in range(1, n_head):
        att = att + p[h]
    att_ref[0] = (att * (1.0 / n_head)).astype(att_ref.dtype)

    # --- heads-batched P @ V, heads written back into a lane-dense (tq, C) tile.
    y_heads = jnp.einsum('hqk,hkd->hqd', p.astype(jnp.bfloat16), v_hm,
                         preferred_element_type=jnp.float32)       # (H, tq, hd) f32
    for h in range(n_head):
        y_sc[:, h * hd:(h + 1) * hd] = y_heads[h].astype(jnp.bfloat16)

    # --- Output projection on the full (tq, C) tile (single lane-dense matmul).
    out = jnp.dot(y_sc[...], wp_ref[...], preferred_element_type=jnp.float32) + bp_ref[...]
    y_ref[0] = out.astype(y_ref.dtype)


def cross_attention_pallas(x, encoder_output, params, n_head, *,
                           tq=128, att_dtype=jnp.float32,
                           vmem_limit_bytes=64 * 1024 * 1024):
    """x: (B, T, C), encoder_output: (B, T_E, E). Returns (y (B,T,C), att (B,T,T_E))."""
    B, T, C = x.shape
    _, T_E, E = encoder_output.shape
    assert C % n_head == 0, "n_embd must be divisible by n_head"
    hd = C // n_head

    # Ragged T: pad the query axis up to a multiple of tq instead of inflating tq to T
    # (bounded VMEM working set regardless of T). Padded query rows are sliced off below.
    tq = min(tq, T)
    n_tq = pl.cdiv(T, tq)
    T_pad = n_tq * tq
    if T_pad != T:
        x = jnp.pad(x, ((0, 0), (0, T_pad - T), (0, 0)))

    # bf16 weights: MXU peak is for bf16 operands; biases stay f32 (added after f32 accumulation).
    # If upstream x / encoder_output are already bf16 they are accepted as-is (in-kernel cast is a no-op).
    wq = params["wq"].astype(jnp.bfloat16)
    wk = params["wk"].astype(jnp.bfloat16)
    wv = params["wv"].astype(jnp.bfloat16)
    wp = params["wp"].astype(jnp.bfloat16)
    bq, bk, bv, bp = params["bq"], params["bk"], params["bv"], params["bp"]

    kernel = functools.partial(_cross_attn_kernel, n_head=n_head)
    full = lambda b, t: (0, 0)   # grid-invariant blocks (weights/biases): revisited, not re-DMA'd

    # Advisory cost estimate (matmul FLOPs, exp count, HBM bytes) for XLA's scheduler.
    itemsize = lambda dt: jnp.dtype(dt).itemsize
    macs = B * (2 * T_pad * C * C + 2 * T_E * E * C + 2 * T_pad * T_E * C)
    cost = pl.CostEstimate(
        flops=int(2 * macs),
        transcendentals=int(B * n_head * T_pad * T_E),
        bytes_accessed=int(
            B * T_pad * C * itemsize(x.dtype)                 # x
            + B * T_E * E * itemsize(encoder_output.dtype)    # encoder_output
            + 2 * (2 * C * C + 2 * E * C)                     # bf16 weights
            + 4 * 4 * C                                       # f32 biases
            + B * T_pad * C * itemsize(x.dtype)               # y
            + B * T_pad * T_E * itemsize(att_dtype)),         # att
    )

    y, att = pl.pallas_call(
        kernel,
        out_shape=(
            jax.ShapeDtypeStruct((B, T_pad, C), x.dtype),
            jax.ShapeDtypeStruct((B, T_pad, T_E), att_dtype),   # set att_dtype=bf16 to halve writeback
        ),
        grid_spec=pltpu.PrefetchScalarGridSpec(
            num_scalar_prefetch=0,
            grid=(B, n_tq),
            in_specs=[
                pl.BlockSpec((1, tq, C), lambda b, t: (b, t, 0)),    # x (query tile)
                pl.BlockSpec((1, T_E, E), lambda b, t: (b, 0, 0)),   # encoder_output (same block over t)
                pl.BlockSpec((C, C), full),   # wq (bf16)
                pl.BlockSpec((1, C), full),   # bq
                pl.BlockSpec((E, C), full),   # wk (bf16)
                pl.BlockSpec((1, C), full),   # bk
                pl.BlockSpec((E, C), full),   # wv (bf16)
                pl.BlockSpec((1, C), full),   # bv
                pl.BlockSpec((C, C), full),   # wp (bf16)
                pl.BlockSpec((1, C), full),   # bp
            ],
            out_specs=(
                pl.BlockSpec((1, tq, C), lambda b, t: (b, t, 0)),    # y   (lane-dense: C % 128 == 0)
                pl.BlockSpec((1, tq, T_E), lambda b, t: (b, t, 0)),  # att (lane-dense: T_E % 128 == 0)
            ),
            scratch_shapes=[
                pltpu.VMEM((n_head, hd, T_E), jnp.bfloat16),   # cached K^T (head-major), per batch element
                pltpu.VMEM((n_head, T_E, hd), jnp.bfloat16),   # cached V   (head-major), per batch element
                pltpu.VMEM((n_head, tq, hd), jnp.bfloat16),    # per-tile head-major Q
                pltpu.VMEM((tq, C), jnp.bfloat16),             # per-tile multi-head output accumulator
            ],
        ),
        compiler_params=pltpu.CompilerParams(
            # batch axis is megacore-shardable; query-tile axis is sequential because the
            # cached K/V scratch carries across query tiles of the same batch element.
            dimension_semantics=("parallel", "arbitrary"),
            vmem_limit_bytes=vmem_limit_bytes,    # budget <= ~48 MiB on v7x (64 MiB physical)
        ),
        cost_estimate=cost,
    )(x, encoder_output, wq, bq, wk, bk, wv, bv, wp, bp)

    if T_pad != T:
        y = y[:, :T]
        att = att[:, :T]
    return y, att


def _reference(x, enc, params, n_head):
    """Pure-JAX (f32) reference mirroring the PyTorch forward (eval mode)."""
    B, T, C = x.shape
    _, T_E, _ = enc.shape
    hd = C // n_head
    k = (enc @ params["wk"] + params["bk"]).reshape(B, T_E, n_head, hd).transpose(0, 2, 1, 3)
    q = (x @ params["wq"] + params["bq"]).reshape(B, T, n_head, hd).transpose(0, 2, 1, 3)
    v = (enc @ params["wv"] + params["bv"]).reshape(B, T_E, n_head, hd).transpose(0, 2, 1, 3)
    att = jnp.einsum("bhtd,bhsd->bhts", q, k) * (1.0 / math.sqrt(hd))
    att = jax.nn.softmax(att, axis=-1)
    y = jnp.einsum("bhts,bhsd->bhtd", att, v).transpose(0, 2, 1, 3).reshape(B, T, C)
    att_mean = att.mean(axis=1)
    y = y @ params["wp"] + params["bp"]
    return y, att_mean


def init_params(key, n_embd, condition_embd):
    """Deterministic nn.Linear-style init. Weights stored as (in, out), f32."""
    ks = jax.random.split(key, 8)

    def linear(kw, kb, fan_in, fan_out):
        bound = 1.0 / math.sqrt(fan_in)
        w = jax.random.uniform(kw, (fan_in, fan_out), jnp.float32, -bound, bound)
        b = jax.random.uniform(kb, (1, fan_out), jnp.float32, -bound, bound)
        return w, b

    wk, bk = linear(ks[0], ks[1], condition_embd, n_embd)
    wq, bq = linear(ks[2], ks[3], n_embd, n_embd)
    wv, bv = linear(ks[4], ks[5], condition_embd, n_embd)
    wp, bp = linear(ks[6], ks[7], n_embd, n_embd)
    return dict(wq=wq, bq=bq, wk=wk, bk=bk, wv=wv, bv=bv, wp=wp, bp=bp)


if __name__ == "__main__":
    # Small, lane-aligned shapes (C, E, T_E multiples of 128; head_dim = 128).
    B, T, T_E = 2, 128, 128
    n_embd, condition_embd, n_head = 256, 128, 2

    key = jax.random.PRNGKey(0)
    kx, kenc, kp = jax.random.split(key, 3)
    x = jax.random.normal(kx, (B, T, n_embd), jnp.float32)
    enc = jax.random.normal(kenc, (B, T_E, condition_embd), jnp.float32)
    params = init_params(kp, n_embd, condition_embd)

    y, att = cross_attention_pallas(x, enc, params, n_head)
    y = jax.block_until_ready(y)
    att = jax.block_until_ready(att)

    # Sanity check against a pure-JAX f32 reference (tolerances loosened for bf16 MXU operands).
    y_ref, att_ref = _reference(x, enc, params, n_head)
    assert y.shape == (B, T, n_embd) and att.shape == (B, T, T_E)
    assert jnp.allclose(y, y_ref, atol=2e-2, rtol=2e-2), float(jnp.max(jnp.abs(y - y_ref)))
    assert jnp.allclose(att, att_ref, atol=1e-2, rtol=1e-2), float(jnp.max(jnp.abs(att - att_ref)))

    print("KERNEL_OK")
</pallas_src>

<mosaic_0001>
module attributes {stable_mosaic.version = 11 : i64} {
  func.func @_cross_attn_kernel(%arg0: i32, %arg1: i32, %arg2: memref<1x128x256xf32, #tpu.memory_space<vmem>>, %arg3: memref<1x128x128xf32, #tpu.memory_space<vmem>>, %arg4: memref<256x256xbf16, #tpu.memory_space<vmem>>, %arg5: memref<1x256xf32, #tpu.memory_space<vmem>>, %arg6: memref<128x256xbf16, #tpu.memory_space<vmem>>, %arg7: memref<1x256xf32, #tpu.memory_space<vmem>>, %arg8: memref<128x256xbf16, #tpu.memory_space<vmem>>, %arg9: memref<1x256xf32, #tpu.memory_space<vmem>>, %arg10: memref<256x256xbf16, #tpu.memory_space<vmem>>, %arg11: memref<1x256xf32, #tpu.memory_space<vmem>>, %arg12: memref<1x128x256xf32, #tpu.memory_space<vmem>>, %arg13: memref<1x128x128xf32, #tpu.memory_space<vmem>>, %arg14: memref<2x128x128xbf16, #tpu.memory_space<vmem>>, %arg15: memref<2x128x128xbf16, #tpu.memory_space<vmem>>, %arg16: memref<2x128x128xbf16, #tpu.memory_space<vmem>>, %arg17: memref<128x256xbf16, #tpu.memory_space<vmem>>) attributes {dimension_semantics = [#tpu.dimension_semantics<parallel>, #tpu.dimension_semantics<arbitrary>], iteration_bounds = array<i64: 2, 1>, scalar_prefetch = 0 : i64, scratch_operands = 4 : i64, tpu.core_type = #tpu.core_type<tc>, window_params = [{transform_indices = @transform_0, window_bounds = array<i64: 1, 128, 256>}, {transform_indices = @transform_1, window_bounds = array<i64: 1, 128, 128>}, {pipeline_mode = #tpu.pipeline_mode<synchronous>, transform_indices = @transform_2, window_bounds = array<i64: 256, 256>}, {pipeline_mode = #tpu.pipeline_mode<synchronous>, transform_indices = @transform_3, window_bounds = array<i64: 1, 256>}, {pipeline_mode = #tpu.pipeline_mode<synchronous>, transform_indices = @transform_4, window_bounds = array<i64: 128, 256>}, {pipeline_mode = #tpu.pipeline_mode<synchronous>, transform_indices = @transform_5, window_bounds = array<i64: 1, 256>}, {pipeline_mode = #tpu.pipeline_mode<synchronous>, transform_indices = @transform_6, window_bounds = array<i64: 128, 256>}, {pipeline_mode = #tpu.pipeline_mode<synchronous>, transform_indices = @transform_7, window_bounds = array<i64: 1, 256>}, {pipeline_mode = #tpu.pipeline_mode<synchronous>, transform_indices = @transform_8, window_bounds = array<i64: 256, 256>}, {pipeline_mode = #tpu.pipeline_mode<synchronous>, transform_indices = @transform_9, window_bounds = array<i64: 1, 256>}, {transform_indices = @transform_10, window_bounds = array<i64: 1, 128, 256>}, {transform_indices = @transform_11, window_bounds = array<i64: 1, 128, 128>}]} {
    %c0_i32 = arith.constant 0 : i32
    %0 = arith.cmpi eq, %arg1, %c0_i32 : i32
    %1 = arith.extui %0 : i1 to i32
    %c0_i32_0 = arith.constant 0 : i32
    %2 = arith.cmpi ne, %1, %c0_i32_0 : i32
    scf.if %2 {
      %c0_43 = arith.constant 0 : index
      %c0_44 = arith.constant 0 : index
      %c0_45 = arith.constant 0 : index
      %65 = vector.load %arg3[%c0_43, %c0_44, %c0_45] : memref<1x128x128xf32, #tpu.memory_space<vmem>>, vector<1x128x128xf32>
      %66 = vector.shape_cast %65 : vector<1x128x128xf32> to vector<128x128xf32>
      %67 = arith.truncf %66 : vector<128x128xf32> to vector<128x128xbf16>
      %c0_46 = arith.constant 0 : index
      %c0_47 = arith.constant 0 : index
      %68 = vector.load %arg6[%c0_46, %c0_47] : memref<128x256xbf16, #tpu.memory_space<vmem>>, vector<128x256xbf16>
      %cst_48 = arith.constant dense<0.000000e+00> : vector<128x256xf32>
      %69 = tpu.matmul %67, %68, %cst_48 {dimension_numbers = #tpu.dot_dimension_numbers<[1], [0], [0], [1], [0, 0, 1, 1], [], []>} : vector<128x128xbf16>, vector<128x256xbf16>, vector<128x256xf32> -> vector<128x256xf32>
      %c0_49 = arith.constant 0 : index
      %c0_50 = arith.constant 0 : index
      %70 = vector.load %arg7[%c0_49, %c0_50] : memref<1x256xf32, #tpu.memory_space<vmem>>, vector<1x256xf32>
      %71 = vector.broadcast %70 : vector<1x256xf32> to vector<128x256xf32>
      %72 = arith.addf %69, %71 : vector<128x256xf32>
      %c0_51 = arith.constant 0 : index
      %c0_52 = arith.constant 0 : index
      %73 = vector.load %arg8[%c0_51, %c0_52] : memref<128x256xbf16, #tpu.memory_space<vmem>>, vector<128x256xbf16>
      %cst_53 = arith.constant dense<0.000000e+00> : vector<128x256xf32>
      %74 = tpu.matmul %67, %73, %cst_53 {dimension_numbers = #tpu.dot_dimension_numbers<[1], [0], [0], [1], [0, 0, 1, 1], [], []>} : vector<128x128xbf16>, vector<128x256xbf16>, vector<128x256xf32> -> vector<128x256xf32>
      %c0_54 = arith.constant 0 : index
      %c0_55 = arith.constant 0 : index
      %75 = vector.load %arg9[%c0_54, %c0_55] : memref<1x256xf32, #tpu.memory_space<vmem>>, vector<1x256xf32>
      %76 = vector.broadcast %75 : vector<1x256xf32> to vector<128x256xf32>
      %77 = arith.addf %74, %76 : vector<128x256xf32>
      %78 = vector.extract_strided_slice %72 {offsets = [0, 0], sizes = [128, 128], strides = [1, 1]} : vector<128x256xf32> to vector<128x128xf32>
      %79 = tpu.transpose %78, [1, 0] : vector<128x128xf32> -> vector<128x128xf32>
      %80 = arith.truncf %79 : vector<128x128xf32> to vector<128x128xbf16>
      %c0_56 = arith.constant 0 : index
      %c0_57 = arith.constant 0 : index
      %c0_58 = arith.constant 0 : index
      %81 = vector.load %arg14[%c0_56, %c0_57, %c0_58] : memref<2x128x128xbf16, #tpu.memory_space<vmem>>, vector<1x128x128xbf16>
      %82 = vector.shape_cast %81 : vector<1x128x128xbf16> to vector<128x128xbf16>
      %83 = vector.shape_cast %80 : vector<128x128xbf16> to vector<1x128x128xbf16>
      tpu.vector_store %arg14[%c0_56, %c0_57, %c0_58], %83 {strides = array<i32>} : memref<2x128x128xbf16, #tpu.memory_space<vmem>>, vector<1x128x128xbf16>,
      %84 = vector.extract_strided_slice %77 {offsets = [0, 0], sizes = [128, 128], strides = [1, 1]} : vector<128x256xf32> to vector<128x128xf32>
      %85 = arith.truncf %84 : vector<128x128xf32> to vector<128x128xbf16>
      %c0_59 = arith.constant 0 : index
      %c0_60 = arith.constant 0 : index
      %c0_61 = arith.constant 0 : index
      %86 = vector.load %arg15[%c0_59, %c0_60, %c0_61] : memref<2x128x128xbf16, #tpu.memory_space<vmem>>, vector<1x128x128xbf16>
      %87 = vector.shape_cast %86 : vector<1x128x128xbf16> to vector<128x128xbf16>
      %88 = vector.shape_cast %85 : vector<128x128xbf16> to vector<1x128x128xbf16>
      tpu.vector_store %arg15[%c0_59, %c0_60, %c0_61], %88 {strides = array<i32>} : memref<2x128x128xbf16, #tpu.memory_space<vmem>>, vector<1x128x128xbf16>,
      %89 = vector.extract_strided_slice %72 {offsets = [0, 128], sizes = [128, 128], strides = [1, 1]} : vector<128x256xf32> to vector<128x128xf32>
      %90 = tpu.transpose %89, [1, 0] : vector<128x128xf32> -> vector<128x128xf32>
      %91 = arith.truncf %90 : vector<128x128xf32> to vector<128x128xbf16>
      %c1_62 = arith.constant 1 : index
      %c0_63 = arith.constant 0 : index
      %c0_64 = arith.constant 0 : index
      %92 = vector.load %arg14[%c1_62, %c0_63, %c0_64] : memref<2x128x128xbf16, #tpu.memory_space<vmem>>, vector<1x128x128xbf16>
      %93 = vector.shape_cast %92 : vector<1x128x128xbf16> to vector<128x128xbf16>
      %94 = vector.shape_cast %91 : vector<128x128xbf16> to vector<1x128x128xbf16>
      tpu.vector_store %arg14[%c1_62, %c0_63, %c0_64], %94 {strides = array<i32>} : memref<2x128x128xbf16, #tpu.memory_space<vmem>>, vector<1x128x128xbf16>,
      %95 = vector.extract_strided_slice %77 {offsets = [0, 128], sizes = [128, 128], strides = [1, 1]} : vector<128x256xf32> to vector<128x128xf32>
      %96 = arith.truncf %95 : vector<128x128xf32> to vector<128x128xbf16>
      %c1_65 = arith.constant 1 : index
      %c0_66 = arith.constant 0 : index
      %c0_67 = arith.constant 0 : index
      %97 = vector.load %arg15[%c1_65, %c0_66, %c0_67] : memref<2x128x128xbf16, #tpu.memory_space<vmem>>, vector<1x128x128xbf16>
      %98 = vector.shape_cast %97 : vector<1x128x128xbf16> to vector<128x128xbf16>
      %99 = vector.shape_cast %96 : vector<128x128xbf16> to vector<1x128x128xbf16>
      tpu.vector_store %arg15[%c1_65, %c0_66, %c0_67], %99 {strides = array<i32>} : memref<2x128x128xbf16, #tpu.memory_space<vmem>>, vector<1x128x128xbf16>,
    } else {
    }
    %c0 = arith.constant 0 : index
    %c0_1 = arith.constant 0 : index
    %c0_2 = arith.constant 0 : index
    %3 = vector.load %arg2[%c0, %c0_1, %c0_2] : memref<1x128x256xf32, #tpu.memory_space<vmem>>, vector<1x128x256xf32>
    %4 = vector.shape_cast %3 : vector<1x128x256xf32> to vector<128x256xf32>
    %5 = arith.truncf %4 : vector<128x256xf32> to vector<128x256xbf16>
    %c0_3 = arith.constant 0 : index
    %c0_4 = arith.constant 0 : index
    %6 = vector.load %arg4[%c0_3, %c0_4] : memref<256x256xbf16, #tpu.memory_space<vmem>>, vector<256x256xbf16>
    %cst = arith.constant dense<0.000000e+00> : vector<128x256xf32>
    %7 = tpu.matmul %5, %6, %cst {dimension_numbers = #tpu.dot_dimension_numbers<[1], [0], [0], [1], [0, 0, 1, 1], [], []>} : vector<128x256xbf16>, vector<256x256xbf16>, vector<128x256xf32> -> vector<128x256xf32>
    %c0_5 = arith.constant 0 : index
    %c0_6 = arith.constant 0 : index
    %8 = vector.load %arg5[%c0_5, %c0_6] : memref<1x256xf32, #tpu.memory_space<vmem>>, vector<1x256xf32>
    %9 = vector.broadcast %8 : vector<1x256xf32> to vector<128x256xf32>
    %10 = arith.addf %7, %9 : vector<128x256xf32>
    %cst_7 = arith.constant 0.0883883461 : f32
    %11 = vector.broadcast %cst_7 : f32 to vector<128x256xf32>
    %12 = arith.mulf %10, %11 : vector<128x256xf32>
    %13 = arith.truncf %12 : vector<128x256xf32> to vector<128x256xbf16>
    %14 = vector.extract_strided_slice %13 {offsets = [0, 0], sizes = [128, 128], strides = [1, 1]} : vector<128x256xbf16> to vector<128x128xbf16>
    %c0_8 = arith.constant 0 : index
    %c0_9 = arith.constant 0 : index
    %c0_10 = arith.constant 0 : index
    %15 = vector.load %arg16[%c0_8, %c0_9, %c0_10] : memref<2x128x128xbf16, #tpu.memory_space<vmem>>, vector<1x128x128xbf16>
    %16 = vector.shape_cast %15 : vector<1x128x128xbf16> to vector<128x128xbf16>
    %17 = vector.shape_cast %14 : vector<128x128xbf16> to vector<1x128x128xbf16>
    tpu.vector_store %arg16[%c0_8, %c0_9, %c0_10], %17 {strides = array<i32>} : memref<2x128x128xbf16, #tpu.memory_space<vmem>>, vector<1x128x128xbf16>,
    %18 = vector.extract_strided_slice %13 {offsets = [0, 128], sizes = [128, 128], strides = [1, 1]} : vector<128x256xbf16> to vector<128x128xbf16>
    %c1 = arith.constant 1 : index
    %c0_11 = arith.constant 0 : index
    %c0_12 = arith.constant 0 : index
    %19 = vector.load %arg16[%c1, %c0_11, %c0_12] : memref<2x128x128xbf16, #tpu.memory_space<vmem>>, vector<1x128x128xbf16>
    %20 = vector.shape_cast %19 : vector<1x128x128xbf16> to vector<128x128xbf16>
    %21 = vector.shape_cast %18 : vector<128x128xbf16> to vector<1x128x128xbf16>
    tpu.vector_store %arg16[%c1, %c0_11, %c0_12], %21 {strides = array<i32>} : memref<2x128x128xbf16, #tpu.memory_space<vmem>>, vector<1x128x128xbf16>,
    %c0_13 = arith.constant 0 : index
    %c0_14 = arith.constant 0 : index
    %c0_15 = arith.constant 0 : index
    %22 = vector.load %arg16[%c0_13, %c0_14, %c0_15] : memref<2x128x128xbf16, #tpu.memory_space<vmem>>, vector<2x128x128xbf16>
    %c0_16 = arith.constant 0 : index
    %c0_17 = arith.constant 0 : index
    %c0_18 = arith.constant 0 : index
    %23 = vector.load %arg14[%c0_16, %c0_17, %c0_18] : memref<2x128x128xbf16, #tpu.memory_space<vmem>>, vector<2x128x128xbf16>
    %c0_19 = arith.constant 0 : index
    %c0_20 = arith.constant 0 : index
    %c0_21 = arith.constant 0 : index
    %24 = vector.load %arg15[%c0_19, %c0_20, %c0_21] : memref<2x128x128xbf16, #tpu.memory_space<vmem>>, vector<2x128x128xbf16>
    "tpu.trace_start"() <{level = 10 : i32, message = "hqd,hdk->hqk"}> : () -> ()
    %cst_22 = arith.constant dense<0.000000e+00> : vector<2x128x128xf32>
    %25 = tpu.matmul %22, %23, %cst_22 {dimension_numbers = #tpu.dot_dimension_numbers<[2], [1], [1], [2], [0, 0, 0, 1, 1, 2], [0], [0]>} : vector<2x128x128xbf16>, vector<2x128x128xbf16>, vector<2x128x128xf32> -> vector<2x128x128xf32>
    "tpu.trace_stop"() : () -> ()
    %cst_23 = arith.constant dense<0xFF800000> : vector<2x128xf32>
    %26 = vector.multi_reduction <maximumf>, %25, %cst_23 [2] : vector<2x128x128xf32> to vector<2x128xf32>
    %27 = vector.shape_cast %26 : vector<2x128xf32> to vector<2x128x1xf32>
    %28 = vector.broadcast %27 : vector<2x128x1xf32> to vector<2x128x128xf32>
    %29 = arith.subf %25, %28 : vector<2x128x128xf32>
    %30 = math.exp %29 : vector<2x128x128xf32>
    %cst_24 = arith.constant dense<0.000000e+00> : vector<2x128xf32>
    %31 = vector.multi_reduction <add>, %30, %cst_24 [2] : vector<2x128x128xf32> to vector<2x128xf32>
    %32 = vector.shape_cast %31 : vector<2x128xf32> to vector<2x128x1xf32>
    %33 = tpu.reciprocal %32 {approx = true} : vector<2x128x1xf32> -> vector<2x128x1xf32>
    %34 = vector.broadcast %33 : vector<2x128x1xf32> to vector<2x128x128xf32>
    %35 = arith.mulf %30, %34 : vector<2x128x128xf32>
    %36 = vector.extract_strided_slice %35 {offsets = [0, 0, 0], sizes = [1, 128, 128], strides = [1, 1, 1]} : vector<2x128x128xf32> to vector<1x128x128xf32>
    %37 = vector.shape_cast %36 : vector<1x128x128xf32> to vector<128x128xf32>
    %38 = vector.extract_strided_slice %35 {offsets = [1, 0, 0], sizes = [1, 128, 128], strides = [1, 1, 1]} : vector<2x128x128xf32> to vector<1x128x128xf32>
    %39 = vector.shape_cast %38 : vector<1x128x128xf32> to vector<128x128xf32>
    %40 = arith.addf %37, %39 : vector<128x128xf32>
    %cst_25 = arith.constant 5.000000e-01 : f32
    %41 = vector.broadcast %cst_25 : f32 to vector<128x128xf32>
    %42 = arith.mulf %40, %41 : vector<128x128xf32>
    %c0_26 = arith.constant 0 : index
    %c0_27 = arith.constant 0 : index
    %c0_28 = arith.constant 0 : index
    %43 = vector.load %arg13[%c0_26, %c0_27, %c0_28] : memref<1x128x128xf32, #tpu.memory_space<vmem>>, vector<1x128x128xf32>
    %44 = vector.shape_cast %43 : vector<1x128x128xf32> to vector<128x128xf32>
    %45 = vector.shape_cast %42 : vector<128x128xf32> to vector<1x128x128xf32>
    tpu.vector_store %arg13[%c0_26, %c0_27, %c0_28], %45 {strides = array<i32>} : memref<1x128x128xf32, #tpu.memory_space<vmem>>, vector<1x128x128xf32>,
    %46 = arith.truncf %35 : vector<2x128x128xf32> to vector<2x128x128xbf16>
    "tpu.trace_start"() <{level = 10 : i32, message = "hqk,hkd->hqd"}> : () -> ()
    %cst_29 = arith.constant dense<0.000000e+00> : vector<2x128x128xf32>
    %47 = tpu.matmul %46, %24, %cst_29 {dimension_numbers = #tpu.dot_dimension_numbers<[2], [1], [1], [2], [0, 0, 0, 1, 1, 2], [0], [0]>} : vector<2x128x128xbf16>, vector<2x128x128xbf16>, vector<2x128x128xf32> -> vector<2x128x128xf32>
    "tpu.trace_stop"() : () -> ()
    %48 = vector.extract_strided_slice %47 {offsets = [0, 0, 0], sizes = [1, 128, 128], strides = [1, 1, 1]} : vector<2x128x128xf32> to vector<1x128x128xf32>
    %49 = vector.shape_cast %48 : vector<1x128x128xf32> to vector<128x128xf32>
    %50 = arith.truncf %49 : vector<128x128xf32> to vector<128x128xbf16>
    %c0_30 = arith.constant 0 : index
    %c0_31 = arith.constant 0 : index
    %51 = vector.load %arg17[%c0_30, %c0_31] : memref<128x256xbf16, #tpu.memory_space<vmem>>, vector<128x128xbf16>
    tpu.vector_store %arg17[%c0_30, %c0_31], %50 {strides = array<i32>} : memref<128x256xbf16, #tpu.memory_space<vmem>>, vector<128x128xbf16>,
    %52 = vector.extract_strided_slice %47 {offsets = [1, 0, 0], sizes = [1, 128, 128], strides = [1, 1, 1]} : vector<2x128x128xf32> to vector<1x128x128xf32>
    %53 = vector.shape_cast %52 : vector<1x128x128xf32> to vector<128x128xf32>
    %54 = arith.truncf %53 : vector<128x128xf32> to vector<128x128xbf16>
    %c0_32 = arith.constant 0 : index
    %c128 = arith.constant 128 : index
    %55 = vector.load %arg17[%c0_32, %c128] : memref<128x256xbf16, #tpu.memory_space<vmem>>, vector<128x128xbf16>
    tpu.vector_store %arg17[%c0_32, %c128], %54 {strides = array<i32>} : memref<128x256xbf16, #tpu.memory_space<vmem>>, vector<128x128xbf16>,
    %c0_33 = arith.constant 0 : index
    %c0_34 = arith.constant 0 : index
    %56 = vector.load %arg17[%c0_33, %c0_34] : memref<128x256xbf16, #tpu.memory_space<vmem>>, vector<128x256xbf16>
    %c0_35 = arith.constant 0 : index
    %c0_36 = arith.constant 0 : index
    %57 = vector.load %arg10[%c0_35, %c0_36] : memref<256x256xbf16, #tpu.memory_space<vmem>>, vector<256x256xbf16>
    %cst_37 = arith.constant dense<0.000000e+00> : vector<128x256xf32>
    %58 = tpu.matmul %56, %57, %cst_37 {dimension_numbers = #tpu.dot_dimension_numbers<[1], [0], [0], [1], [0, 0, 1, 1], [], []>} : vector<128x256xbf16>, vector<256x256xbf16>, vector<128x256xf32> -> vector<128x256xf32>
    %c0_38 = arith.constant 0 : index
    %c0_39 = arith.constant 0 : index
    %59 = vector.load %arg11[%c0_38, %c0_39] : memref<1x256xf32, #tpu.memory_space<vmem>>, vector<1x256xf32>
    %60 = vector.broadcast %59 : vector<1x256xf32> to vector<128x256xf32>
    %61 = arith.addf %58, %60 : vector<128x256xf32>
    %c0_40 = arith.constant 0 : index
    %c0_41 = arith.constant 0 : index
    %c0_42 = arith.constant 0 : index
    %62 = vector.load %arg12[%c0_40, %c0_41, %c0_42] : memref<1x128x256xf32, #tpu.memory_space<vmem>>, vector<1x128x256xf32>
    %63 = vector.shape_cast %62 : vector<1x128x256xf32> to vector<128x256xf32>
    %64 = vector.shape_cast %61 : vector<128x256xf32> to vector<1x128x256xf32>
    tpu.vector_store %arg12[%c0_40, %c0_41, %c0_42], %64 {strides = array<i32>} : memref<1x128x256xf32, #tpu.memory_space<vmem>>, vector<1x128x256xf32>,
    return
  }
  func.func @transform_0(%arg0: i32, %arg1: i32) -> (i32, i32, i32) {
    %c0_i32 = arith.constant 0 : i32
    %c0_i32_0 = arith.constant 0 : i32
    return %arg0, %arg1, %c0_i32 : i32, i32, i32
  }
  func.func @transform_1(%arg0: i32, %arg1: i32) -> (i32, i32, i32) {
    %c0_i32 = arith.constant 0 : i32
    %c0_i32_0 = arith.constant 0 : i32
    %c0_i32_1 = arith.constant 0 : i32
    return %arg0, %c0_i32, %c0_i32_0 : i32, i32, i32
  }
  func.func @transform_2(%arg0: i32, %arg1: i32) -> (i32, i32) {
    %c0_i32 = arith.constant 0 : i32
    %c0_i32_0 = arith.constant 0 : i32
    %c0_i32_1 = arith.constant 0 : i32
    return %c0_i32, %c0_i32_0 : i32, i32
  }
  func.func @transform_3(%arg0: i32, %arg1: i32) -> (i32, i32) {
    %c0_i32 = arith.constant 0 : i32
    %c0_i32_0 = arith.constant 0 : i32
    %c0_i32_1 = arith.constant 0 : i32
    return %c0_i32, %c0_i32_0 : i32, i32
  }
  func.func @transform_4(%arg0: i32, %arg1: i32) -> (i32, i32) {
    %c0_i32 = arith.constant 0 : i32
    %c0_i32_0 = arith.constant 0 : i32
    %c0_i32_1 = arith.constant 0 : i32
    return %c0_i32, %c0_i32_0 : i32, i32
  }
  func.func @transform_5(%arg0: i32, %arg1: i32) -> (i32, i32) {
    %c0_i32 = arith.constant 0 : i32
    %c0_i32_0 = arith.constant 0 : i32
    %c0_i32_1 = arith.constant 0 : i32
    return %c0_i32, %c0_i32_0 : i32, i32
  }
  func.func @transform_6(%arg0: i32, %arg1: i32) -> (i32, i32) {
    %c0_i32 = arith.constant 0 : i32
    %c0_i32_0 = arith.constant 0 : i32
    %c0_i32_1 = arith.constant 0 : i32
    return %c0_i32, %c0_i32_0 : i32, i32
  }
  func.func @transform_7(%arg0: i32, %arg1: i32) -> (i32, i32) {
    %c0_i32 = arith.constant 0 : i32
    %c0_i32_0 = arith.constant 0 : i32
    %c0_i32_1 = arith.constant 0 : i32
    return %c0_i32, %c0_i32_0 : i32, i32
  }
  func.func @transform_8(%arg0: i32, %arg1: i32) -> (i32, i32) {
    %c0_i32 = arith.constant 0 : i32
    %c0_i32_0 = arith.constant 0 : i32
    %c0_i32_1 = arith.constant 0 : i32
    return %c0_i32, %c0_i32_0 : i32, i32
  }
  func.func @transform_9(%arg0: i32, %arg1: i32) -> (i32, i32) {
    %c0_i32 = arith.constant 0 : i32
    %c0_i32_0 = arith.constant 0 : i32
    %c0_i32_1 = arith.constant 0 : i32
    return %c0_i32, %c0_i32_0 : i32, i32
  }
  func.func @transform_10(%arg0: i32, %arg1: i32) -> (i32, i32, i32) {
    %c0_i32 = arith.constant 0 : i32
    %c0_i32_0 = arith.constant 0 : i32
    return %arg0, %arg1, %c0_i32 : i32, i32, i32
  }
  func.func @transform_11(%arg0: i32, %arg1: i32) -> (i32, i32, i32) {
    %c0_i32 = arith.constant 0 : i32
    %c0_i32_0 = arith.constant 0 : i32
    return %arg0, %arg1, %c0_i32 : i32, i32, i32
  }
}

</mosaic_0001>

<bundles_post_ra>
// kernel: tpu_custom_call.1
= control target key start
LH: loop header
LB: loop body
LE: loop exit
PB: predicated region body
PF: predicated region fallthrough
CT: control target
= control target key end

     0   :  { %s5666_s0 = inlined_call_operand.hbm [shape: f32[2,128,256], index: 0, kind: input, shape index: {}]   ;;  %s5667_s1 = inlined_call_operand.hbm [shape: f32[2,128,128], index: 1, kind: input, shape index: {}]   ;;  %s5668_s2 = inlined_call_operand.hbm [shape: bf16[256,256], index: 2, kind: input, shape index: {}]   ;;  %s5669_s3 = inlined_call_operand.hbm [shape: f32[1,256], index: 3, kind: input, shape index: {}]   ;;  %s5670_s4 = inlined_call_operand.hbm [shape: bf16[128,256], index: 4, kind: input, shape index: {}]   ;;  %s5671_s5 = inlined_call_operand.hbm [shape: f32[1,256], index: 5, kind: input, shape index: {}]   ;;  %s5672_s6 = inlined_call_operand.hbm [shape: bf16[128,256], index: 6, kind: input, shape index: {}]   ;;  %s5673_s7 = inlined_call_operand.hbm [shape: f32[1,256], index: 7, kind: input, shape index: {}]   ;;  %s5674_s8 = inlined_call_operand.hbm [shape: bf16[256,256], index: 8, kind: input, shape index: {}]   ;;  %s5675_s9 = inlined_call_operand.hbm [shape: f32[1,256], index: 9, kind: input, shape index: {}]   ;;  %s5676_s10 = inlined_call_operand.hbm [shape: f32[2,128,256], index: 10, kind: output, shape index: {0}]   ;;  %s5677_s11 = inlined_call_operand.hbm [shape: f32[2,128,128], index: 11, kind: output, shape index: {1}]  }
   0x1   :  { %5694 = sst [smem:[#allocation42_spill]] %s5666_s0 }
   0x2   :  { %5695 = sst [smem:[#allocation43_spill]] %s5667_s1 }
   0x3   :  { %5696 = sst [smem:[#allocation44_spill]] %s5668_s2 }
   0x4   :  { %5697 = sst [smem:[#allocation45_spill]] %s5669_s3 }
   0x5   :  { %5698 = sst [smem:[#allocation46_spill]] %s5670_s4 }
   0x6   :  { %5699 = sst [smem:[#allocation47_spill]] %s5671_s5 }
   0x7   :  { %5700 = sst [smem:[#allocation48_spill]] %s5672_s6 }
   0x8   :  { %5701 = sst [smem:[#allocation49_spill]] %s5673_s7 }
   0x9   :  { %5702 = sst [smem:[#allocation50_spill]] %s5674_s8 }
   0xa   :  { %5703 = sst [smem:[#allocation51_spill]] %s5676_s10 }
   0xb   :  { %5704 = sst [smem:[#allocation52_spill]] %s5677_s11 }
   0xc   :  { %17 = vsyncpa [#allocation7], 0 }
   0xd   :  { %19 = vsyncpa [#allocation7 + $0x1], 0 }
   0xe   :  { %20 = vsyncpa [#allocation10], 0 }
   0xf   :  { %22 = vsyncpa [#allocation10 + $0x1], 0 }
  0x10   :  { %23 = vsyncpa [#allocation13], 0 }
  0x11   :  { %24 = vsyncpa [#allocation16], 0 }
  0x12   :  { %25 = vsyncpa [#allocation19], 0 }
  0x13   :  { %26 = vsyncpa [#allocation22], 0 }
  0x14   :  { %27 = vsyncpa [#allocation8], 0 }
  0x15   :  { %29 = vsyncpa [#allocation8 + $0x1], 0 }
  0x16   :  { %30 = vsyncpa [#allocation25], 0 }
  0x17   :  { %32 = vsyncpa [#allocation25 + $0x1], 0  ;;  %s4335_s17 = smov 0   ;;  %s4337_s18 = smov 0  }
  0x18   :  { %s4339_s19 = smov 0   ;;  %s4341_s20 = smov 0  }
  0x19   :  { %s4343_s21 = smov 0   ;;  %s4345_s22 = smov 0  }
  0x1a LB: > { %5705 = sst [smem:[#allocation35_spill]] %s4244_s20  ;;  %s4366_s23 = sadd.s32 4294967295, %s4252_s22   ;;  %s4252_s22 = sphi %s4345_s22, %s38_s22   ;;  %s4248_s21 = sphi %s4343_s21, %s5774_s21   ;;  %s4244_s20 = sphi %s4341_s20, %s5773_s20   ;;  %s4240_s19 = sphi %s4339_s19, %s5772_s19   ;;  %s4236_s18 = sphi %s4337_s18, %s5771_s18   ;;  %s4232_s17 = sphi %s4335_s17, %s5770_s17  }
  0x1b   : > { %p3067_p0 = scmp.ge.s32.totalorder %s4252_s22, 1  ;;  %p5683_p1 = scmp.eq.s32.totalorder %s4366_s23, 0 }
  0x1c   : > { %p333_p2 = scmp.lt.s32.totalorder %s4252_s22, 3  ;;  %s4254_s25 = smov [#allocation11]  }
  0x1d   : > { %s345_s26 = sshll.u32 %s4254_s25, 4  ;;  %s4255_s28 = smov [#allocation12]   ;;  %s4375_s26 = int_to_ptr.vmem [resolvable:$true] %s345_s26 }
  0x1e   : > { %p4371_p3 = pnand %p3067_p0, %p333_p2  ;;  %s359_s29 = sshll.u32 %s4255_s28, 4  ;;  %s4386_s29 = int_to_ptr.vmem [resolvable:$true] %s359_s29 }
  0x1f   : > { %s4256_s30 = smov [#allocation15]   ;;  %s5709_s2 = sld [smem:[#allocation44_spill]] }
  0x20   : > { %s5706_s24 = scalar_select %p4371_p3, 1, 0 }
  0x21   : > { %p3436_p4 = pneg %p4371_p3  ;;  %s4388_s12 = sshll.u32 %s4256_s30, 4  ;;  %s384_s12 = int_to_ptr.vmem [resolvable:$true] %s4388_s12 }
  0x22   : > { %5707 = sst [smem:[#allocation36_spill]] %s5706_s24 }
  0x23   : > { %p4382_p6 = pnand %p3436_p4, %p5683_p1 }
  0x25   : > { %s3830_s15 = scalar_lea.hbm %s5709_s2, 4096  ;;  %p4398_p8 = pneg %p4382_p6 }
  0x26   : > { %p3831_p7 = scmp.ne.s32.totalorder %s5709_s2, %s3830_s15  ;;  %p3837_p11 = scmp.lt.u32.totalorder %s3830_s15, %s5709_s2 }
  0x28   : > { %p3833_p9 = pnand %p4398_p8, %p3831_p7 }
  0x2a   : > { %p3834_p10 = pneg %p3833_p9 }
  0x2c   : > { %p3839_p12 = pnand %p3837_p11, %p3834_p10 }
  0x2e   : > { %3842 = shalt.err (!%p3839_p12)
}
  0x2f   : > { %s3843_s13 = scalar_lea.vmem %s4375_s26, 4096  ;;  %p3851_p4 = scmp.lt.s32.totalorder %s4375_s26, %s4375_s26 }
  0x30   : > { %p3844_p13 = scmp.ne.s32.totalorder %s4375_s26, %s3843_s13  ;;  %p3852_p5 = scmp.lt.s32.totalorder %s3843_s13, %s3843_s13 }
  0x32   : > { %p3846_p0 = pnand %p3844_p13, %p4398_p8  ;;  %p3853_p7 = por %p3852_p5, %p3851_p4 }
  0x34   : > { %p3847_p2 = pneg %p3846_p0 }
  0x36   : > { %p3854_p9 = pnand %p3853_p7, %p3847_p2 }
  0x38   : > { %3857 = shalt.err (!%p3854_p9)
}
  0x39   : > { %s5685_s14 = smov 128   ;;  %s5687_s15 = smov 8  }
  0x3a   : > { %3439 = dma.hbm_to_vmem [thread:$0]  (!%p4382_p6), %s5709_s2, 4096, %s4375_s26, [#allocation10], %s5685_s14, %s5685_s14, %s5687_s15  }
  0x3b   : > { %s5711_s3 = sld [smem:[#allocation45_spill]] }
  0x41   : > { %s3858_s13 = scalar_lea.hbm %s5711_s3, 32 }
  0x42   : > { %p3859_p5 = scmp.ne.s32.totalorder %s5711_s3, %s3858_s13  ;;  %p3865_p12 = scmp.lt.u32.totalorder %s3858_s13, %s5711_s3 }
  0x44   : > { %p3861_p10 = pnand %p3859_p5, %p4398_p8 }
  0x46   : > { %p3862_p11 = pneg %p3861_p10 }
  0x48   : > { %p3867_p13 = pnand %p3865_p12, %p3862_p11 }
  0x4a   : > { %3870 = shalt.err (!%p3867_p13)
}
  0x4b   : > { %s3871_s26 = scalar_lea.vmem %s4386_s29, 32  ;;  %p3879_p7 = scmp.lt.s32.totalorder %s4386_s29, %s4386_s29 }
  0x4c   : > { %p3872_p0 = scmp.ne.s32.totalorder %s4386_s29, %s3871_s26  ;;  %p3880_p9 = scmp.lt.s32.totalorder %s3871_s26, %s3871_s26 }
  0x4e   : > { %p3874_p2 = pnand %p3872_p0, %p4398_p8  ;;  %p3881_p5 = por %p3880_p9, %p3879_p7 }
  0x50   : > { %p3875_p4 = pneg %p3874_p2 }
  0x52   : > { %p3882_p10 = pnand %p3881_p5, %p3875_p4 }
  0x54   : > { %3885 = shalt.err (!%p3882_p10)
}
  0x55   : > { %3442 = dma.hbm_to_vmem [thread:$0]  (!%p4382_p6), %s5711_s3, 32, %s4386_s29, [#allocation13]  }
  0x56   : > { %s5712_s5 = sld [smem:[#allocation47_spill]] }
  0x5c   : > { %s3886_s16 = scalar_lea.hbm %s5712_s5, 32 }
  0x5d   : > { %p3887_p11 = scmp.ne.s32.totalorder %s5712_s5, %s3886_s16  ;;  %p3893_p0 = scmp.lt.u32.totalorder %s3886_s16, %s5712_s5 }
  0x5f   : > { %p3889_p12 = pnand %p3887_p11, %p4398_p8 }
  0x61   : > { %p3890_p13 = pneg %p3889_p12 }
  0x63   : > { %p3895_p2 = pnand %p3893_p0, %p3890_p13 }
  0x65   : > { %3898 = shalt.err (!%p3895_p2)
}
  0x66   : > { %s3899_s26 = scalar_lea.vmem %s384_s12, 32  ;;  %p3907_p5 = scmp.lt.s32.totalorder %s384_s12, %s384_s12 }
  0x67   : > { %p3900_p4 = scmp.ne.s32.totalorder %s384_s12, %s3899_s26  ;;  %p3908_p10 = scmp.lt.s32.totalorder %s3899_s26, %s3899_s26 }
  0x69   : > { %p3902_p7 = pnand %p3900_p4, %p4398_p8  ;;  %p3909_p1 = por %p3908_p10, %p3907_p5 }
  0x6b   : > { %p3903_p9 = pneg %p3902_p7 }
  0x6d   : > { %p3910_p3 = pnand %p3909_p1, %p3903_p9 }
  0x6f   : > { %3913 = shalt.err (!%p3910_p3)
}
  0x70   : > { %3448 = dma.hbm_to_vmem [thread:$0]  (!%p4382_p6), %s5712_s5, 32, %s384_s12, [#allocation16]  }
  0x71   : > { %s4259_s11 = smov [#allocation18]   ;;  %s4260_s24 = smov [#allocation14]  }
  0x72   : > { %s407_s20 = sshll.u32 %s4259_s11, 4  ;;  %s369_s16 = sshll.u32 %s4260_s24, 4  ;;  %s408_s20 = int_to_ptr.vmem [resolvable:$true] %s407_s20  ;;  %s370_s16 = int_to_ptr.vmem [resolvable:$true] %s369_s16 }
  0x73   : > { %s5713_s7 = sld [smem:[#allocation49_spill]] }
  0x79   : > { %s3914_s30 = scalar_lea.hbm %s5713_s7, 32 }
  0x7a   : > { %p3915_p1 = scmp.ne.s32.totalorder %s5713_s7, %s3914_s30  ;;  %p3921_p12 = scmp.lt.u32.totalorder %s3914_s30, %s5713_s7 }
  0x7c   : > { %p3917_p3 = pnand %p3915_p1, %p4398_p8 }
  0x7e   : > { %p3918_p11 = pneg %p3917_p3 }
  0x80   : > { %p3923_p13 = pnand %p3921_p12, %p3918_p11 }
  0x82   : > { %3926 = shalt.err (!%p3923_p13)
}
  0x83   : > { %s3927_s12 = scalar_lea.vmem %s408_s20, 32  ;;  %p3935_p7 = scmp.lt.s32.totalorder %s408_s20, %s408_s20 }
  0x84   : > { %p3928_p0 = scmp.ne.s32.totalorder %s408_s20, %s3927_s12  ;;  %p3936_p9 = scmp.lt.s32.totalorder %s3927_s12, %s3927_s12 }
  0x86   : > { %p3930_p2 = pnand %p3928_p0, %p4398_p8  ;;  %p3937_p5 = por %p3936_p9, %p3935_p7 }
  0x88   : > { %p3931_p4 = pneg %p3930_p2 }
  0x8a   : > { %p3938_p10 = pnand %p3937_p5, %p3931_p4 }
  0x8c   : > { %3941 = shalt.err (!%p3938_p10)
}
  0x8d   : > { %3454 = dma.hbm_to_vmem [thread:$0]  (!%p4382_p6), %s5713_s7, 32, %s408_s20, [#allocation19]  }
  0x8e   : > { %s5714_s4 = sld [smem:[#allocation46_spill]] }
  0x94   : > { %s3942_s25 = scalar_lea.hbm %s5714_s4, 2048 }
  0x95   : > { %p3943_p1 = scmp.ne.s32.totalorder %s5714_s4, %s3942_s25  ;;  %p3949_p12 = scmp.lt.u32.totalorder %s3942_s25, %s5714_s4 }
  0x97   : > { %p3945_p3 = pnand %p3943_p1, %p4398_p8 }
  0x99   : > { %p3946_p11 = pneg %p3945_p3 }
  0x9b   : > { %p3951_p13 = pnand %p3949_p12, %p3946_p11 }
  0x9d   : > { %3954 = shalt.err (!%p3951_p13)
}
  0x9e   : > { %s3955_s29 = scalar_lea.vmem %s370_s16, 2048  ;;  %p3963_p7 = scmp.lt.s32.totalorder %s370_s16, %s370_s16 }
  0x9f   : > { %p3956_p0 = scmp.ne.s32.totalorder %s370_s16, %s3955_s29  ;;  %p3964_p9 = scmp.lt.s32.totalorder %s3955_s29, %s3955_s29 }
  0xa1   : > { %p3958_p2 = pnand %p3956_p0, %p4398_p8  ;;  %p3965_p5 = por %p3964_p9, %p3963_p7 }
  0xa3   : > { %p3959_p4 = pneg %p3958_p2 }
  0xa5   : > { %p3966_p10 = pnand %p3965_p5, %p3959_p4 }
  0xa7   : > { %3969 = shalt.err (!%p3966_p10)
}
  0xa8   : > { %s5715_s20 = smov 128   ;;  %s4261_s11 = smov [#allocation17]  }
  0xa9   : > { %3445 = dma.hbm_to_vmem [thread:$0]  (!%p4382_p6), %s5714_s4, 2048, %s370_s16, [#allocation13], %s5715_s20, %s5715_s20, %s5687_s15  }
  0xaa   : > { %s393_s14 = sshll.u32 %s4261_s11, 4  ;;  %s4262_s24 = smov [#allocation20]   ;;  %s394_s14 = int_to_ptr.vmem [resolvable:$true] %s393_s14 }
  0xab   : > { %s417_s25 = sshll.u32 %s4262_s24, 4  ;;  %s5716_s6 = sld [smem:[#allocation48_spill]]  ;;  %s418_s25 = int_to_ptr.vmem [resolvable:$true] %s417_s25 }
  0xb1   : > { %s3970_s13 = scalar_lea.hbm %s5716_s6, 2048 }
  0xb2   : > { %p3971_p1 = scmp.ne.s32.totalorder %s5716_s6, %s3970_s13  ;;  %p3977_p12 = scmp.lt.u32.totalorder %s3970_s13, %s5716_s6 }
  0xb4   : > { %p3973_p3 = pnand %p3971_p1, %p4398_p8 }
  0xb6   : > { %p3974_p11 = pneg %p3973_p3 }
  0xb8   : > { %p3979_p13 = pnand %p3977_p12, %p3974_p11 }
  0xba   : > { %3982 = shalt.err (!%p3979_p13)
}
  0xbb   : > { %s3983_s16 = scalar_lea.vmem %s394_s14, 2048  ;;  %p3991_p7 = scmp.lt.s32.totalorder %s394_s14, %s394_s14 }
  0xbc   : > { %p3984_p0 = scmp.ne.s32.totalorder %s394_s14, %s3983_s16  ;;  %p3992_p9 = scmp.lt.s32.totalorder %s3983_s16, %s3983_s16 }
  0xbe   : > { %p3986_p2 = pnand %p3984_p0, %p4398_p8  ;;  %p3993_p5 = por %p3992_p9, %p3991_p7 }
  0xc0   : > { %p3987_p4 = pneg %p3986_p2 }
  0xc2   : > { %p3994_p10 = pnand %p3993_p5, %p3987_p4 }
  0xc4   : > { %3997 = shalt.err (!%p3994_p10)
}
  0xc5   : > { %3451 = dma.hbm_to_vmem [thread:$0]  (!%p4382_p6), %s5716_s6, 2048, %s394_s14, [#allocation16], %s5715_s20, %s5715_s20, %s5687_s15  }
  0xc6   : > { %s5717_s8 = sld [smem:[#allocation50_spill]] }
  0xcc   : > { %s3998_s28 = scalar_lea.hbm %s5717_s8, 4096 }
  0xcd   : > { %p3999_p1 = scmp.ne.s32.totalorder %s5717_s8, %s3998_s28  ;;  %p4005_p12 = scmp.lt.u32.totalorder %s3998_s28, %s5717_s8 }
  0xcf   : > { %p4001_p3 = pnand %p3999_p1, %p4398_p8 }
  0xd1   : > { %p4002_p11 = pneg %p4001_p3 }
  0xd3   : > { %p4007_p13 = pnand %p4005_p12, %p4002_p11 }
  0xd5   : > { %4010 = shalt.err (!%p4007_p13)
}
  0xd6   : > { %s4011_s12 = scalar_lea.vmem %s418_s25, 4096  ;;  %p4019_p7 = scmp.lt.s32.totalorder %s418_s25, %s418_s25 }
  0xd7   : > { %p4012_p0 = scmp.ne.s32.totalorder %s418_s25, %s4011_s12  ;;  %p4020_p9 = scmp.lt.s32.totalorder %s4011_s12, %s4011_s12 }
  0xd9   : > { %p4014_p2 = pnand %p4012_p0, %p4398_p8  ;;  %p4021_p5 = por %p4020_p9, %p4019_p7 }
  0xdb   : > { %p4015_p4 = pneg %p4014_p2 }
  0xdd   : > { %p4022_p10 = pnand %p4021_p5, %p4015_p4 }
  0xdf   : > { %4025 = shalt.err (!%p4022_p10)
}
  0xe0   : > { %3457 = dma.hbm_to_vmem [thread:$0]  (!%p4382_p6), %s5717_s8, 4096, %s418_s25, [#allocation19], %s5715_s20, %s5715_s20, %s5687_s15  }
  0xe1   : > { %s4263_s2 = smov [#allocation21]   ;;  %s4026_s28 = scalar_lea.hbm %s5675_s9, 32 }
  0xe2   : > { %s431_s1 = sshll.u32 %s4263_s2, 4  ;;  %p4027_p1 = scmp.ne.s32.totalorder %s5675_s9, %s4026_s28  ;;  %s432_s1 = int_to_ptr.vmem [resolvable:$true] %s431_s1 }
  0xe3   : > { %p4033_p12 = scmp.lt.u32.totalorder %s4026_s28, %s5675_s9 }
  0xe4   : > { %p4029_p3 = pnand %p4027_p1, %p4398_p8 }
  0xe6   : > { %p4030_p11 = pneg %p4029_p3 }
  0xe8   : > { %p4035_p13 = pnand %p4033_p12, %p4030_p11 }
  0xea   : > { %4038 = shalt.err (!%p4035_p13)
}
  0xeb   : > { %s4039_s25 = scalar_lea.vmem %s432_s1, 32  ;;  %p4047_p7 = scmp.lt.s32.totalorder %s432_s1, %s432_s1 }
  0xec   : > { %p4040_p0 = scmp.ne.s32.totalorder %s432_s1, %s4039_s25  ;;  %p4048_p9 = scmp.lt.s32.totalorder %s4039_s25, %s4039_s25 }
  0xee   : > { %p4042_p2 = pnand %p4040_p0, %p4398_p8  ;;  %p4049_p5 = por %p4048_p9, %p4047_p7 }
  0xf0   : > { %p4043_p4 = pneg %p4042_p2 }
  0xf2   : > { %p4050_p10 = pnand %p4049_p5, %p4043_p4 }
  0xf4   : > { %4053 = shalt.err (!%p4050_p10)
}
  0xf5   : > { %3460 = dma.hbm_to_vmem [thread:$0]  (!%p4382_p6), %s5675_s9, 32, %s432_s1, [#allocation22]  }
  0xf6   : > { %s3066_s10 = sadd.s32 4294967294, %s4252_s22   ;;  %s50_s16 = sadd.s32 1, %s4248_s21 }
  0xf7   : > { %p52_p8 = scmp.ge.s32.totalorder %s50_s16, 2  ;;  %s59_s27 = sadd.s32 1, %s4240_s19 }
  0xf8   : > { %p66_p1 = scmp.ne.s32.totalorder %s4240_s19, %s4236_s18  ;;  %p67_p3 = scmp.eq.s32.totalorder %s4252_s22, 0 }
  0xf9   : > { %s5776_s16 = smov (%p52_p8, %s50_s16), 0  ;;  %p72_p12 = scmp.ne.s32.totalorder %s4236_s18, %s4232_s17 }
  0xfa   : > { %p4571_p11 = por %p67_p3, %p66_p1  ;;  %s54_s1 = ssub.s32 %s4248_s21, %s5776_s16 }
  0xfb   : > { %p292_p6 = scmp.eq.s32.totalorder %s4366_s23, 1  ;;  %p57_p13 = scmp.eq.s32.totalorder %s54_s1, 0 }
  0xfc   : > { %p5719_p0 = scmp.eq.s32.totalorder %s4366_s23, 0  ;;  %p298_p7 = scmp.eq.s32.totalorder %s3066_s10, 1 }
  0xfd   : > { %p4586_p4 = por %p292_p6, %p66_p1  ;;  %p3483_p5 = scmp.lt.s32.totalorder %s4252_s22, 2 }
  0xfe   : > { %p4582_p2 = por %p5719_p0, %p72_p12  ;;  %p4593_p9 = por %p298_p7, %p72_p12 }
  0xff   : > { %s5721_s24 = scalar_select %p4586_p4, 1, 0 }
 0x100   : > { %s4591_s28 = scalar_select %p57_p13, %s4240_s19, %s59_s27  }
 0x101   : > { %s5722_s30 = scalar_select %p4593_p9, 1, 0 }
 0x102   : > { %s4599_s13 = sand.u32 1, %s4240_s19   ;;  %s3200_s26 = sshll.u32 %s4248_s21, 12 }
 0x103   : > { %s3077_s29 = sshll.u32 %s4599_s13, 8  ;;  %s5723_s0 = sld [smem:[#allocation42_spill]] }
 0x104   : > { %s446_s10 = scalar_lea.vmem [#allocation6], %s3077_s29  ;;  %p4610_p10 = pnand %p3483_p5, %p4571_p11 }
 0x105   : > { %s456_s27 = sshll.u32 %s446_s10, 4  ;;  %s443_s15 = scalar_lea.sflag [#allocation7], %s4599_s13  ;;  %s4614_s27 = int_to_ptr.vmem [resolvable:$true] %s456_s27 }
 0x106   : > { %p4056_p1 = pneg %p4610_p10 }
 0x109   : > { %s4606_s14 = scalar_lea.hbm %s5723_s0, %s3200_s26  ;;  %s4059_s2 = scalar_lea.hbm %s5723_s0, 8192 }
 0x10a   : > { %s4054_s3 = scalar_lea.hbm %s4606_s14, 4096  ;;  %p4060_p11 = scmp.lt.u32.totalorder %s4606_s14, %s5723_s0 }
 0x10b   : > { %p4055_p8 = scmp.ne.s32.totalorder %s4606_s14, %s4054_s3  ;;  %p4061_p6 = scmp.lt.u32.totalorder %s4059_s2, %s4054_s3 }
 0x10c   : > { %p4063_p0 = scmp.lt.u32.totalorder %s4054_s3, %s4606_s14 }
 0x10d   : > { %p4057_p3 = pnand %p4056_p1, %p4055_p8  ;;  %p4062_p13 = por %p4061_p6, %p4060_p11 }
 0x10f   : > { %p4058_p12 = pneg %p4057_p3  ;;  %p4064_p7 = por %p4063_p0, %p4062_p13 }
 0x111   : > { %p4065_p5 = pnand %p4064_p7, %p4058_p12 }
 0x113   : > { %4068 = shalt.err (!%p4065_p5)
}
 0x114   : > { %s4069_s10 = scalar_lea.vmem %s4614_s27, 4096  ;;  %s4264_s26 = smov [#allocation6]  }
 0x115   : > { %p4070_p8 = scmp.ne.s32.totalorder %s4614_s27, %s4069_s10  ;;  %s4074_s29 = sshll.u32 %s4264_s26, 4  ;;  %s4075_s29 = int_to_ptr.vmem [resolvable:$false] %s4074_s29 }
 0x116   : > { %s4076_s25 = scalar_lea.vmem %s4075_s29, 8192  ;;  %p4077_p4 = scmp.lt.s32.totalorder %s4614_s27, %s4075_s29 }
 0x117   : > { %p4072_p3 = pnand %p4070_p8, %p4056_p1  ;;  %p4078_p11 = scmp.lt.s32.totalorder %s4076_s25, %s4069_s10 }
 0x119   : > { %p4073_p9 = pneg %p4072_p3  ;;  %p4079_p6 = por %p4078_p11, %p4077_p4 }
 0x11b   : > { %p4080_p13 = pnand %p4079_p6, %p4073_p9 }
 0x11d   : > { %4083 = shalt.err (!%p4080_p13)
}
 0x11e   : > { %s4265_s3 = smov 256   ;;  %s4266_s2 = smov 16  }
 0x11f   : > { %3464 = dma.hbm_to_vmem [thread:$0]  (!%p4610_p10), %s4606_s14, 4096, %s4614_s27, %s443_s15, %s4265_s3, %s4265_s3, %s4266_s2  }
 0x120   : > { %s466_s12 = sand.u32 1, %s4252_s22   ;;  %s3080_s26 = sshll.u32 %s4599_s13, 7 }
 0x121   : > { %s3201_s29 = sshll.u32 %s4248_s21, 11  ;;  %s470_s10 = scalar_lea.vmem [#allocation9], %s3080_s26 }
 0x122   : > { %s477_s25 = sshll.u32 %s470_s10, 4  ;;  %s5725_s5 = sld [smem:[#allocation43_spill]]  ;;  %s4652_s25 = int_to_ptr.vmem [resolvable:$true] %s477_s25 }
 0x123   : > { %s4654_s7 = scalar_lea.sflag [#allocation10], %s466_s12 }
 0x128   : > { %s4650_s6 = scalar_lea.hbm %s5725_s5, %s3201_s29  ;;  %s4089_s0 = scalar_lea.hbm %s5725_s5, 4096 }
 0x129   : > { %s4084_s8 = scalar_lea.hbm %s4650_s6, 2048  ;;  %p4090_p0 = scmp.lt.u32.totalorder %s4650_s6, %s5725_s5 }
 0x12a   : > { %p4085_p4 = scmp.ne.s32.totalorder %s4650_s6, %s4084_s8  ;;  %p4091_p7 = scmp.lt.u32.totalorder %s4089_s0, %s4084_s8 }
 0x12b   : > { %p4093_p8 = scmp.lt.u32.totalorder %s4084_s8, %s4650_s6 }
 0x12c   : > { %p4087_p9 = pnand %p4085_p4, %p4056_p1  ;;  %p4092_p5 = por %p4091_p7, %p4090_p0 }
 0x12e   : > { %p4088_p12 = pneg %p4087_p9  ;;  %p4094_p3 = por %p4093_p8, %p4092_p5 }
 0x130   : > { %p4095_p11 = pnand %p4094_p3, %p4088_p12 }
 0x132   : > { %4098 = shalt.err (!%p4095_p11)
}
 0x133   : > { %s4099_s27 = scalar_lea.vmem %s4652_s25, 2048  ;;  %s4267_s3 = smov [#allocation9]  }
 0x134   : > { %p4100_p6 = scmp.ne.s32.totalorder %s4652_s25, %s4099_s27  ;;  %s4104_s2 = sshll.u32 %s4267_s3, 4  ;;  %s4105_s2 = int_to_ptr.vmem [resolvable:$false] %s4104_s2 }
 0x135   : > { %s4106_s12 = scalar_lea.vmem %s4105_s2, 4096  ;;  %p4107_p9 = scmp.lt.s32.totalorder %s4652_s25, %s4105_s2 }
 0x136   : > { %p4102_p13 = pnand %p4100_p6, %p4056_p1  ;;  %p4108_p0 = scmp.lt.s32.totalorder %s4106_s12, %s4099_s27 }
 0x138   : > { %p4103_p4 = pneg %p4102_p13  ;;  %p4109_p7 = por %p4108_p0, %p4107_p9 }
 0x13a   : > { %p4110_p5 = pnand %p4109_p7, %p4103_p4 }
 0x13c   : > { %4113 = shalt.err (!%p4110_p5)
}
 0x13d   : > { %s5726_s8 = smov 8   ;;  %s5727_s26 = sld [smem:[#allocation36_spill]] }
 0x13e   : > { %3467 = dma.hbm_to_vmem [thread:$0]  (!%p4610_p10), %s4650_s6, 2048, %s4652_s25, %s4654_s7, %s5715_s20, %s5715_s20, %s5726_s8  }
 0x143   : > { %p5728_p1 = scmp.ne.s32.totalorder %s5727_s26, 0 }
 0x145   : > { %489 = sbr.rel (%p5728_p1) target bundleno = 1870 (0x74e), region = 60 }
 0x14c   : > { %s4686_s29 = sand.u32 1, %s4236_s18  }
 0x14d   : > { %s3084_s10 = sshll.u32 %s4686_s29, 8  ;;  %s492_s15 = scalar_lea.sflag [#allocation7], %s4686_s29 }
 0x14e   : > { %s4692_s1 = scalar_lea.vmem [#allocation6], %s3084_s10 }
 0x14f   : > { %4195 = dma.done.wait (%p4582_p2), %s492_s15, 4096  }
 0x150   : > { %4197 = vsyncadd (%p4582_p2), %s492_s15, 4294963200  ;;  %s500_s6 = sand.u32 1, %s4366_s23   ;;  %s3085_s7 = sshll.u32 %s4686_s29, 7 }
 0x151   : > { %s501_s20 = scalar_lea.sflag [#allocation10], %s500_s6  ;;  %s4702_s25 = scalar_lea.vmem [#allocation9], %s3085_s7 }
 0x152   : > { %4199 = dma.done.wait (%p4582_p2), %s501_s20, 2048  }
 0x153   : > { %4201 = vsyncadd (%p4582_p2), %s501_s20, 4294965248  ;;  %p5729_p10 = scmp.eq.s32.totalorder %s4366_s23, 0 }
 0x155   : > { %4203 = dma.done.wait (%p5729_p10), [#allocation10], 4096   ;;  %p5730_p12 = pmov %p5729_p10 }
 0x156   : > { %p5731_p8 = pmov %p5729_p10 }
 0x157   : > { %4205 = vsyncadd (%p5730_p12), [#allocation10], 4294963200 }
 0x158   : > { %4207 = dma.done.wait (%p5731_p8), [#allocation13], 2080   ;;  %p5732_p3 = pmov %p5731_p8 }
 0x15a   : > { %4209 = vsyncadd (%p5732_p3), [#allocation13], 4294965216  ;;  %p5733_p11 = pmov %p5732_p3 }
 0x15b   : > { %p5734_p6 = pmov %p5732_p3 }
 0x15c   : > { %4211 = dma.done.wait (%p5733_p11), [#allocation16], 2080  }
 0x15d   : > { %4213 = vsyncadd (%p5734_p6), [#allocation16], 4294965216  ;;  %p5735_p2 = pmov %p5732_p3 }
 0x15f   : > { %4215 = dma.done.wait (%p5735_p2), [#allocation19], 4128   ;;  %p5736_p13 = pmov %p5735_p2 }
 0x160   : > { %p5737_p4 = pmov %p5735_p2 }
 0x161   : > { %4217 = vsyncadd (%p5736_p13), [#allocation19], 4294963168 }
 0x162   : > { %4219 = dma.done.wait (%p5737_p4), [#allocation22], 32   ;;  %p5738_p9 = pmov %p5735_p2 }
 0x163   : > { %v4268_v0 = vmov 0   ;;  %v3558_v1 = vld [vmem:[#allocation14 + $0x4] ss:$8 sps:$4 sm:$0xff]   ;;  %v3560_v2 = vld [vmem:[#allocation14] ss:$8 sps:$4 sm:$0xff]   ;;  %v596_v24 = vld [vmem:[%s4702_s25 + $0x18] sm:$0xff] }
 0x164   : > { %4221 = vsyncadd (%p5738_p9), [#allocation22], 4294967264  ;;  %757 = vmatprep.mubr.bf16.mxu0 %v4268_v0  ;;  %978 = vmatprep.mubr.bf16.mxu1 %v4268_v0  ;;  %v3561_v3 = vld [vmem:[#allocation14 + $0x14] ss:$8 sps:$4 sm:$0xff]   ;;  %v3563_v4 = vld [vmem:[#allocation14 + $0x10] ss:$8 sps:$4 sm:$0xff]  }
 0x165   : > { %725 = vmatprep.subr.bf16.mxu0 %v3558_v1  ;;  %v3564_v5 = vld [vmem:[#allocation14 + $0x24] ss:$8 sps:$4 sm:$0xff]   ;;  %v3566_v6 = vld [vmem:[#allocation14 + $0x20] ss:$8 sps:$4 sm:$0xff]   ;;  %v3567_v7 = vld [vmem:[#allocation14 + $0x34] ss:$8 sps:$4 sm:$0xff]  }
 0x166   : > { %726 = vmatpush1.bf16.msra.mxu0 %v3560_v2  ;;  %v3569_v8 = vld [vmem:[#allocation14 + $0x30] ss:$8 sps:$4 sm:$0xff]   ;;  %v3570_v9 = vld [vmem:[#allocation14 + $0x44] ss:$8 sps:$4 sm:$0xff]   ;;  %v3572_v10 = vld [vmem:[#allocation14 + $0x40] ss:$8 sps:$4 sm:$0xff]  }
 0x167   : > { %727 = vmatprep.subr.bf16.mxu0 %v3561_v3  ;;  %v3573_v11 = vld [vmem:[#allocation14 + $0x54] ss:$8 sps:$4 sm:$0xff]   ;;  %v3575_v12 = vld [vmem:[#allocation14 + $0x50] ss:$8 sps:$4 sm:$0xff]   ;;  %v3576_v13 = vld [vmem:[#allocation14 + $0x64] ss:$8 sps:$4 sm:$0xff]  }
 0x168   : > { %v3578_v14 = vld [vmem:[#allocation14 + $0x60] ss:$8 sps:$4 sm:$0xff]   ;;  %v3579_v15 = vld [vmem:[#allocation14 + $0x74] ss:$8 sps:$4 sm:$0xff]   ;;  %v3581_v16 = vld [vmem:[#allocation14 + $0x70] ss:$8 sps:$4 sm:$0xff]  }
 0x169   : > { %v593_v17 = vld [vmem:[%s4702_s25] sm:$0xff]  ;;  %v594_v18 = vld [vmem:[%s4702_s25 + $0x8] sm:$0xff]  ;;  %v3587_v22 = vld [vmem:[#allocation11 + $0x14] ss:$8 sps:$4 sm:$0xff]   ;;  %s5458_s23 = scalar_lea.vmem [#allocation24], %s3085_s7  ;;  %s5762_s11 = sld [smem:[#allocation35_spill]] }
 0x16a   : > { %728 = vmatpush1.bf16.msra.mxu0 %v3563_v4  ;;  %v3584_v19 = vld [vmem:[#allocation11 + $0x4] ss:$8 sps:$4 sm:$0xff]   ;;  %v4732_v20 = vpack.c.bf16 %v594_v18, %v593_v17  ;;  %v3582_v21 = vld [vmem:[#allocation11] ss:$8 sps:$4 sm:$0xff]   ;;  %v595_v23 = vld [vmem:[%s4702_s25 + $0x10] sm:$0xff]  ;;  %s2844_s0 = sshll.u32 %s5458_s23, 4  ;;  %s5510_s0 = int_to_ptr.vmem [resolvable:$true] %s2844_s0 }
 0x16b   : > { %729 = vmatprep.subr.bf16.mxu0 %v3564_v5  ;;  %v3585_v25 = vld [vmem:[#allocation11 + $0x10] ss:$8 sps:$4 sm:$0xff]   ;;  %v3590_v26 = vld [vmem:[#allocation11 + $0x24] ss:$8 sps:$4 sm:$0xff]   ;;  %v4738_v27 = vpack.c.bf16 %v596_v24, %v595_v23  ;;  %v3588_v28 = vld [vmem:[#allocation11 + $0x20] ss:$8 sps:$4 sm:$0xff]  }
 0x16c   : > { %v3593_v29 = vld [vmem:[#allocation11 + $0x34] ss:$8 sps:$4 sm:$0xff]   ;;  %v597_v30 = vld [vmem:[%s4702_s25 + $0x20] sm:$0xff]  ;;  %v598_v31 = vld [vmem:[%s4702_s25 + $0x28] sm:$0xff]  ;;  %s5763_s27 = sld [smem:[#allocation52_spill]]  ;;  %s2810_s2 = scalar_lea.sflag [#allocation25], %s4686_s29 }
 0x16d   : > { %v3591_v32 = vld [vmem:[#allocation11 + $0x30] ss:$8 sps:$4 sm:$0xff]   ;;  %v3596_v33 = vld [vmem:[#allocation11 + $0x44] ss:$8 sps:$4 sm:$0xff]   ;;  %v4744_v34 = vpack.c.bf16 %v598_v31, %v597_v30  ;;  %v3594_v35 = vld [vmem:[#allocation11 + $0x40] ss:$8 sps:$4 sm:$0xff]  }
 0x16e   : > { %730 = vmatpush1.bf16.msra.mxu0 %v3566_v6  ;;  %v3599_v36 = vld [vmem:[#allocation11 + $0x54] ss:$8 sps:$4 sm:$0xff]   ;;  %v3597_v39 = vld [vmem:[#allocation11 + $0x50] ss:$8 sps:$4 sm:$0xff]   ;;  %v3602_v40 = vld [vmem:[#allocation11 + $0x64] ss:$8 sps:$4 sm:$0xff]  }
 0x16f   : > { %731 = vmatprep.subr.bf16.mxu0 %v3567_v7  ;;  %v599_v37 = vld [vmem:[%s4702_s25 + $0x30] sm:$0xff]  ;;  %v600_v38 = vld [vmem:[%s4702_s25 + $0x38] sm:$0xff]  ;;  %v3600_v41 = vld [vmem:[#allocation11 + $0x60] ss:$8 sps:$4 sm:$0xff]   ;;  %s3203_s13 = sshll.u32 %s5762_s11, 11  ;;  %s4114_s12 = scalar_lea.vmem %s5510_s0, 2048 }
 0x170   : > { %v4750_v42 = vpack.c.bf16 %v600_v38, %v599_v37  ;;  %v3605_v43 = vld [vmem:[#allocation11 + $0x74] ss:$8 sps:$4 sm:$0xff]   ;;  %v601_v44 = vld [vmem:[%s4702_s25 + $0x40] sm:$0xff]  ;;  %v602_v45 = vld [vmem:[%s4702_s25 + $0x48] sm:$0xff]  ;;  %p4115_p0 = scmp.ne.s32.totalorder %s5510_s0, %s4114_s12  ;;  %p5764_p7 = scmp.ne.s32.totalorder %s5721_s24, 0 }
 0x171   : > { %v3603_v46 = vld [vmem:[#allocation11 + $0x70] ss:$8 sps:$4 sm:$0xff]   ;;  %v3608_v47 = vld [vmem:[#allocation11 + $0x84] ss:$8 sps:$4 sm:$0xff]   ;;  %v4756_v48 = vpack.c.bf16 %v602_v45, %v601_v44  ;;  %v3606_v49 = vld [vmem:[#allocation11 + $0x80] ss:$8 sps:$4 sm:$0xff]  }
 0x172   : > { %732 = vmatpush1.bf16.msra.mxu0 %v3569_v8  ;;  %v3611_v50 = vld [vmem:[#allocation11 + $0x94] ss:$8 sps:$4 sm:$0xff]   ;;  %v3609_v53 = vld [vmem:[#allocation11 + $0x90] ss:$8 sps:$4 sm:$0xff]   ;;  %v3614_v54 = vld [vmem:[#allocation11 + $0xa4] ss:$8 sps:$4 sm:$0xff]   ;;  %s5508_s3 = scalar_lea.hbm %s5763_s27, %s3203_s13  ;;  %p4116_p5 = pnand %p4115_p0, %p5764_p7 }
 0x173   : > { %733 = vmatprep.subr.bf16.mxu0 %v3570_v9  ;;  %v603_v51 = vld [vmem:[%s4702_s25 + $0x50] sm:$0xff]  ;;  %v604_v52 = vld [vmem:[%s4702_s25 + $0x58] sm:$0xff]  ;;  %v3612_v56 = vld [vmem:[#allocation11 + $0xa0] ss:$8 sps:$4 sm:$0xff]   ;;  %s4269_s8 = smov [#allocation24]  }
 0x174   : > { %v4762_v55 = vpack.c.bf16 %v604_v52, %v603_v51  ;;  %v3617_v57 = vld [vmem:[#allocation11 + $0xb4] ss:$8 sps:$4 sm:$0xff]   ;;  %v605_v58 = vld [vmem:[%s4702_s25 + $0x60] sm:$0xff]  ;;  %v606_v59 = vld [vmem:[%s4702_s25 + $0x68] sm:$0xff]  ;;  %p4117_p1 = pneg %p4116_p5  ;;  %s4118_s26 = sshll.u32 %s4269_s8, 4  ;;  %s4119_s26 = int_to_ptr.vmem [resolvable:$false] %s4118_s26 }
 0x175   : > { %v3615_v60 = vld [vmem:[#allocation11 + $0xb0] ss:$8 sps:$4 sm:$0xff]   ;;  %v3620_v61 = vld [vmem:[#allocation11 + $0xc4] ss:$8 sps:$4 sm:$0xff]   ;;  %v4768_v62 = vpack.c.bf16 %v606_v59, %v605_v58  ;;  %v3618_v63 = vld [vmem:[#allocation11 + $0xc0] ss:$8 sps:$4 sm:$0xff]   ;;  %p4121_p10 = scmp.lt.s32.totalorder %s5510_s0, %s4119_s26 }
 0x176   : > { %734 = vmatpush1.bf16.msra.mxu0 %v3572_v10  ;;  %v3623_v1 = vld [vmem:[#allocation11 + $0xd4] ss:$8 sps:$4 sm:$0xff]   ;;  %v3621_v4 = vld [vmem:[#allocation11 + $0xd0] ss:$8 sps:$4 sm:$0xff]   ;;  %v3626_v5 = vld [vmem:[#allocation11 + $0xe4] ss:$8 sps:$4 sm:$0xff]  }
 0x177   : > { %735 = vmatprep.subr.bf16.mxu0 %v3573_v11  ;;  %v607_v2 = vld [vmem:[%s4702_s25 + $0x70] sm:$0xff]  ;;  %v608_v3 = vld [vmem:[%s4702_s25 + $0x78] sm:$0xff]  ;;  %v1190_v6 = vld [vmem:[%s4692_s1 + $0x8] sm:$0xff]  ;;  %s4120_s15 = scalar_lea.vmem %s4119_s26, 4096 }
 0x178   : > { %v1192_v7 = vld [vmem:[%s4692_s1 + $0x18] sm:$0xff]  ;;  %v4776_v8 = vpack.c.bf16 %v608_v3, %v607_v2  ;;  %v3624_v9 = vld [vmem:[#allocation11 + $0xe0] ss:$8 sps:$4 sm:$0xff]   ;;  %v3632_v3 = vld [vmem:[#allocation17] ss:$8 sps:$4 sm:$0xff]   ;;  %p4122_p12 = scmp.lt.s32.totalorder %s4120_s15, %s4114_s12 }
 0x179   : > { %v1222_v10 = vpack.c.bf16 %v1192_v7, %v1190_v6  ;;  %v3629_v11 = vld [vmem:[#allocation11 + $0xf4] ss:$8 sps:$4 sm:$0xff]   ;;  %v3630_v2 = vld [vmem:[#allocation17 + $0x4] ss:$8 sps:$4 sm:$0xff]   ;;  %v3638_v7 = vld [vmem:[#allocation17 + $0x20] ss:$8 sps:$4 sm:$0xff]  }
 0x17a   : > { %736 = vmatpush1.bf16.msra.mxu0 %v3575_v12  ;;  %v3627_v12 = vld [vmem:[#allocation11 + $0xf0] ss:$8 sps:$4 sm:$0xff]   ;;  %946 = vmatprep.subr.bf16.mxu1 %v3630_v2  ;;  %p4123_p8 = por %p4122_p12, %p4121_p10 }
 0x17b   : > { %737 = vmatprep.subr.bf16.mxu0 %v3576_v13  ;;  %v1189_v13 = vld [vmem:[%s4692_s1] sm:$0xff]  ;;  %v1200_v23 = vld [vmem:[%s4692_s1 + $0x58] sm:$0xff]  ;;  %947 = vmatpush1.bf16.msra.mxu1 %v3632_v3  ;;  %v3636_v6 = vld [vmem:[#allocation17 + $0x24] ss:$8 sps:$4 sm:$0xff]  }
 0x17c   : > { %v1204_v30 = vld [vmem:[%s4692_s1 + $0x78] sm:$0xff]  ;;  %p4124_p3 = pnand %p4123_p8, %p4117_p1 }
 0x17d   : > { %v1208_v37 = vld [vmem:[%s4692_s1 + $0x98] sm:$0xff] }
 0x17e   : > { %738 = vmatpush1.bf16.msra.mxu0 %v3578_v14  ;;  %v1191_v14 = vld [vmem:[%s4692_s1 + $0x10] sm:$0xff]  ;;  %v1212_v44 = vld [vmem:[%s4692_s1 + $0xb8] sm:$0xff] }
 0x17f   : > { %739 = vmatprep.subr.bf16.mxu0 %v3579_v15  ;;  %v1194_v15 = vld [vmem:[%s4692_s1 + $0x28] sm:$0xff]  ;;  %v1221_v17 = vpack.c.bf16 %v1191_v14, %v1189_v13  ;;  %v1216_v51 = vld [vmem:[%s4692_s1 + $0xd8] sm:$0xff] }
 0x180   : > { %v1220_v58 = vld [vmem:[%s4692_s1 + $0xf8] sm:$0xff] }
 0x181   : > { %v3645_v13 = vld [vmem:[#allocation17 + $0x54] ss:$8 sps:$4 sm:$0xff]   ;;  %v3647_v14 = vld [vmem:[#allocation17 + $0x50] ss:$8 sps:$4 sm:$0xff]  }
 0x182   : > { %740 = vmatpush1.bf16.msra.mxu0 %v3581_v16  ;;  %v1196_v16 = vld [vmem:[%s4692_s1 + $0x38] sm:$0xff] }
 0x183   : > { %1441 = vmatprep.subr.bf16.mxu0 %v3584_v19  ;;  %v1224_v18 = vpack.c.bf16 %v1196_v16, %v1194_v15  ;;  %v1193_v19 = vld [vmem:[%s4692_s1 + $0x20] sm:$0xff]  ;;  %v3648_v15 = vld [vmem:[#allocation17 + $0x64] ss:$8 sps:$4 sm:$0xff]  }
 0x184   : > { %v3650_v16 = vld [vmem:[#allocation17 + $0x60] ss:$8 sps:$4 sm:$0xff]  }
 0x185   : > { %758 = vmatmul.mubr.bf16.vlgmr.msra.gmra.mrb[0].mxu0 %v4732_v20 }
 0x186   : > { %767 = vmatprep.mubr.bf16.mxu0 %v4268_v0  ;;  %1442 = vmatpush1.bf16.msra.mxu0 %v3582_v21  ;;  %v1195_v21 = vld [vmem:[%s4692_s1 + $0x30] sm:$0xff] }
 0x187   : > { %1443 = vmatprep.subr.bf16.mxu0 %v3587_v22  ;;  %v1198_v22 = vld [vmem:[%s4692_s1 + $0x48] sm:$0xff]  ;;  %v1223_v24 = vpack.c.bf16 %v1195_v21, %v1193_v19  ;;  %v635_v19 = vlaneseq  ;;  %v633_v21 = vld [vmem:[#allocation15] sm:$0x3] }
 0x18a   : > { %1444 = vmatpush1.bf16.msra.mxu0 %v3585_v25  ;;  %v1226_v25 = vpack.c.bf16 %v1200_v23, %v1198_v22 }
 0x18b   : > { %1445 = vmatprep.subr.bf16.mxu0 %v3590_v26  ;;  %v1197_v26 = vld [vmem:[%s4692_s1 + $0x40] sm:$0xff] }
 0x18d   : > { %768 = vmatmul.mubr.bf16.gmra.mrb[4].mxu0 %v4738_v27 }
 0x18e   : > { %777 = vmatprep.mubr.bf16.mxu0 %v4268_v0  ;;  %1446 = vmatpush1.bf16.msra.mxu0 %v3588_v28  ;;  %v1199_v28 = vld [vmem:[%s4692_s1 + $0x50] sm:$0xff] }
 0x18f   : > { %1447 = vmatprep.subr.bf16.mxu0 %v3593_v29  ;;  %v1202_v29 = vld [vmem:[%s4692_s1 + $0x68] sm:$0xff]  ;;  %v1225_v31 = vpack.c.bf16 %v1199_v28, %v1197_v26 }
 0x192   : > { %1448 = vmatpush1.bf16.msra.mxu0 %v3591_v32  ;;  %v1228_v32 = vpack.c.bf16 %v1204_v30, %v1202_v29 }
 0x193   : > { %1449 = vmatprep.subr.bf16.mxu0 %v3596_v33  ;;  %v1201_v33 = vld [vmem:[%s4692_s1 + $0x60] sm:$0xff] }
 0x195   : > { %778 = vmatmul.mubr.bf16.gmra.mrb[8].mxu0 %v4744_v34 }
 0x196   : > { %787 = vmatprep.mubr.bf16.mxu0 %v4268_v0  ;;  %1450 = vmatpush1.bf16.msra.mxu0 %v3594_v35  ;;  %v1203_v35 = vld [vmem:[%s4692_s1 + $0x70] sm:$0xff] }
 0x197   : > { %1451 = vmatprep.subr.bf16.mxu0 %v3599_v36  ;;  %v1206_v36 = vld [vmem:[%s4692_s1 + $0x88] sm:$0xff]  ;;  %v1227_v38 = vpack.c.bf16 %v1203_v35, %v1201_v33 }
 0x19a   : > { %1452 = vmatpush1.bf16.msra.mxu0 %v3597_v39  ;;  %v1230_v39 = vpack.c.bf16 %v1208_v37, %v1206_v36 }
 0x19b   : > { %1453 = vmatprep.subr.bf16.mxu0 %v3602_v40  ;;  %v1205_v40 = vld [vmem:[%s4692_s1 + $0x80] sm:$0xff] }
 0x19d   : > { %788 = vmatmul.mubr.bf16.gmra.mrb[12].mxu0 %v4750_v42 }
 0x19e   : > { %797 = vmatprep.mubr.bf16.mxu0 %v4268_v0  ;;  %1454 = vmatpush1.bf16.msra.mxu0 %v3600_v41  ;;  %v1207_v41 = vld [vmem:[%s4692_s1 + $0x90] sm:$0xff] }
 0x19f   : > { %1455 = vmatprep.subr.bf16.mxu0 %v3605_v43  ;;  %v1210_v43 = vld [vmem:[%s4692_s1 + $0xa8] sm:$0xff]  ;;  %v1229_v45 = vpack.c.bf16 %v1207_v41, %v1205_v40 }
 0x1a2   : > { %1456 = vmatpush1.bf16.msra.mxu0 %v3603_v46  ;;  %v1232_v46 = vpack.c.bf16 %v1212_v44, %v1210_v43 }
 0x1a3   : > { %1457 = vmatprep.subr.bf16.mxu0 %v3608_v47  ;;  %v1209_v47 = vld [vmem:[%s4692_s1 + $0xa0] sm:$0xff] }
 0x1a5   : > { %798 = vmatmul.mubr.bf16.gmra.mrb[16].mxu0 %v4756_v48 }
 0x1a6   : > { %807 = vmatprep.mubr.bf16.mxu0 %v4268_v0  ;;  %1458 = vmatpush1.bf16.msra.mxu0 %v3606_v49  ;;  %v1211_v49 = vld [vmem:[%s4692_s1 + $0xb0] sm:$0xff] }
 0x1a7   : > { %1459 = vmatprep.subr.bf16.mxu0 %v3611_v50  ;;  %v1214_v50 = vld [vmem:[%s4692_s1 + $0xc8] sm:$0xff]  ;;  %v1231_v52 = vpack.c.bf16 %v1211_v49, %v1209_v47 }
 0x1aa   : > { %1460 = vmatpush1.bf16.msra.mxu0 %v3609_v53  ;;  %v1234_v53 = vpack.c.bf16 %v1216_v51, %v1214_v50 }
 0x1ab   : > { %1461 = vmatprep.subr.bf16.mxu0 %v3614_v54  ;;  %v1213_v54 = vld [vmem:[%s4692_s1 + $0xc0] sm:$0xff] }
 0x1ad   : > { %808 = vmatmul.mubr.bf16.gmra.mrb[20].mxu0 %v4762_v55 }
 0x1ae   : > { %817 = vmatprep.mubr.bf16.mxu0 %v4268_v0  ;;  %1462 = vmatpush1.bf16.msra.mxu0 %v3612_v56  ;;  %v1215_v56 = vld [vmem:[%s4692_s1 + $0xd0] sm:$0xff] }
 0x1af   : > { %1463 = vmatprep.subr.bf16.mxu0 %v3617_v57  ;;  %v1218_v57 = vld [vmem:[%s4692_s1 + $0xe8] sm:$0xff]  ;;  %v1233_v59 = vpack.c.bf16 %v1215_v56, %v1213_v54 }
 0x1b2   : > { %1464 = vmatpush1.bf16.msra.mxu0 %v3615_v60  ;;  %v1236_v60 = vpack.c.bf16 %v1220_v58, %v1218_v57 }
 0x1b3   : > { %1465 = vmatprep.subr.bf16.mxu0 %v3620_v61  ;;  %v1217_v61 = vld [vmem:[%s4692_s1 + $0xe0] sm:$0xff] }
 0x1b5   : > { %818 = vmatmul.mubr.bf16.gmra.mrb[24].mxu0 %v4768_v62 }
 0x1b6   : > { %827 = vmatprep.mubr.bf16.mxu0 %v4268_v0  ;;  %1466 = vmatpush1.bf16.msra.mxu0 %v3618_v63  ;;  %v1219_v63 = vld [vmem:[%s4692_s1 + $0xf0] sm:$0xff] }
 0x1b7   : > { %1467 = vmatprep.subr.bf16.mxu0 %v3623_v1  ;;  %v1235_v1 = vpack.c.bf16 %v1219_v63, %v1217_v61 }
 0x1ba   : > { %1468 = vmatpush1.bf16.msra.mxu0 %v3621_v4  ;;  %v3633_v4 = vld [vmem:[#allocation17 + $0x14] ss:$8 sps:$4 sm:$0xff]  }
 0x1bb   : > { %1469 = vmatprep.subr.bf16.mxu0 %v3626_v5  ;;  %v3635_v5 = vld [vmem:[#allocation17 + $0x10] ss:$8 sps:$4 sm:$0xff]   ;;  %948 = vmatprep.subr.bf16.mxu1 %v3633_v4 }
 0x1bc   : > { %949 = vmatpush1.bf16.msra.mxu1 %v3635_v5 }
 0x1bd   : > { %828 = vmatmul.mubr.bf16.gmra.mrb[28].mxu0 %v4776_v8  ;;  %950 = vmatprep.subr.bf16.mxu1 %v3636_v6 }
 0x1be   : > { %1470 = vmatpush1.bf16.msra.mxu0 %v3624_v9  ;;  %1473 = vmatprep.mubr.bf16.mxu0 %v1222_v10  ;;  %v3639_v9 = vld [vmem:[#allocation17 + $0x34] ss:$8 sps:$4 sm:$0xff]   ;;  %v3641_v10 = vld [vmem:[#allocation17 + $0x30] ss:$8 sps:$4 sm:$0xff]  }
 0x1bf   : > { %1471 = vmatprep.subr.bf16.mxu0 %v3629_v11  ;;  %v3642_v11 = vld [vmem:[#allocation17 + $0x44] ss:$8 sps:$4 sm:$0xff]  }
 0x1c0   : > { %951 = vmatpush1.bf16.msra.mxu1 %v3638_v7 }
 0x1c1   : > { %952 = vmatprep.subr.bf16.mxu1 %v3639_v9 }
 0x1c2   : > { %1472 = vmatpush1.bf16.msra.mxu0 %v3627_v12  ;;  %v3644_v12 = vld [vmem:[#allocation17 + $0x40] ss:$8 sps:$4 sm:$0xff]  }
 0x1c4   : > { %953 = vmatpush1.bf16.msra.mxu1 %v3641_v10 }
 0x1c5   : > { %1474 = vmatmul.mubr.bf16.vlgmr.msra.gmra.mrb[32].mxu0 %v1221_v17  ;;  %954 = vmatprep.subr.bf16.mxu1 %v3642_v11  ;;  %v3651_v17 = vld [vmem:[#allocation17 + $0x74] ss:$8 sps:$4 sm:$0xff]  }
 0x1c6   : > { %1483 = vmatprep.mubr.bf16.mxu0 %v1224_v18  ;;  %v3653_v18 = vld [vmem:[#allocation17 + $0x70] ss:$8 sps:$4 sm:$0xff]  }
 0x1c8   : > { %955 = vmatpush1.bf16.msra.mxu1 %v3644_v12 }
 0x1c9   : > { %956 = vmatprep.subr.bf16.mxu1 %v3645_v13 }
 0x1cc   : > { %957 = vmatpush1.bf16.msra.mxu1 %v3647_v14 }
 0x1cd   : > { %1484 = vmatmul.mubr.bf16.gmra.mrb[36].mxu0 %v1223_v24  ;;  %958 = vmatprep.subr.bf16.mxu1 %v3648_v15 }
 0x1ce   : > { %1493 = vmatprep.mubr.bf16.mxu0 %v1226_v25 }
 0x1d0   : > { %959 = vmatpush1.bf16.msra.mxu1 %v3650_v16 }
 0x1d1   : > { %960 = vmatprep.subr.bf16.mxu1 %v3651_v17 }
 0x1d4   : > { %961 = vmatpush1.bf16.msra.mxu1 %v3653_v18 }
 0x1d5   : > { %1494 = vmatmul.mubr.bf16.gmra.mrb[40].mxu0 %v1225_v31 }
 0x1d6   : > { %1503 = vmatprep.mubr.bf16.mxu0 %v1228_v32 }
 0x1d7   : > { %979 = vmatmul.mubr.bf16.vlgmr.msra.gmra.mrb[0].mxu1 %v4732_v20  ;;  %v636_v20 = vshrl.u32 %v635_v19, 7 }
 0x1d8   : > { %988 = vmatprep.mubr.bf16.mxu1 %v4268_v0 }
 0x1dd   : > { %1504 = vmatmul.mubr.bf16.gmra.mrb[44].mxu0 %v1227_v38 }
 0x1de   : > { %1513 = vmatprep.mubr.bf16.mxu0 %v1230_v39 }
 0x1df   : > { %989 = vmatmul.mubr.bf16.gmra.mrb[4].mxu1 %v4738_v27  ;;  %v4821_v27 = vsub.s32 0, %v636_v20 }
 0x1e0   : > { %998 = vmatprep.mubr.bf16.mxu1 %v4268_v0 }
 0x1e1   : > { %5739 = vst [vmem:[#allocation37_spill] sm:$0xff] %v4821_v27 }
 0x1e5   : > { %1514 = vmatmul.mubr.bf16.gmra.mrb[48].mxu0 %v1229_v45 }
 0x1e6   : > { %1523 = vmatprep.mubr.bf16.mxu0 %v1232_v46 }
 0x1e7   : > { %999 = vmatmul.mubr.bf16.gmra.mrb[8].mxu1 %v4744_v34  ;;  %v4823_v34 = vsub.s32 1, %v636_v20 }
 0x1e8   : > { %1008 = vmatprep.mubr.bf16.mxu1 %v4268_v0 }
 0x1e9   : > { %5740 = vst [vmem:[#allocation38_spill] sm:$0xff] %v4823_v34 }
 0x1ed   : > { %1524 = vmatmul.mubr.bf16.gmra.mrb[52].mxu0 %v1231_v52 }
 0x1ee   : > { %1533 = vmatprep.mubr.bf16.mxu0 %v1234_v53 }
 0x1ef   : > { %1009 = vmatmul.mubr.bf16.gmra.mrb[12].mxu1 %v4750_v42  ;;  %v4828_v42 = vrot.slane %v633_v21, %v4821_v27 }
 0x1f0   : > { %1018 = vmatprep.mubr.bf16.mxu1 %v4268_v0 }
 0x1f5   : > { %1534 = vmatmul.mubr.bf16.gmra.mrb[56].mxu0 %v1233_v59 }
 0x1f6   : > { %1543 = vmatprep.mubr.bf16.mxu0 %v1236_v60 }
 0x1f7   : > { %1019 = vmatmul.mubr.bf16.gmra.mrb[16].mxu1 %v4756_v48  ;;  %v4831_v48 = vrot.slane %v633_v21, %v4823_v34 }
 0x1f8   : > { %1028 = vmatprep.mubr.bf16.mxu1 %v4268_v0 }
 0x1fd   : > { %1544 = vmatmul.mubr.bf16.gmra.mrb[60].mxu0 %v1235_v1 }
 0x1ff   : > { %1029 = vmatmul.mubr.bf16.gmra.mrb[20].mxu1 %v4762_v55 }
 0x200   : > { %1038 = vmatprep.mubr.bf16.mxu1 %v4268_v0 }
 0x207   : > { %1039 = vmatmul.mubr.bf16.gmra.mrb[24].mxu1 %v4768_v62 }
 0x208   : > { %1048 = vmatprep.mubr.bf16.mxu1 %v4268_v0 }
 0x20f   : > { %1049 = vmatmul.mubr.bf16.gmra.mrb[28].mxu1 %v4776_v8 }
 0x258   : > { %v759_v22 = vpop.f32.mrb[0].mxu0 }
 0x259   : > { %v761_v55 = vpop.f32.mrb[1].mxu0  ;;  %v760_v23 = vadd.f32 %v759_v22, %v4828_v42 }
 0x25a   : > { %v763_v24 = vpop.f32.mrb[2].mxu0  ;;  %v762_v25 = vadd.f32 %v761_v55, %v4831_v48  ;;  %v1269_v55 = vld [vmem:[#allocation12] sm:$0x3] }
 0x25b   : > { %v765_v26 = vpop.f32.mrb[3].mxu0  ;;  %1059 = vxpose.xlu0.b32.start [1/16] %v760_v23, 128  ;;  %v764_v0 = vadd.f32 %v763_v24, %v4828_v42 }
 0x25c   : > { %1123 = vxpose.xlu1.b32.start [1/16] %v762_v25, 128  ;;  %v766_v62 = vadd.f32 %v765_v26, %v4831_v48  ;;  %v4866_v25 = vrot.slane %v1269_v55, %v4821_v27 }
 0x25f   : > { %1060 = vxpose.xlu0.b32.cont [2/16] %v764_v0, 128  ;;  %v4870_v0 = vrot.slane %v1269_v55, %v4823_v34 }
 0x260   : > { %v769_v28 = vpop.f32.mrb[4].mxu0  ;;  %1124 = vxpose.xlu1.b32.cont [2/16] %v766_v62, 128 }
 0x261   : > { %v770_v29 = vadd.f32 %v769_v28, %v4828_v42  ;;  %v771_v30 = vpop.f32.mrb[5].mxu0 }
 0x262   : > { %v772_v31 = vadd.f32 %v771_v30, %v4831_v48  ;;  %v773_v32 = vpop.f32.mrb[6].mxu0 }
 0x263   : > { %v775_v33 = vpop.f32.mrb[7].mxu0  ;;  %1061 = vxpose.xlu0.b32.cont [3/16] %v770_v29, 128  ;;  %v774_v8 = vadd.f32 %v773_v32, %v4828_v42 }
 0x264   : > { %1125 = vxpose.xlu1.b32.cont [3/16] %v772_v31, 128  ;;  %v776_v35 = vadd.f32 %v775_v33, %v4831_v48 }
 0x267   : > { %1062 = vxpose.xlu0.b32.cont [4/16] %v774_v8, 128 }
 0x268   : > { %v779_v36 = vpop.f32.mrb[8].mxu0  ;;  %1126 = vxpose.xlu1.b32.cont [4/16] %v776_v35, 128 }
 0x269   : > { %v780_v37 = vadd.f32 %v779_v36, %v4828_v42  ;;  %v781_v38 = vpop.f32.mrb[9].mxu0 }
 0x26a   : > { %v782_v39 = vadd.f32 %v781_v38, %v4831_v48  ;;  %v783_v40 = vpop.f32.mrb[10].mxu0 }
 0x26b   : > { %v785_v41 = vpop.f32.mrb[11].mxu0  ;;  %1063 = vxpose.xlu0.b32.cont [5/16] %v780_v37, 128  ;;  %v784_v43 = vadd.f32 %v783_v40, %v4828_v42 }
 0x26c   : > { %1127 = vxpose.xlu1.b32.cont [5/16] %v782_v39, 128  ;;  %v786_v44 = vadd.f32 %v785_v41, %v4831_v48 }
 0x26f   : > { %1064 = vxpose.xlu0.b32.cont [6/16] %v784_v43, 128 }
 0x270   : > { %v789_v45 = vpop.f32.mrb[12].mxu0  ;;  %1128 = vxpose.xlu1.b32.cont [6/16] %v786_v44, 128 }
 0x271   : > { %v790_v46 = vadd.f32 %v789_v45, %v4828_v42  ;;  %v791_v47 = vpop.f32.mrb[13].mxu0 }
 0x272   : > { %v792_v49 = vadd.f32 %v791_v47, %v4831_v48  ;;  %v793_v50 = vpop.f32.mrb[14].mxu0 }
 0x273   : > { %v795_v51 = vpop.f32.mrb[15].mxu0  ;;  %1065 = vxpose.xlu0.b32.cont [7/16] %v790_v46, 128  ;;  %v794_v52 = vadd.f32 %v793_v50, %v4828_v42 }
 0x274   : > { %1129 = vxpose.xlu1.b32.cont [7/16] %v792_v49, 128  ;;  %v796_v53 = vadd.f32 %v795_v51, %v4831_v48 }
 0x277   : > { %1066 = vxpose.xlu0.b32.cont [8/16] %v794_v52, 128 }
 0x278   : > { %v799_v54 = vpop.f32.mrb[16].mxu0  ;;  %1130 = vxpose.xlu1.b32.cont [8/16] %v796_v53, 128 }
 0x279   : > { %v800_v56 = vadd.f32 %v799_v54, %v4828_v42  ;;  %v801_v57 = vpop.f32.mrb[17].mxu0 }
 0x27a   : > { %v802_v58 = vadd.f32 %v801_v57, %v4831_v48  ;;  %v803_v59 = vpop.f32.mrb[18].mxu0 }
 0x27b   : > { %v805_v60 = vpop.f32.mrb[19].mxu0  ;;  %1067 = vxpose.xlu0.b32.cont [9/16] %v800_v56, 128  ;;  %v804_v61 = vadd.f32 %v803_v59, %v4828_v42 }
 0x27c   : > { %1131 = vxpose.xlu1.b32.cont [9/16] %v802_v58, 128  ;;  %v806_v63 = vadd.f32 %v805_v60, %v4831_v48 }
 0x27f   : > { %1068 = vxpose.xlu0.b32.cont [10/16] %v804_v61, 128 }
 0x280   : > { %v809_v1 = vpop.f32.mrb[20].mxu0  ;;  %1132 = vxpose.xlu1.b32.cont [10/16] %v806_v63, 128 }
 0x281   : > { %v810_v2 = vadd.f32 %v809_v1, %v4828_v42  ;;  %v811_v3 = vpop.f32.mrb[21].mxu0 }
 0x282   : > { %v812_v4 = vadd.f32 %v811_v3, %v4831_v48  ;;  %v813_v5 = vpop.f32.mrb[22].mxu0 }
 0x283   : > { %v815_v6 = vpop.f32.mrb[23].mxu0  ;;  %1069 = vxpose.xlu0.b32.cont [11/16] %v810_v2, 128  ;;  %v814_v7 = vadd.f32 %v813_v5, %v4828_v42 }
 0x284   : > { %1133 = vxpose.xlu1.b32.cont [11/16] %v812_v4, 128  ;;  %v816_v9 = vadd.f32 %v815_v6, %v4831_v48 }
 0x287   : > { %1070 = vxpose.xlu0.b32.cont [12/16] %v814_v7, 128 }
 0x288   : > { %v819_v10 = vpop.f32.mrb[24].mxu0  ;;  %1134 = vxpose.xlu1.b32.cont [12/16] %v816_v9, 128 }
 0x289   : > { %v820_v11 = vadd.f32 %v819_v10, %v4828_v42  ;;  %v821_v12 = vpop.f32.mrb[25].mxu0 }
 0x28a   : > { %v822_v13 = vadd.f32 %v821_v12, %v4831_v48  ;;  %v823_v14 = vpop.f32.mrb[26].mxu0 }
 0x28b   : > { %v825_v15 = vpop.f32.mrb[27].mxu0  ;;  %1071 = vxpose.xlu0.b32.cont [13/16] %v820_v11, 128  ;;  %v824_v16 = vadd.f32 %v823_v14, %v4828_v42 }
 0x28c   : > { %1135 = vxpose.xlu1.b32.cont [13/16] %v822_v13, 128  ;;  %v826_v17 = vadd.f32 %v825_v15, %v4831_v48 }
 0x28f   : > { %1072 = vxpose.xlu0.b32.cont [14/16] %v824_v16, 128 }
 0x290   : > { %v829_v18 = vpop.f32.mrb[28].mxu0  ;;  %1136 = vxpose.xlu1.b32.cont [14/16] %v826_v17, 128 }
 0x291   : > { %v830_v19 = vadd.f32 %v829_v18, %v4828_v42  ;;  %v831_v20 = vpop.f32.mrb[29].mxu0 }
 0x292   : > { %v832_v21 = vadd.f32 %v831_v20, %v4831_v48  ;;  %v833_v22 = vpop.f32.mrb[30].mxu0 }
 0x293   : > { %v835_v23 = vpop.f32.mrb[31].mxu0  ;;  %1073 = vxpose.xlu0.b32.cont [15/16] %v830_v19, 128  ;;  %v834_v24 = vadd.f32 %v833_v22, %v4828_v42 }
 0x294   : > { %1137 = vxpose.xlu1.b32.cont [15/16] %v832_v21, 128  ;;  %v836_v26 = vadd.f32 %v835_v23, %v4831_v48 }
 0x297   : > { %1074 = vxpose.xlu0.b32.end [16/16] %v834_v24, 128 }
 0x298   : > { %1138 = vxpose.xlu1.b32.end [16/16] %v836_v26, 128  ;;  %v1475_v62 = vpop.f32.mrb[32].mxu0 }
 0x299   : > { %v1476_v28 = vadd.f32 %v1475_v62, %v4866_v25  ;;  %v1477_v29 = vpop.f32.mrb[33].mxu0 }
 0x29a   : > { %v1478_v30 = vadd.f32 %v1477_v29, %v4870_v0  ;;  %v1479_v31 = vpop.f32.mrb[34].mxu0 }
 0x29b   : > { %v1554_v32 = vmul.f32 0.088388346, %v1476_v28  ;;  %v1480_v42 = vadd.f32 %v1479_v31, %v4866_v25  ;;  %v1481_v33 = vpop.f32.mrb[35].mxu0 }
 0x29c   : > { %v4875_v8 = vmul.f32 0.088388346, %v1478_v30  ;;  %v1482_v48 = vadd.f32 %v1481_v33, %v4870_v0 }
 0x29d   : > { %v1556_v35 = vmul.f32 0.088388346, %v1480_v42 }
 0x29e   : > { %v4878_v36 = vmul.f32 0.088388346, %v1482_v48 }
 0x29f   : > { %v1586_v37 = vpack.c.bf16 %v1556_v35, %v1554_v32 }
 0x2a0   : > { %v1485_v39 = vpop.f32.mrb[36].mxu0 }
 0x2a1   : > { %v1486_v40 = vadd.f32 %v1485_v39, %v4866_v25  ;;  %v1487_v41 = vpop.f32.mrb[37].mxu0  ;;  %3284 = vmatprep.mubr.bf16.mxu1 %v1586_v37 }
 0x2a2   : > { %v1488_v43 = vadd.f32 %v1487_v41, %v4870_v0  ;;  %v1489_v44 = vpop.f32.mrb[38].mxu0 }
 0x2a3   : > { %v4884_v45 = vmul.f32 0.088388346, %v1486_v40  ;;  %v1490_v46 = vadd.f32 %v1489_v44, %v4866_v25  ;;  %v1491_v47 = vpop.f32.mrb[39].mxu0 }
 0x2a4   : > { %v4887_v49 = vmul.f32 0.088388346, %v1488_v43  ;;  %v1492_v50 = vadd.f32 %v1491_v47, %v4870_v0 }
 0x2a5   : > { %v4890_v51 = vmul.f32 0.088388346, %v1490_v46 }
 0x2a6   : > { %v4892_v52 = vmul.f32 0.088388346, %v1492_v50 }
 0x2a8   : > { %v1495_v56 = vpop.f32.mrb[40].mxu0 }
 0x2a9   : > { %v1496_v57 = vadd.f32 %v1495_v56, %v4866_v25  ;;  %v1497_v58 = vpop.f32.mrb[41].mxu0 }
 0x2aa   : > { %v1498_v59 = vadd.f32 %v1497_v58, %v4870_v0  ;;  %v1499_v60 = vpop.f32.mrb[42].mxu0 }
 0x2ab   : > { %v4900_v61 = vmul.f32 0.088388346, %v1496_v57  ;;  %v1500_v63 = vadd.f32 %v1499_v60, %v4866_v25  ;;  %v1501_v1 = vpop.f32.mrb[43].mxu0 }
 0x2ac   : > { %v4903_v2 = vmul.f32 0.088388346, %v1498_v59  ;;  %v1502_v3 = vadd.f32 %v1501_v1, %v4870_v0 }
 0x2ad   : > { %v4906_v4 = vmul.f32 0.088388346, %v1500_v63 }
 0x2ae   : > { %v4908_v5 = vmul.f32 0.088388346, %v1502_v3 }
 0x2b0   : > { %v1505_v9 = vpop.f32.mrb[44].mxu0 }
 0x2b1   : > { %v1506_v10 = vadd.f32 %v1505_v9, %v4866_v25  ;;  %v1507_v11 = vpop.f32.mrb[45].mxu0 }
 0x2b2   : > { %v1508_v12 = vadd.f32 %v1507_v11, %v4870_v0  ;;  %v1509_v13 = vpop.f32.mrb[46].mxu0 }
 0x2b3   : > { %v4916_v14 = vmul.f32 0.088388346, %v1506_v10  ;;  %v1510_v15 = vadd.f32 %v1509_v13, %v4866_v25  ;;  %v1511_v16 = vpop.f32.mrb[47].mxu0 }
 0x2b4   : > { %v4919_v17 = vmul.f32 0.088388346, %v1508_v12  ;;  %v1512_v18 = vadd.f32 %v1511_v16, %v4870_v0 }
 0x2b5   : > { %v4922_v19 = vmul.f32 0.088388346, %v1510_v15 }
 0x2b6   : > { %v4924_v20 = vmul.f32 0.088388346, %v1512_v18 }
 0x2b8   : > { %v1515_v55 = vpop.f32.mrb[48].mxu0 }
 0x2b9   : > { %v1516_v23 = vadd.f32 %v1515_v55, %v4866_v25  ;;  %v1517_v24 = vpop.f32.mrb[49].mxu0 }
 0x2ba   : > { %v1518_v26 = vadd.f32 %v1517_v24, %v4870_v0  ;;  %v1519_v62 = vpop.f32.mrb[50].mxu0 }
 0x2bb   : > { %v4932_v28 = vmul.f32 0.088388346, %v1516_v23  ;;  %v1520_v29 = vadd.f32 %v1519_v62, %v4866_v25  ;;  %v1521_v30 = vpop.f32.mrb[51].mxu0 }
 0x2bc   : > { %v4935_v31 = vmul.f32 0.088388346, %v1518_v26  ;;  %v1522_v32 = vadd.f32 %v1521_v30, %v4870_v0 }
 0x2bd   : > { %v4938_v42 = vmul.f32 0.088388346, %v1520_v29 }
 0x2be   : > { %v4940_v33 = vmul.f32 0.088388346, %v1522_v32 }
 0x2c0   : > { %v1525_v37 = vpop.f32.mrb[52].mxu0 }
 0x2c1   : > { %v1526_v39 = vadd.f32 %v1525_v37, %v4866_v25  ;;  %v1527_v40 = vpop.f32.mrb[53].mxu0 }
 0x2c2   : > { %v1528_v41 = vadd.f32 %v1527_v40, %v4870_v0  ;;  %v1529_v43 = vpop.f32.mrb[54].mxu0 }
 0x2c3   : > { %v4948_v44 = vmul.f32 0.088388346, %v1526_v39  ;;  %v1530_v46 = vadd.f32 %v1529_v43, %v4866_v25  ;;  %v1531_v47 = vpop.f32.mrb[55].mxu0 }
 0x2c4   : > { %v4951_v50 = vmul.f32 0.088388346, %v1528_v41  ;;  %v1532_v56 = vadd.f32 %v1531_v47, %v4870_v0 }
 0x2c5   : > { %v4954_v57 = vmul.f32 0.088388346, %v1530_v46 }
 0x2c6   : > { %v4956_v58 = vmul.f32 0.088388346, %v1532_v56 }
 0x2c8   : > { %v1535_v63 = vpop.f32.mrb[56].mxu0 }
 0x2c9   : > { %v1536_v1 = vadd.f32 %v1535_v63, %v4866_v25  ;;  %v1537_v3 = vpop.f32.mrb[57].mxu0 }
 0x2ca   : > { %v1538_v9 = vadd.f32 %v1537_v3, %v4870_v0  ;;  %v1539_v10 = vpop.f32.mrb[58].mxu0 }
 0x2cb   : > { %v4964_v11 = vmul.f32 0.088388346, %v1536_v1  ;;  %v1540_v12 = vadd.f32 %v1539_v10, %v4866_v25  ;;  %v1541_v13 = vpop.f32.mrb[59].mxu0 }
 0x2cc   : > { %v4967_v15 = vmul.f32 0.088388346, %v1538_v9  ;;  %v1542_v16 = vadd.f32 %v1541_v13, %v4870_v0 }
 0x2cd   : > { %v4970_v18 = vmul.f32 0.088388346, %v1540_v12 }
 0x2ce   : > { %v4972_v55 = vmul.f32 0.088388346, %v1542_v16 }
 0x2d0   : > { %v1545_v26 = vpop.f32.mrb[60].mxu0 }
 0x2d1   : > { %v1546_v62 = vadd.f32 %v1545_v26, %v4866_v25  ;;  %v1547_v29 = vpop.f32.mrb[61].mxu0 }
 0x2d2   : > { %v1548_v30 = vadd.f32 %v1547_v29, %v4870_v0  ;;  %v1549_v32 = vpop.f32.mrb[62].mxu0 }
 0x2d3   : > { %v4980_v37 = vmul.f32 0.088388346, %v1546_v62  ;;  %v1550_v39 = vadd.f32 %v1549_v32, %v4866_v25  ;;  %v1551_v40 = vpop.f32.mrb[63].mxu0  ;;  %v854_v32 = vld [vmem:[#allocation18] sm:$0x3] }
 0x2d4   : > { %v4983_v41 = vmul.f32 0.088388346, %v1548_v30  ;;  %v1552_v43 = vadd.f32 %v1551_v40, %v4870_v0  ;;  %v5005_v40 = vrot.slane %v854_v32, %v4821_v27 }
 0x2d5   : > { %v4986_v46 = vmul.f32 0.088388346, %v1550_v39 }
 0x2d6   : > { %v4988_v47 = vmul.f32 0.088388346, %v1552_v43 }
 0x2db   : > { %v1075_v1 = vpop.trf.xlu0 }
 0x2dc   : > { %v4994_v3 = vpop.trf.xlu1 }
 0x2df   : > { %v1076_v9 = vpop.trf.xlu0 }
 0x2e0   : > { %v1091_v25 = vpack.c.bf16 %v1076_v9, %v1075_v1  ;;  %v4996_v10 = vpop.trf.xlu1  ;;  %v5008_v1 = vrot.slane %v854_v32, %v4823_v34 }
 0x2e2   : > { %3268 = vmatprep.subr.bf16.mxu1 %v1091_v25 }
 0x2e3   : > { %3269 = vmatpush3.bf16.msra.mxu1 %v1091_v25  ;;  %v1077_v0 = vpop.trf.xlu0  ;;  %v980_v25 = vpop.f32.mrb[0].mxu1 }
 0x2e4   : > { %v4998_v12 = vpop.trf.xlu1 }
 0x2e7   : > { %v1078_v13 = vpop.trf.xlu0 }
 0x2e8   : > { %v1092_v16 = vpack.c.bf16 %v1078_v13, %v1077_v0  ;;  %v5000_v26 = vpop.trf.xlu1  ;;  %v981_v0 = vadd.f32 %v980_v25, %v5005_v40  ;;  %v982_v13 = vpop.f32.mrb[1].mxu1 }
 0x2e9   : > { %v983_v63 = vadd.f32 %v982_v13, %v5008_v1  ;;  %v984_v24 = vpop.f32.mrb[2].mxu1 }
 0x2ea   : > { %3270 = vmatprep.subr.bf16.mxu1 %v1092_v16  ;;  %v986_v60 = vpop.f32.mrb[3].mxu1 }
 0x2eb   : > { %3271 = vmatpush3.bf16.msra.mxu1 %v1092_v16  ;;  %v1079_v62 = vpop.trf.xlu0  ;;  %v990_v25 = vpop.f32.mrb[4].mxu1 }
 0x2ec   : > { %v5002_v29 = vpop.trf.xlu1  ;;  %v991_v54 = vadd.f32 %v990_v25, %v5005_v40  ;;  %v992_v13 = vpop.f32.mrb[5].mxu1 }
 0x2ef   : > { %v1080_v30 = vpop.trf.xlu0 }
 0x2f0   : > { %v1093_v39 = vpack.c.bf16 %v1080_v30, %v1079_v62  ;;  %v5010_v9 = vpop.trf.xlu1  ;;  %v985_v30 = vadd.f32 %v984_v24, %v5005_v40  ;;  %v994_v24 = vpop.f32.mrb[6].mxu1 }
 0x2f1   : > { %v996_v23 = vpop.f32.mrb[7].mxu1 }
 0x2f2   : > { %3272 = vmatprep.subr.bf16.mxu1 %v1093_v39  ;;  %v5018_v32 = vpack.c.bf16 %v985_v30, %v981_v0  ;;  %v997_v0 = vadd.f32 %v996_v23, %v5008_v1 }
 0x2f3   : > { %3273 = vmatpush3.bf16.msra.mxu1 %v1093_v39  ;;  %v1081_v43 = vpop.trf.xlu0  ;;  %v987_v39 = vadd.f32 %v986_v60, %v5008_v1  ;;  %v995_v60 = vadd.f32 %v994_v24, %v5005_v40 }
 0x2f4   : > { %v5016_v35 = vpop.trf.xlu1 }
 0x2f5   : > { %v5020_v7 = vpack.c.bf16 %v987_v39, %v983_v63  ;;  %v1000_v39 = vpop.f32.mrb[8].mxu1 }
 0x2f7   : > { %v1082_v16 = vpop.trf.xlu0  ;;  %5741 = vst [vmem:[#allocation39_spill] sm:$0xff] %v5020_v7 }
 0x2f8   : > { %v1094_v62 = vpack.c.bf16 %v1082_v16, %v1081_v43  ;;  %v993_v43 = vadd.f32 %v992_v13, %v5008_v1  ;;  %v5024_v56 = vpop.trf.xlu1  ;;  %v1001_v13 = vadd.f32 %v1000_v39, %v5005_v40 }
 0x2fa   : > { %3274 = vmatprep.subr.bf16.mxu1 %v1094_v62  ;;  %v5030_v30 = vpack.c.bf16 %v997_v0, %v993_v43 }
 0x2fb   : > { %3275 = vmatpush3.bf16.msra.mxu1 %v1094_v62  ;;  %v1083_v22 = vpop.trf.xlu0  ;;  %v5028_v62 = vpack.c.bf16 %v995_v60, %v991_v54 }
 0x2fc   : > { %5742 = vst [vmem:[#allocation40_spill] sm:$0xff] %v5030_v30  ;;  %v5032_v25 = vpop.trf.xlu1 }
 0x2ff   : > { %v1084_v38 = vpop.trf.xlu0 }
 0x300   : > { %v1095_v16 = vpack.c.bf16 %v1084_v38, %v1083_v22  ;;  %v1002_v38 = vpop.f32.mrb[9].mxu1  ;;  %v5042_v0 = vpop.trf.xlu1 }
 0x301   : > { %v1003_v59 = vadd.f32 %v1002_v38, %v5008_v1  ;;  %v1004_v24 = vpop.f32.mrb[10].mxu1 }
 0x302   : > { %3276 = vmatprep.subr.bf16.mxu1 %v1095_v16  ;;  %v1005_v23 = vadd.f32 %v1004_v24, %v5005_v40  ;;  %v1006_v21 = vpop.f32.mrb[11].mxu1 }
 0x303   : > { %3277 = vmatpush3.bf16.msra.mxu1 %v1095_v16  ;;  %v1085_v63 = vpop.trf.xlu0  ;;  %v1007_v54 = vadd.f32 %v1006_v21, %v5008_v1  ;;  %v1010_v39 = vpop.f32.mrb[12].mxu1 }
 0x304   : > { %v5038_v16 = vpack.c.bf16 %v1005_v23, %v1001_v13  ;;  %v1011_v6 = vadd.f32 %v1010_v39, %v5005_v40  ;;  %v1012_v38 = vpop.f32.mrb[13].mxu1  ;;  %v1149_v23 = vpop.trf.xlu1 }
 0x305   : > { %v5040_v60 = vpack.c.bf16 %v1007_v54, %v1003_v59 }
 0x307   : > { %v1086_v22 = vpop.trf.xlu0  ;;  %5743 = vst [vmem:[#allocation41_spill] sm:$0xff] %v5040_v60 }
 0x308   : > { %v1096_v48 = vpack.c.bf16 %v1086_v22, %v1085_v63  ;;  %v1013_v63 = vadd.f32 %v1012_v38, %v5008_v1  ;;  %v1014_v22 = vpop.f32.mrb[14].mxu1  ;;  %v1150_v7 = vpop.trf.xlu1 }
 0x309   : > { %v1015_v21 = vadd.f32 %v1014_v22, %v5005_v40  ;;  %v1016_v34 = vpop.f32.mrb[15].mxu1 }
 0x30a   : > { %3278 = vmatprep.subr.bf16.mxu1 %v1096_v48  ;;  %v1017_v13 = vadd.f32 %v1016_v34, %v5008_v1  ;;  %v1020_v39 = vpop.f32.mrb[16].mxu1 }
 0x30b   : > { %3279 = vmatpush3.bf16.msra.mxu1 %v1096_v48  ;;  %v1087_v43 = vpop.trf.xlu0  ;;  %v5048_v48 = vpack.c.bf16 %v1015_v21, %v1011_v6  ;;  %v1021_v27 = vadd.f32 %v1020_v39, %v5005_v40  ;;  %v1022_v60 = vpop.f32.mrb[17].mxu1 }
 0x30c   : > { %v5050_v54 = vpack.c.bf16 %v1017_v13, %v1013_v63 }
 0x30f   : > { %v1088_v53 = vpop.trf.xlu0 }
 0x310   : > { %v1097_v24 = vpack.c.bf16 %v1088_v53, %v1087_v43  ;;  %v1023_v53 = vadd.f32 %v1022_v60, %v5008_v1  ;;  %v1024_v43 = vpop.f32.mrb[18].mxu1  ;;  %v1156_v60 = vpack.c.bf16 %v5000_v26, %v4998_v12 }
 0x311   : > { %v1025_v30 = vadd.f32 %v1024_v43, %v5005_v40  ;;  %v1026_v34 = vpop.f32.mrb[19].mxu1 }
 0x312   : > { %3280 = vmatprep.subr.bf16.mxu1 %v1097_v24  ;;  %v1027_v6 = vadd.f32 %v1026_v34, %v5008_v1  ;;  %v1030_v13 = vpop.f32.mrb[20].mxu1  ;;  %v5746_v34 = vpack.c.bf16 %v4922_v19, %v4916_v14  ;;  %v1159_v14 = vpack.c.bf16 %v5042_v0, %v5032_v25 }
 0x313   : > { %3281 = vmatpush3.bf16.msra.mxu1 %v1097_v24  ;;  %v1089_v59 = vpop.trf.xlu0  ;;  %v1155_v24 = vpack.c.bf16 %v4996_v10, %v4994_v3  ;;  %v5058_v63 = vpack.c.bf16 %v1025_v30, %v1021_v27  ;;  %v1031_v39 = vadd.f32 %v1030_v13, %v5005_v40  ;;  %v5745_v3 = vpack.c.bf16 %v4906_v4, %v4900_v61  ;;  %v1151_v27 = vpop.trf.xlu1 }
 0x314   : > { %v5060_v21 = vpack.c.bf16 %v1027_v6, %v1023_v53 }
 0x317   : > { %v1090_v38 = vpop.trf.xlu0  ;;  %v1152_v61 = vpop.trf.xlu1 }
 0x318   : > { %v1098_v22 = vpack.c.bf16 %v1090_v38, %v1089_v59  ;;  %v5744_v59 = vpack.c.bf16 %v4890_v51, %v4884_v45  ;;  %v1032_v38 = vpop.f32.mrb[21].mxu1  ;;  %v1157_v45 = vpack.c.bf16 %v5010_v9, %v5002_v29  ;;  %v5747_v29 = vpack.c.bf16 %v4938_v42, %v4932_v28 }
 0x319   : > { %v1033_v10 = vadd.f32 %v1032_v38, %v5008_v1  ;;  %v1034_v30 = vpop.f32.mrb[22].mxu1  ;;  %v1160_v42 = vpack.c.bf16 %v1150_v7, %v1149_v23  ;;  %v5748_v38 = vpack.c.bf16 %v4954_v57, %v4948_v44  ;;  %v1161_v44 = vpack.c.bf16 %v1152_v61, %v1151_v27 }
 0x31a   : > { %3282 = vmatprep.subr.bf16.mxu1 %v1098_v22  ;;  %v1035_v53 = vadd.f32 %v1034_v30, %v5005_v40  ;;  %v1036_v12 = vpop.f32.mrb[23].mxu1  ;;  %v5749_v30 = vpack.c.bf16 %v4970_v18, %v4964_v11  ;;  %v5750_v11 = vpack.c.bf16 %v4986_v46, %v4980_v37  ;;  %v5751_v18 = vpack.c.bf16 %v4878_v36, %v4875_v8 }
 0x31b   : > { %3283 = vmatpush3.bf16.msra.mxu1 %v1098_v22  ;;  %v1037_v26 = vadd.f32 %v1036_v12, %v5008_v1  ;;  %v1040_v4 = vpop.f32.mrb[24].mxu1  ;;  %v1158_v22 = vpack.c.bf16 %v5024_v56, %v5016_v35  ;;  %v1153_v56 = vpop.trf.xlu1  ;;  %v5754_v8 = vpack.c.bf16 %v4924_v20, %v4919_v17  ;;  %v5755_v36 = vpack.c.bf16 %v4940_v33, %v4935_v31 }
 0x31c   : > { %3300 = vmatprep.subr.bf16.mxu1 %v1155_v24  ;;  %v5076_v51 = vpack.c.bf16 %v1035_v53, %v1031_v39  ;;  %v1041_v6 = vadd.f32 %v1040_v4, %v5005_v40 }
 0x31d   : > { %v5078_v43 = vpack.c.bf16 %v1037_v26, %v1033_v10 }
 0x31e   : > { %3285 = vmatmul.mubr.bf16.vlgmr.msra.gmra.mrb[32].mxu1 %v5744_v59 }
 0x31f   : > { %3288 = vmatprep.mubr.bf16.mxu1 %v5745_v3  ;;  %3301 = vmatpush3.bf16.msra.mxu1 %v1155_v24  ;;  %v1042_v24 = vpop.f32.mrb[25].mxu1  ;;  %v1154_v7 = vpop.trf.xlu1 }
 0x320   : > { %3302 = vmatprep.subr.bf16.mxu1 %v1156_v60  ;;  %v1043_v9 = vadd.f32 %v1042_v24, %v5008_v1  ;;  %v1044_v13 = vpop.f32.mrb[26].mxu1 }
 0x321   : > { %v1046_v59 = vpop.f32.mrb[27].mxu1 }
 0x322   : > { %v1047_v35 = vadd.f32 %v1046_v59, %v5008_v1  ;;  %v1050_v28 = vpop.f32.mrb[28].mxu1 }
 0x323   : > { %3303 = vmatpush3.bf16.msra.mxu1 %v1156_v60  ;;  %v1045_v60 = vadd.f32 %v1044_v13, %v5005_v40  ;;  %v1051_v3 = vadd.f32 %v1050_v28, %v5005_v40  ;;  %v1052_v10 = vpop.f32.mrb[29].mxu1 }
 0x324   : > { %3304 = vmatprep.subr.bf16.mxu1 %v1157_v45  ;;  %v5094_v39 = vpack.c.bf16 %v1047_v35, %v1043_v9  ;;  %v1053_v25 = vadd.f32 %v1052_v10, %v5008_v1  ;;  %v1054_v0 = vpop.f32.mrb[30].mxu1 }
 0x325   : > { %v1113_v19 = vpack.c.bf16 %v1045_v60, %v1041_v6  ;;  %v1055_v53 = vadd.f32 %v1054_v0, %v5005_v40  ;;  %v1056_v12 = vpop.f32.mrb[31].mxu1  ;;  %v5752_v40 = vpack.c.bf16 %v4892_v52, %v4887_v49  ;;  %v5756_v49 = vpack.c.bf16 %v4956_v58, %v4951_v50 }
 0x326   : > { %3289 = vmatmul.mubr.bf16.gmra.mrb[36].mxu1 %v5746_v34  ;;  %v1057_v23 = vadd.f32 %v1056_v12, %v5008_v1  ;;  %v5753_v1 = vpack.c.bf16 %v4908_v5, %v4903_v2  ;;  %v5757_v52 = vpack.c.bf16 %v4972_v55, %v4967_v15  ;;  %v5758_v2 = vpack.c.bf16 %v4988_v47, %v4983_v41  ;;  %v5759_v5 = vld [vmem:[#allocation39_spill] sm:$0xff] }
 0x327   : > { %3292 = vmatprep.mubr.bf16.mxu1 %v5747_v29  ;;  %3305 = vmatpush3.bf16.msra.mxu1 %v1157_v45  ;;  %v1114_v57 = vpack.c.bf16 %v1055_v53, %v1051_v3  ;;  %v1162_v45 = vpack.c.bf16 %v1154_v7, %v1153_v56 }
 0x328   : > { %3306 = vmatprep.subr.bf16.mxu1 %v1158_v22  ;;  %v5106_v26 = vpack.c.bf16 %v1057_v23, %v1053_v25 }
 0x32b   : > { %3307 = vmatpush3.bf16.msra.mxu1 %v1158_v22 }
 0x32c   : > { %3308 = vmatprep.subr.bf16.mxu1 %v1159_v14 }
 0x32e   : > { %3293 = vmatmul.mubr.bf16.gmra.mrb[40].mxu1 %v5748_v38 }
 0x32f   : > { %3309 = vmatpush3.bf16.msra.mxu1 %v1159_v14  ;;  %3296 = vmatprep.mubr.bf16.mxu1 %v5749_v30 }
 0x330   : > { %3310 = vmatprep.subr.bf16.mxu1 %v1160_v42 }
 0x333   : > { %3311 = vmatpush3.bf16.msra.mxu1 %v1160_v42 }
 0x334   : > { %3312 = vmatprep.subr.bf16.mxu1 %v1161_v44 }
 0x336   : > { %3297 = vmatmul.mubr.bf16.gmra.mrb[44].mxu1 %v5750_v11 }
 0x337   : > { %3313 = vmatpush3.bf16.msra.mxu1 %v1161_v44  ;;  %3316 = vmatprep.mubr.bf16.mxu1 %v5751_v18 }
 0x338   : > { %3314 = vmatprep.subr.bf16.mxu1 %v1162_v45 }
 0x33b   : > { %3315 = vmatpush3.bf16.msra.mxu1 %v1162_v45 }
 0x33c   : > { %3332 = vmatprep.subr.bf16.mxu1 %v5018_v32 }
 0x33e   : > { %3317 = vmatmul.mubr.bf16.vlgmr.msra.gmra.mrb[48].mxu1 %v5752_v40 }
 0x33f   : > { %3320 = vmatprep.mubr.bf16.mxu1 %v5753_v1  ;;  %3333 = vmatpush3.bf16.msra.mxu1 %v5018_v32 }
 0x340   : > { %3334 = vmatprep.subr.bf16.mxu1 %v5028_v62 }
 0x343   : > { %3335 = vmatpush3.bf16.msra.mxu1 %v5028_v62 }
 0x344   : > { %3336 = vmatprep.subr.bf16.mxu1 %v5038_v16 }
 0x346   : > { %3321 = vmatmul.mubr.bf16.gmra.mrb[52].mxu1 %v5754_v8 }
 0x347   : > { %3324 = vmatprep.mubr.bf16.mxu1 %v5755_v36  ;;  %3337 = vmatpush3.bf16.msra.mxu1 %v5038_v16 }
 0x348   : > { %3338 = vmatprep.subr.bf16.mxu1 %v5048_v48 }
 0x34b   : > { %3339 = vmatpush3.bf16.msra.mxu1 %v5048_v48 }
 0x34c   : > { %3340 = vmatprep.subr.bf16.mxu1 %v5058_v63 }
 0x34e   : > { %3325 = vmatmul.mubr.bf16.gmra.mrb[56].mxu1 %v5756_v49 }
 0x34f   : > { %3328 = vmatprep.mubr.bf16.mxu1 %v5757_v52  ;;  %3341 = vmatpush3.bf16.msra.mxu1 %v5058_v63 }
 0x350   : > { %3342 = vmatprep.subr.bf16.mxu1 %v5076_v51 }
 0x353   : > { %3343 = vmatpush3.bf16.msra.mxu1 %v5076_v51 }
 0x354   : > { %3344 = vmatprep.subr.bf16.mxu1 %v1113_v19 }
 0x356   : > { %3329 = vmatmul.mubr.bf16.gmra.mrb[60].mxu1 %v5758_v2 }
 0x357   : > { %3345 = vmatpush3.bf16.msra.mxu1 %v1113_v19 }
 0x358   : > { %3346 = vmatprep.subr.bf16.mxu1 %v1114_v57 }
 0x35b   : > { %3347 = vmatpush3.bf16.msra.mxu1 %v1114_v57 }
 0x35c   : > { %3364 = vmatprep.subr.bf16.mxu1 %v5759_v5 }
 0x3f1   : > { %v5148_v17 = vpop.f32.mrb[32].mxu1 }
 0x3f2   : > { %1865 = vmax.xlane.f32.xlu1 %v5148_v17  ;;  %v5151_v20 = vpop.f32.mrb[33].mxu1 }
 0x3f3   : > { %1861 = vmax.xlane.f32.xlu0 %v5151_v20  ;;  %v5154_v31 = vpop.f32.mrb[34].mxu1 }
 0x3f4   : > { %v5156_v33 = vpop.f32.mrb[35].mxu1 }
 0x3f6   : > { %1863 = vmax.xlane.f32.xlu1 %v5156_v33 }
 0x3f9   : > { %v5159_v50 = vpop.f32.mrb[36].mxu1 }
 0x3fa   : > { %1867 = vmax.xlane.f32.xlu1 %v5154_v31  ;;  %v5162_v58 = vpop.f32.mrb[37].mxu1 }
 0x3fb   : > { %1869 = vmax.xlane.f32.xlu0 %v5162_v58  ;;  %v5165_v15 = vpop.f32.mrb[38].mxu1 }
 0x3fc   : > { %v5167_v55 = vpop.f32.mrb[39].mxu1 }
 0x3fe   : > { %1871 = vmax.xlane.f32.xlu1 %v5167_v55 }
 0x3ff   : > { %1873 = vmax.xlane.f32.xlu0 %v5159_v50 }
 0x401   : > { %v5171_v37 = vpop.f32.mrb[40].mxu1 }
 0x402   : > { %1875 = vmax.xlane.f32.xlu1 %v5165_v15  ;;  %v5174_v41 = vpop.f32.mrb[41].mxu1 }
 0x403   : > { %1877 = vmax.xlane.f32.xlu0 %v5174_v41  ;;  %v5177_v46 = vpop.f32.mrb[42].mxu1 }
 0x404   : > { %v5179_v47 = vpop.f32.mrb[43].mxu1 }
 0x406   : > { %1879 = vmax.xlane.f32.xlu1 %v5179_v47 }
 0x407   : > { %1881 = vmax.xlane.f32.xlu0 %v5171_v37 }
 0x409   : > { %v5183_v32 = vpop.f32.mrb[44].mxu1 }
 0x40a   : > { %1883 = vmax.xlane.f32.xlu1 %v5177_v46  ;;  %v5186_v62 = vpop.f32.mrb[45].mxu1 }
 0x40b   : > { %1885 = vmax.xlane.f32.xlu0 %v5186_v62  ;;  %v5189_v16 = vpop.f32.mrb[46].mxu1 }
 0x40c   : > { %v5191_v48 = vpop.f32.mrb[47].mxu1 }
 0x40e   : > { %1887 = vmax.xlane.f32.xlu1 %v5191_v48 }
 0x40f   : > { %1889 = vmax.xlane.f32.xlu0 %v5183_v32 }
 0x411   : > { %v5195_v63 = vpop.f32.mrb[48].mxu1 }
 0x412   : > { %1891 = vmax.xlane.f32.xlu1 %v5189_v16  ;;  %v5198_v27 = vpop.f32.mrb[49].mxu1 }
 0x413   : > { %1893 = vmax.xlane.f32.xlu0 %v5198_v27  ;;  %v5201_v51 = vpop.f32.mrb[50].mxu1 }
 0x414   : > { %v5203_v61 = vpop.f32.mrb[51].mxu1 }
 0x416   : > { %1895 = vmax.xlane.f32.xlu1 %v5203_v61 }
 0x417   : > { %1897 = vmax.xlane.f32.xlu0 %v5195_v63 }
 0x419   : > { %v5207_v4 = vpop.f32.mrb[52].mxu1 }
 0x41a   : > { %1899 = vmax.xlane.f32.xlu1 %v5201_v51  ;;  %v5210_v22 = vpop.f32.mrb[53].mxu1 }
 0x41b   : > { %1901 = vmax.xlane.f32.xlu0 %v5210_v22  ;;  %v5213_v34 = vpop.f32.mrb[54].mxu1 }
 0x41c   : > { %v5215_v6 = vpop.f32.mrb[55].mxu1 }
 0x41e   : > { %1903 = vmax.xlane.f32.xlu1 %v5215_v6 }
 0x41f   : > { %1905 = vmax.xlane.f32.xlu0 %v5207_v4 }
 0x421   : > { %v5219_v24 = vpop.f32.mrb[56].mxu1 }
 0x422   : > { %1907 = vmax.xlane.f32.xlu1 %v5213_v34  ;;  %v5222_v29 = vpop.f32.mrb[57].mxu1 }
 0x423   : > { %1909 = vmax.xlane.f32.xlu0 %v5222_v29  ;;  %v5225_v9 = vpop.f32.mrb[58].mxu1 }
 0x424   : > { %v5227_v13 = vpop.f32.mrb[59].mxu1 }
 0x426   : > { %1911 = vmax.xlane.f32.xlu1 %v5227_v13 }
 0x427   : > { %1913 = vmax.xlane.f32.xlu0 %v5219_v24 }
 0x429   : > { %v5231_v60 = vpop.f32.mrb[60].mxu1 }
 0x42a   : > { %1915 = vmax.xlane.f32.xlu1 %v5225_v9  ;;  %v5234_v59 = vpop.f32.mrb[61].mxu1 }
 0x42b   : > { %1921 = vmax.xlane.f32.xlu0 %v5231_v60  ;;  %v5237_v35 = vpop.f32.mrb[62].mxu1 }
 0x42c   : > { %v5239_v14 = vpop.f32.mrb[63].mxu1 }
 0x42e   : > { %1923 = vmax.xlane.f32.xlu1 %v5237_v35 }
 0x42f   : > { %1917 = vmax.xlane.f32.xlu0 %v5234_v59 }
 0x432   : > { %1919 = vmax.xlane.f32.xlu1 %v5239_v14 }
 0x47f   : > { %v1866_v19 = vpop.xlane.xlu1 %1865 }
 0x480   : > { %v1862_v56 = vpop.xlane.xlu0 %1861  ;;  %v1927_v28 = vsub.f32 %v5148_v17, %v1866_v19 }
 0x481   : > { %v1925_v42 = vsub.f32 %v5151_v20, %v1862_v56 }
 0x482   : > { %v1961_v30 = vmul.f32 1.442695, %v1927_v28 }
 0x483   : > { %v1957_v38 = vmul.f32 1.442695, %v1925_v42  ;;  %v1864_v3 = vpop.xlane.xlu1 %1863 }
 0x484   : > { %v1926_v10 = vsub.f32 %v5156_v33, %v1864_v3 }
 0x485   : > { %3702 = vpow2.f32 %v1957_v38 }
 0x486   : > { %v1959_v25 = vmul.f32 1.442695, %v1926_v10 }
 0x487   : > { %v1868_v0 = vpop.xlane.xlu1 %1867 }
 0x488   : > { %3704 = vpow2.f32 %v1959_v25  ;;  %v1928_v53 = vsub.f32 %v5154_v31, %v1868_v0  ;;  %v1870_v12 = vpop.xlane.xlu0 %1869 }
 0x489   : > { %3706 = vpow2.f32 %v1961_v30  ;;  %v1929_v7 = vsub.f32 %v5162_v58, %v1870_v12 }
 0x48a   : > { %v1963_v23 = vmul.f32 1.442695, %v1928_v53 }
 0x48b   : > { %v1965_v44 = vmul.f32 1.442695, %v1929_v7  ;;  %v1872_v57 = vpop.xlane.xlu1 %1871 }
 0x48c   : > { %3708 = vpow2.f32 %v1963_v23  ;;  %v1930_v45 = vsub.f32 %v5167_v55, %v1872_v57  ;;  %v1874_v11 = vpop.xlane.xlu0 %1873 }
 0x48d   : > { %3710 = vpow2.f32 %v1965_v44  ;;  %v1931_v18 = vsub.f32 %v5159_v50, %v1874_v11 }
 0x48e   : > { %v1967_v40 = vmul.f32 1.442695, %v1930_v45 }
 0x48f   : > { %v5251_v1 = vpop.eup %3702  ;;  %v1969_v8 = vmul.f32 1.442695, %v1931_v18  ;;  %v1876_v36 = vpop.xlane.xlu1 %1875 }
 0x490   : > { %3712 = vpow2.f32 %v1967_v40  ;;  %v1932_v49 = vsub.f32 %v5165_v15, %v1876_v36  ;;  %v1878_v52 = vpop.xlane.xlu0 %1877  ;;  %2021 = vadd.xlane.f32.xlu0 %v5251_v1 }
 0x491   : > { %3714 = vpow2.f32 %v1969_v8  ;;  %v1933_v2 = vsub.f32 %v5174_v41, %v1878_v52 }
 0x492   : > { %v5256_v17 = vpop.eup %3704  ;;  %v1971_v20 = vmul.f32 1.442695, %v1932_v49 }
 0x493   : > { %v5258_v31 = vpop.eup %3706  ;;  %v1973_v33 = vmul.f32 1.442695, %v1933_v2  ;;  %v1880_v50 = vpop.xlane.xlu1 %1879  ;;  %2023 = vadd.xlane.f32.xlu1 %v5256_v17 }
 0x494   : > { %3716 = vpow2.f32 %v1971_v20  ;;  %v1934_v58 = vsub.f32 %v5179_v47, %v1880_v50  ;;  %v1882_v55 = vpop.xlane.xlu0 %1881  ;;  %2025 = vadd.xlane.f32.xlu0 %v5258_v31 }
 0x495   : > { %3718 = vpow2.f32 %v1973_v33  ;;  %v1935_v15 = vsub.f32 %v5171_v37, %v1882_v55 }
 0x496   : > { %v5264_v19 = vpop.eup %3708  ;;  %v1975_v41 = vmul.f32 1.442695, %v1934_v58 }
 0x497   : > { %v5266_v56 = vpop.eup %3710  ;;  %v1977_v28 = vmul.f32 1.442695, %v1935_v15  ;;  %v1884_v42 = vpop.xlane.xlu1 %1883  ;;  %2027 = vadd.xlane.f32.xlu1 %v5264_v19 }
 0x498   : > { %3720 = vpow2.f32 %v1975_v41  ;;  %v1936_v38 = vsub.f32 %v5177_v46, %v1884_v42  ;;  %v1886_v3 = vpop.xlane.xlu0 %1885  ;;  %2029 = vadd.xlane.f32.xlu0 %v5266_v56 }
 0x499   : > { %3722 = vpow2.f32 %v1977_v28  ;;  %v1937_v47 = vsub.f32 %v5186_v62, %v1886_v3 }
 0x49a   : > { %v5272_v10 = vpop.eup %3712  ;;  %v1979_v37 = vmul.f32 1.442695, %v1936_v38 }
 0x49b   : > { %v5274_v30 = vpop.eup %3714  ;;  %v1981_v25 = vmul.f32 1.442695, %v1937_v47  ;;  %v1888_v0 = vpop.xlane.xlu1 %1887  ;;  %2031 = vadd.xlane.f32.xlu1 %v5272_v10 }
 0x49c   : > { %3724 = vpow2.f32 %v1979_v37  ;;  %v1938_v53 = vsub.f32 %v5191_v48, %v1888_v0  ;;  %v1890_v12 = vpop.xlane.xlu0 %1889  ;;  %2033 = vadd.xlane.f32.xlu0 %v5274_v30 }
 0x49d   : > { %3726 = vpow2.f32 %v1981_v25  ;;  %v1939_v46 = vsub.f32 %v5183_v32, %v1890_v12 }
 0x49e   : > { %v5280_v7 = vpop.eup %3716  ;;  %v1983_v62 = vmul.f32 1.442695, %v1938_v53 }
 0x49f   : > { %v5282_v23 = vpop.eup %3718  ;;  %v1985_v44 = vmul.f32 1.442695, %v1939_v46  ;;  %v1892_v57 = vpop.xlane.xlu1 %1891  ;;  %2035 = vadd.xlane.f32.xlu1 %v5280_v7 }
 0x4a0   : > { %3728 = vpow2.f32 %v1983_v62  ;;  %v1940_v45 = vsub.f32 %v5189_v16, %v1892_v57  ;;  %v1894_v11 = vpop.xlane.xlu0 %1893  ;;  %2037 = vadd.xlane.f32.xlu0 %v5282_v23 }
 0x4a1   : > { %3730 = vpow2.f32 %v1985_v44  ;;  %v1941_v48 = vsub.f32 %v5198_v27, %v1894_v11 }
 0x4a2   : > { %v5288_v18 = vpop.eup %3720  ;;  %v1987_v32 = vmul.f32 1.442695, %v1940_v45 }
 0x4a3   : > { %v5290_v40 = vpop.eup %3722  ;;  %v1989_v8 = vmul.f32 1.442695, %v1941_v48  ;;  %v1896_v36 = vpop.xlane.xlu1 %1895  ;;  %2039 = vadd.xlane.f32.xlu1 %v5288_v18 }
 0x4a4   : > { %3732 = vpow2.f32 %v1987_v32  ;;  %v1942_v49 = vsub.f32 %v5203_v61, %v1896_v36  ;;  %v1898_v52 = vpop.xlane.xlu0 %1897  ;;  %2041 = vadd.xlane.f32.xlu0 %v5290_v40 }
 0x4a5   : > { %3734 = vpow2.f32 %v1989_v8  ;;  %v1943_v16 = vsub.f32 %v5195_v63, %v1898_v52 }
 0x4a6   : > { %v5296_v2 = vpop.eup %3724  ;;  %v1991_v27 = vmul.f32 1.442695, %v1942_v49 }
 0x4a7   : > { %v5298_v20 = vpop.eup %3726  ;;  %v1993_v33 = vmul.f32 1.442695, %v1943_v16  ;;  %v1900_v50 = vpop.xlane.xlu1 %1899  ;;  %2043 = vadd.xlane.f32.xlu1 %v5296_v2 }
 0x4a8   : > { %3736 = vpow2.f32 %v1991_v27  ;;  %v1944_v58 = vsub.f32 %v5201_v51, %v1900_v50  ;;  %v1902_v55 = vpop.xlane.xlu0 %1901  ;;  %2045 = vadd.xlane.f32.xlu0 %v5298_v20 }
 0x4a9   : > { %3738 = vpow2.f32 %v1993_v33  ;;  %v1945_v61 = vsub.f32 %v5210_v22, %v1902_v55 }
 0x4aa   : > { %v5304_v15 = vpop.eup %3728  ;;  %v1995_v63 = vmul.f32 1.442695, %v1944_v58 }
 0x4ab   : > { %v5306_v41 = vpop.eup %3730  ;;  %v1997_v28 = vmul.f32 1.442695, %v1945_v61  ;;  %v1904_v42 = vpop.xlane.xlu1 %1903  ;;  %2047 = vadd.xlane.f32.xlu1 %v5304_v15 }
 0x4ac   : > { %3740 = vpow2.f32 %v1995_v63  ;;  %v1946_v38 = vsub.f32 %v5215_v6, %v1904_v42  ;;  %v1906_v3 = vpop.xlane.xlu0 %1905  ;;  %2049 = vadd.xlane.f32.xlu0 %v5306_v41 }
 0x4ad   : > { %3742 = vpow2.f32 %v1997_v28  ;;  %v1947_v51 = vsub.f32 %v5207_v4, %v1906_v3 }
 0x4ae   : > { %v5312_v47 = vpop.eup %3732  ;;  %v1999_v22 = vmul.f32 1.442695, %v1946_v38 }
 0x4af   : > { %v5314_v37 = vpop.eup %3734  ;;  %v2001_v25 = vmul.f32 1.442695, %v1947_v51  ;;  %v1908_v0 = vpop.xlane.xlu1 %1907  ;;  %2051 = vadd.xlane.f32.xlu1 %v5312_v47 }
 0x4b0   : > { %3744 = vpow2.f32 %v1999_v22  ;;  %v1948_v53 = vsub.f32 %v5213_v34, %v1908_v0  ;;  %v1910_v12 = vpop.xlane.xlu0 %1909  ;;  %2053 = vadd.xlane.f32.xlu0 %v5314_v37 }
 0x4b1   : > { %3746 = vpow2.f32 %v2001_v25  ;;  %v1949_v6 = vsub.f32 %v5222_v29, %v1910_v12  ;;  %v3656_v12 = vld [vmem:[#allocation20 + $0x4] ss:$8 sps:$4 sm:$0xff]  }
 0x4b2   : > { %v5320_v46 = vpop.eup %3736  ;;  %v2003_v4 = vmul.f32 1.442695, %v1948_v53  ;;  %v3654_v53 = vld [vmem:[#allocation20] ss:$8 sps:$4 sm:$0xff]   ;;  %2659 = vmatprep.subr.bf16.mxu0 %v3656_v12 }
 0x4b3   : > { %v5322_v62 = vpop.eup %3738  ;;  %v2005_v44 = vmul.f32 1.442695, %v1949_v6  ;;  %v1912_v57 = vpop.xlane.xlu1 %1911  ;;  %2055 = vadd.xlane.f32.xlu1 %v5320_v46  ;;  %v3659_v6 = vld [vmem:[#allocation20 + $0x14] ss:$8 sps:$4 sm:$0xff]   ;;  %2660 = vmatpush1.bf16.msra.mxu0 %v3654_v53 }
 0x4b4   : > { %3748 = vpow2.f32 %v2003_v4  ;;  %v1950_v45 = vsub.f32 %v5227_v13, %v1912_v57  ;;  %v1914_v11 = vpop.xlane.xlu0 %1913  ;;  %2057 = vadd.xlane.f32.xlu0 %v5322_v62  ;;  %v3657_v4 = vld [vmem:[#allocation20 + $0x10] ss:$8 sps:$4 sm:$0xff]   ;;  %2661 = vmatprep.subr.bf16.mxu0 %v3659_v6  ;;  %v3660_v57 = vld [vmem:[#allocation20 + $0x20] ss:$8 sps:$4 sm:$0xff]  }
 0x4b5   : > { %3750 = vpow2.f32 %v2005_v44  ;;  %v1951_v34 = vsub.f32 %v5219_v24, %v1914_v11  ;;  %v3662_v44 = vld [vmem:[#allocation20 + $0x24] ss:$8 sps:$4 sm:$0xff]   ;;  %v3663_v11 = vld [vmem:[#allocation20 + $0x30] ss:$8 sps:$4 sm:$0xff]  }
 0x4b6   : > { %v5328_v48 = vpop.eup %3740  ;;  %v2007_v29 = vmul.f32 1.442695, %v1950_v45  ;;  %v3665_v45 = vld [vmem:[#allocation20 + $0x34] ss:$8 sps:$4 sm:$0xff]  }
 0x4b7   : > { %v5330_v32 = vpop.eup %3742  ;;  %v2009_v8 = vmul.f32 1.442695, %v1951_v34  ;;  %v1916_v36 = vpop.xlane.xlu1 %1915  ;;  %2059 = vadd.xlane.f32.xlu1 %v5328_v48  ;;  %2662 = vmatpush1.bf16.msra.mxu0 %v3657_v4  ;;  %v3668_v34 = vld [vmem:[#allocation20 + $0x44] ss:$8 sps:$4 sm:$0xff]  }
 0x4b8   : > { %3752 = vpow2.f32 %v2007_v29  ;;  %v1952_v49 = vsub.f32 %v5225_v9, %v1916_v36  ;;  %v1922_v52 = vpop.xlane.xlu0 %1921  ;;  %2061 = vadd.xlane.f32.xlu0 %v5330_v32  ;;  %2663 = vmatprep.subr.bf16.mxu0 %v3662_v44  ;;  %v3666_v29 = vld [vmem:[#allocation20 + $0x40] ss:$8 sps:$4 sm:$0xff]   ;;  %v3669_v36 = vld [vmem:[#allocation20 + $0x50] ss:$8 sps:$4 sm:$0xff]  }
 0x4b9   : > { %3754 = vpow2.f32 %v2009_v8  ;;  %v1955_v50 = vsub.f32 %v5231_v60, %v1922_v52  ;;  %v3671_v8 = vld [vmem:[#allocation20 + $0x54] ss:$8 sps:$4 sm:$0xff]   ;;  %v3672_v52 = vld [vmem:[#allocation20 + $0x60] ss:$8 sps:$4 sm:$0xff]  }
 0x4ba   : > { %v5335_v13 = vpop.eup %3744  ;;  %v2011_v16 = vmul.f32 1.442695, %v1952_v49  ;;  %v3674_v49 = vld [vmem:[#allocation20 + $0x64] ss:$8 sps:$4 sm:$0xff]  }
 0x4bb   : > { %v5337_v24 = vpop.eup %3746  ;;  %v1924_v27 = vpop.xlane.xlu1 %1923  ;;  %2063 = vadd.xlane.f32.xlu1 %v5335_v13  ;;  %v2017_v38 = vmul.f32 1.442695, %v1955_v50  ;;  %2664 = vmatpush1.bf16.msra.mxu0 %v3660_v57 }
 0x4bc   : > { %3756 = vpow2.f32 %v2011_v16  ;;  %2065 = vadd.xlane.f32.xlu0 %v5337_v24  ;;  %v1918_v33 = vpop.xlane.xlu0 %1917  ;;  %v1956_v28 = vsub.f32 %v5237_v35, %v1924_v27  ;;  %2665 = vmatprep.subr.bf16.mxu0 %v3665_v45 }
 0x4bd   : > { %v1953_v9 = vsub.f32 %v5234_v59, %v1918_v33 }
 0x4be   : > { %v5343_v58 = vpop.eup %3748  ;;  %v2019_v51 = vmul.f32 1.442695, %v1956_v28 }
 0x4bf   : > { %v5345_v55 = vpop.eup %3750  ;;  %v2013_v61 = vmul.f32 1.442695, %v1953_v9  ;;  %2067 = vadd.xlane.f32.xlu1 %v5343_v58  ;;  %v1920_v63 = vpop.xlane.xlu1 %1919  ;;  %2666 = vmatpush1.bf16.msra.mxu0 %v3663_v11 }
 0x4c0   : > { %v1954_v42 = vsub.f32 %v5239_v14, %v1920_v63  ;;  %2069 = vadd.xlane.f32.xlu0 %v5345_v55  ;;  %2667 = vmatprep.subr.bf16.mxu0 %v3668_v34 }
 0x4c1   : > { %3758 = vpow2.f32 %v2013_v61 }
 0x4c2   : > { %v5351_v3 = vpop.eup %3752  ;;  %v2015_v60 = vmul.f32 1.442695, %v1954_v42 }
 0x4c3   : > { %v5353_v59 = vpop.eup %3754  ;;  %2071 = vadd.xlane.f32.xlu1 %v5351_v3  ;;  %2668 = vmatpush1.bf16.msra.mxu0 %v3666_v29 }
 0x4c4   : > { %3760 = vpow2.f32 %v2015_v60  ;;  %2073 = vadd.xlane.f32.xlu0 %v5353_v59  ;;  %2669 = vmatprep.subr.bf16.mxu0 %v3671_v8 }
 0x4c5   : > { %3762 = vpow2.f32 %v2017_v38 }
 0x4c6   : > { %v5357_v22 = vpop.eup %3756  ;;  %3764 = vpow2.f32 %v2019_v51 }
 0x4c7   : > { %2075 = vadd.xlane.f32.xlu1 %v5357_v22  ;;  %2670 = vmatpush1.bf16.msra.mxu0 %v3669_v36 }
 0x4c8   : > { %2671 = vmatprep.subr.bf16.mxu0 %v3674_v49  ;;  %v5760_v49 = vld [vmem:[#allocation40_spill] sm:$0xff] }
 0x4cb   : > { %v5360_v35 = vpop.eup %3758  ;;  %2672 = vmatpush1.bf16.msra.mxu0 %v3672_v52 }
 0x4cc   : > { %2077 = vadd.xlane.f32.xlu0 %v5360_v35 }
 0x4ce   : > { %v5363_v14 = vpop.eup %3760 }
 0x4cf   : > { %v5365_v25 = vpop.eup %3762  ;;  %2079 = vadd.xlane.f32.xlu1 %v5363_v14 }
 0x4d0   : > { %2081 = vadd.xlane.f32.xlu0 %v5365_v25  ;;  %v5369_v0 = vpop.eup %3764 }
 0x4d3   : > { %2083 = vadd.xlane.f32.xlu1 %v5369_v0 }
 0x51d   : > { %v2022_v16 = vpop.xlane.xlu0 %2021 }
 0x51e   : > { %3766 = vrcp.f32 %v2022_v16 }
 0x520   : > { %v2024_v27 = vpop.xlane.xlu1 %2023 }
 0x521   : > { %3768 = vrcp.f32 %v2024_v27  ;;  %v2026_v33 = vpop.xlane.xlu0 %2025 }
 0x522   : > { %3770 = vrcp.f32 %v2026_v33 }
 0x524   : > { %v2028_v50 = vpop.xlane.xlu1 %2027 }
 0x525   : > { %3772 = vrcp.f32 %v2028_v50  ;;  %v2030_v9 = vpop.xlane.xlu0 %2029  ;;  %v5761_v50 = vld [vmem:[#allocation41_spill] sm:$0xff] }
 0x526   : > { %3774 = vrcp.f32 %v2030_v9 }
 0x528   : > { %v2032_v61 = vpop.xlane.xlu1 %2031  ;;  %v3767_v63 = vpop.eup %3766 }
 0x529   : > { %3776 = vrcp.f32 %v2032_v61  ;;  %v2034_v28 = vpop.xlane.xlu0 %2033  ;;  %v5373_v60 = vmul.f32 %v3767_v63, %v5251_v1 }
 0x52a   : > { %3778 = vrcp.f32 %v2034_v28 }
 0x52b   : > { %v3769_v42 = vpop.eup %3768 }
 0x52c   : > { %v2036_v38 = vpop.xlane.xlu1 %2035  ;;  %v5376_v51 = vmul.f32 %v3769_v42, %v5256_v17  ;;  %v3771_v53 = vpop.eup %3770 }
 0x52d   : > { %3780 = vrcp.f32 %v2036_v38  ;;  %v2038_v12 = vpop.xlane.xlu0 %2037  ;;  %v5381_v44 = vmul.f32 %v3771_v53, %v5258_v31 }
 0x52e   : > { %v2197_v6 = vpack.c.bf16 %v5376_v51, %v5373_v60  ;;  %3782 = vrcp.f32 %v2038_v12 }
 0x52f   : > { %v3773_v4 = vpop.eup %3772 }
 0x530   : > { %v5384_v57 = vmul.f32 %v3773_v4, %v5264_v19  ;;  %3348 = vmatprep.mubr.bf16.mxu1 %v2197_v6  ;;  %v2040_v1 = vpop.xlane.xlu1 %2039  ;;  %v3775_v45 = vpop.eup %3774 }
 0x531   : > { %3784 = vrcp.f32 %v2040_v1  ;;  %v2042_v17 = vpop.xlane.xlu0 %2041  ;;  %v5389_v8 = vmul.f32 %v3775_v45, %v5266_v56 }
 0x532   : > { %v2198_v11 = vpack.c.bf16 %v5384_v57, %v5381_v44  ;;  %3786 = vrcp.f32 %v2042_v17 }
 0x533   : > { %v3777_v34 = vpop.eup %3776 }
 0x534   : > { %3349 = vmatmul.mubr.bf16.vlgmr.msra.gmra.mrb[64].mxu1 %v2198_v11  ;;  %v2044_v29 = vpop.xlane.xlu1 %2043  ;;  %v5392_v31 = vmul.f32 %v3777_v34, %v5272_v10  ;;  %v3779_v19 = vpop.eup %3778 }
 0x535   : > { %3365 = vmatpush3.bf16.msra.mxu1 %v5759_v5  ;;  %3788 = vrcp.f32 %v2044_v29  ;;  %v2046_v36 = vpop.xlane.xlu0 %2045  ;;  %v5399_v56 = vmul.f32 %v3779_v19, %v5274_v30 }
 0x536   : > { %3366 = vmatprep.subr.bf16.mxu1 %v5760_v49  ;;  %v2199_v52 = vpack.c.bf16 %v5392_v31, %v5389_v8  ;;  %3790 = vrcp.f32 %v2046_v36 }
 0x537   : > { %v3781_v16 = vpop.eup %3780 }
 0x538   : > { %3352 = vmatprep.mubr.bf16.mxu1 %v2199_v52  ;;  %v2048_v27 = vpop.xlane.xlu1 %2047  ;;  %v5402_v10 = vmul.f32 %v3781_v16, %v5280_v7  ;;  %v3783_v33 = vpop.eup %3782 }
 0x539   : > { %3367 = vmatpush3.bf16.msra.mxu1 %v5760_v49  ;;  %3792 = vrcp.f32 %v2048_v27  ;;  %v2050_v5 = vpop.xlane.xlu0 %2049  ;;  %v5409_v30 = vmul.f32 %v3783_v33, %v5282_v23 }
 0x53a   : > { %3368 = vmatprep.subr.bf16.mxu1 %v5761_v50  ;;  %v2200_v9 = vpack.c.bf16 %v5402_v10, %v5399_v56  ;;  %3794 = vrcp.f32 %v2050_v5 }
 0x53b   : > { %v3785_v61 = vpop.eup %3784 }
 0x53c   : > { %3353 = vmatmul.mubr.bf16.gmra.mrb[68].mxu1 %v2200_v9  ;;  %v2052_v63 = vpop.xlane.xlu1 %2051  ;;  %v5412_v7 = vmul.f32 %v3785_v61, %v5288_v18  ;;  %v3787_v28 = vpop.eup %3786 }
 0x53d   : > { %3369 = vmatpush3.bf16.msra.mxu1 %v5761_v50  ;;  %3796 = vrcp.f32 %v2052_v63  ;;  %v2054_v42 = vpop.xlane.xlu0 %2053  ;;  %v5419_v23 = vmul.f32 %v3787_v28, %v5290_v40 }
 0x53e   : > { %3798 = vrcp.f32 %v2054_v42  ;;  %3370 = vmatprep.subr.bf16.mxu1 %v5050_v54  ;;  %v2201_v38 = vpack.c.bf16 %v5412_v7, %v5409_v30 }
 0x53f   : > { %v3789_v53 = vpop.eup %3788 }
 0x540   : > { %3356 = vmatprep.mubr.bf16.mxu1 %v2201_v38  ;;  %v2056_v12 = vpop.xlane.xlu1 %2055  ;;  %v5422_v18 = vmul.f32 %v3789_v53, %v5296_v2  ;;  %v3791_v6 = vpop.eup %3790 }
 0x541   : > { %3371 = vmatpush3.bf16.msra.mxu1 %v5050_v54  ;;  %3800 = vrcp.f32 %v2056_v12  ;;  %v2058_v4 = vpop.xlane.xlu0 %2057  ;;  %v5429_v40 = vmul.f32 %v3791_v6, %v5298_v20 }
 0x542   : > { %3802 = vrcp.f32 %v2058_v4  ;;  %3372 = vmatprep.subr.bf16.mxu1 %v5060_v21  ;;  %v2202_v1 = vpack.c.bf16 %v5422_v18, %v5419_v23 }
 0x543   : > { %v3793_v45 = vpop.eup %3792 }
 0x544   : > { %3357 = vmatmul.mubr.bf16.gmra.mrb[72].mxu1 %v2202_v1  ;;  %v2060_v17 = vpop.xlane.xlu1 %2059  ;;  %v5432_v2 = vmul.f32 %v3793_v45, %v5304_v15  ;;  %v3795_v11 = vpop.eup %3794 }
 0x545   : > { %3373 = vmatpush3.bf16.msra.mxu1 %v5060_v21  ;;  %3804 = vrcp.f32 %v2060_v17  ;;  %v2062_v54 = vpop.xlane.xlu0 %2061  ;;  %v5439_v20 = vmul.f32 %v3795_v11, %v5306_v41 }
 0x546   : > { %3806 = vrcp.f32 %v2062_v54  ;;  %3374 = vmatprep.subr.bf16.mxu1 %v5078_v43  ;;  %v2203_v34 = vpack.c.bf16 %v5432_v2, %v5429_v40 }
 0x547   : > { %v3797_v29 = vpop.eup %3796 }
 0x548   : > { %v3799_v19 = vpop.eup %3798  ;;  %3360 = vmatprep.mubr.bf16.mxu1 %v2203_v34  ;;  %v2064_v36 = vpop.xlane.xlu1 %2063  ;;  %v5442_v15 = vmul.f32 %v3797_v29, %v5312_v47 }
 0x549   : > { %3375 = vmatpush3.bf16.msra.mxu1 %v5078_v43  ;;  %3808 = vrcp.f32 %v2064_v36  ;;  %v2066_v21 = vpop.xlane.xlu0 %2065  ;;  %v2133_v49 = vmul.f32 %v3799_v19, %v5314_v37 }
 0x54a   : > { %3810 = vrcp.f32 %v2066_v21  ;;  %3376 = vmatprep.subr.bf16.mxu1 %v5094_v39  ;;  %v2204_v52 = vpack.c.bf16 %v5442_v15, %v5439_v20 }
 0x54b   : > { %v3801_v16 = vpop.eup %3800  ;;  %v2149_v27 = vadd.f32 %v2133_v49, %v5373_v60 }
 0x54c   : > { %v3803_v41 = vpop.eup %3802  ;;  %3361 = vmatmul.mubr.bf16.gmra.mrb[76].mxu1 %v2204_v52  ;;  %v2068_v47 = vpop.xlane.xlu1 %2067  ;;  %v2134_v33 = vmul.f32 %v3801_v16, %v5320_v46 }
 0x54d   : > { %v2135_v43 = vmul.f32 %v3803_v41, %v5322_v62  ;;  %3377 = vmatpush3.bf16.msra.mxu1 %v5094_v39  ;;  %3812 = vrcp.f32 %v2068_v47  ;;  %v2070_v37 = vpop.xlane.xlu0 %2069  ;;  %v2165_v5 = vmul.f32 0.5, %v2149_v27 }
 0x54e   : > { %3814 = vrcp.f32 %v2070_v37  ;;  %3378 = vmatprep.subr.bf16.mxu1 %v5106_v26  ;;  %v2150_v50 = vadd.f32 %v2134_v33, %v5376_v51  ;;  %v2205_v9 = vpack.c.bf16 %v2134_v33, %v2133_v49 }
 0x54f   : > { %v3805_v60 = vpop.eup %3804  ;;  %v2151_v61 = vadd.f32 %v2135_v43, %v5381_v44  ;;  %2181 = vst [vmem:[%s5458_s23] sm:$0xff] %v2165_v5 }
 0x550   : > { %v3807_v39 = vpop.eup %3806  ;;  %v2136_v46 = vmul.f32 %v3805_v60, %v5328_v48  ;;  %v2166_v62 = vmul.f32 0.5, %v2150_v50  ;;  %3380 = vmatprep.mubr.bf16.mxu1 %v2205_v9  ;;  %v2072_v63 = vpop.xlane.xlu1 %2071 }
 0x551   : > { %v2167_v28 = vmul.f32 0.5, %v2151_v61  ;;  %3379 = vmatpush3.bf16.msra.mxu1 %v5106_v26  ;;  %3816 = vrcp.f32 %v2072_v63  ;;  %v2074_v51 = vpop.xlane.xlu0 %2073  ;;  %v2137_v44 = vmul.f32 %v3807_v39, %v5330_v32 }
 0x552   : > { %v2152_v42 = vadd.f32 %v2136_v46, %v5384_v57  ;;  %2182 = vst [vmem:[%s5458_s23 + $0x8] sm:$0xff] %v2166_v62  ;;  %3818 = vrcp.f32 %v2074_v51  ;;  %v2206_v38 = vpack.c.bf16 %v2136_v46, %v2135_v43 }
 0x553   : > { %v3809_v53 = vpop.eup %3808  ;;  %2183 = vst [vmem:[%s5458_s23 + $0x10] sm:$0xff] %v2167_v28  ;;  %v2153_v48 = vadd.f32 %v2137_v44, %v5389_v8 }
 0x554   : > { %v3811_v12 = vpop.eup %3810  ;;  %v2168_v6 = vmul.f32 0.5, %v2152_v42  ;;  %3381 = vmatmul.mubr.bf16.vlgmr.msra.gmra.mrb[80].mxu1 %v2206_v38  ;;  %v2076_v4 = vpop.xlane.xlu1 %2075  ;;  %v2138_v26 = vmul.f32 %v3809_v53, %v5335_v13  ;;  %v3680_v38 = vld [vmem:[#allocation20 + $0x84] ss:$8 sps:$4 sm:$0xff]   ;;  %v3678_v53 = vld [vmem:[#allocation20 + $0x80] ss:$8 sps:$4 sm:$0xff]  }
 0x555   : > { %3820 = vrcp.f32 %v2076_v4  ;;  %v2169_v32 = vmul.f32 0.5, %v2153_v48  ;;  %v2139_v1 = vmul.f32 %v3811_v12, %v5337_v24  ;;  %v3681_v48 = vld [vmem:[#allocation20 + $0x90] ss:$8 sps:$4 sm:$0xff]   ;;  %v3684_v12 = vld [vmem:[#allocation20 + $0xa0] ss:$8 sps:$4 sm:$0xff]  }
 0x556   : > { %2184 = vst [vmem:[%s5458_s23 + $0x18] sm:$0xff] %v2168_v6  ;;  %v2154_v57 = vadd.f32 %v2138_v26, %v5392_v31  ;;  %v2207_v45 = vpack.c.bf16 %v2138_v26, %v2137_v44  ;;  %v3687_v6 = vld [vmem:[#allocation20 + $0xb0] ss:$8 sps:$4 sm:$0xff]   ;;  %v3692_v4 = vld [vmem:[#allocation20 + $0xc4] ss:$8 sps:$4 sm:$0xff]  }
 0x557   : > { %v3813_v17 = vpop.eup %3812  ;;  %2185 = vst [vmem:[%s5458_s23 + $0x20] sm:$0xff] %v2169_v32  ;;  %v2155_v8 = vadd.f32 %v2139_v1, %v5399_v56  ;;  %v3690_v26 = vld [vmem:[#allocation20 + $0xc0] ss:$8 sps:$4 sm:$0xff]   ;;  %v3695_v32 = vld [vmem:[#allocation20 + $0xd4] ss:$8 sps:$4 sm:$0xff]  }
 0x558   : > { %v3815_v11 = vpop.eup %3814  ;;  %v2170_v54 = vmul.f32 0.5, %v2154_v57  ;;  %3384 = vmatprep.mubr.bf16.mxu1 %v2207_v45  ;;  %v2140_v34 = vmul.f32 %v3813_v17, %v5343_v58  ;;  %v3698_v57 = vld [vmem:[#allocation20 + $0xe4] ss:$8 sps:$4 sm:$0xff]   ;;  %v3696_v45 = vld [vmem:[#allocation20 + $0xe0] ss:$8 sps:$4 sm:$0xff]  }
 0x559   : > { %v2078_v13 = vpop.xlane.xlu0 %2077  ;;  %v2171_v29 = vmul.f32 0.5, %v2155_v8  ;;  %v2141_v19 = vmul.f32 %v3815_v11, %v5345_v55  ;;  %v3701_v17 = vld [vmem:[#allocation20 + $0xf4] ss:$8 sps:$4 sm:$0xff]   ;;  %v3699_v8 = vld [vmem:[#allocation20 + $0xf0] ss:$8 sps:$4 sm:$0xff]  }
 0x55a   : > { %2186 = vst [vmem:[%s5458_s23 + $0x28] sm:$0xff] %v2170_v54  ;;  %3822 = vrcp.f32 %v2078_v13  ;;  %v2156_v24 = vadd.f32 %v2140_v34, %v5402_v10  ;;  %v2208_v31 = vpack.c.bf16 %v2140_v34, %v2139_v1  ;;  %v3693_v1 = vld [vmem:[#allocation20 + $0xd0] ss:$8 sps:$4 sm:$0xff]  }
 0x55b   : > { %v3817_v36 = vpop.eup %3816  ;;  %2187 = vst [vmem:[%s5458_s23 + $0x30] sm:$0xff] %v2171_v29  ;;  %v2157_v56 = vadd.f32 %v2141_v19, %v5409_v30 }
 0x55c   : > { %v3819_v21 = vpop.eup %3818  ;;  %v2172_v49 = vmul.f32 0.5, %v2156_v24  ;;  %3385 = vmatmul.mubr.bf16.gmra.mrb[84].mxu1 %v2208_v31  ;;  %v2080_v52 = vpop.xlane.xlu1 %2079  ;;  %v2142_v58 = vmul.f32 %v3817_v36, %v5351_v3 }
 0x55d   : > { %3824 = vrcp.f32 %v2080_v52  ;;  %v2082_v16 = vpop.xlane.xlu0 %2081  ;;  %v2173_v55 = vmul.f32 0.5, %v2157_v56  ;;  %v2143_v27 = vmul.f32 %v3819_v21, %v5353_v59 }
 0x55e   : > { %2188 = vst [vmem:[%s5458_s23 + $0x38] sm:$0xff] %v2172_v49  ;;  %3826 = vrcp.f32 %v2082_v16  ;;  %v2158_v10 = vadd.f32 %v2142_v58, %v5412_v7  ;;  %v2209_v41 = vpack.c.bf16 %v2142_v58, %v2141_v19 }
 0x55f   : > { %v3821_v47 = vpop.eup %3820  ;;  %2189 = vst [vmem:[%s5458_s23 + $0x40] sm:$0xff] %v2173_v55  ;;  %v2159_v30 = vadd.f32 %v2143_v27, %v5419_v23 }
 0x560   : > { %v2174_v33 = vmul.f32 0.5, %v2158_v10  ;;  %3388 = vmatprep.mubr.bf16.mxu1 %v2209_v41  ;;  %v2084_v3 = vpop.xlane.xlu1 %2083  ;;  %v2144_v43 = vmul.f32 %v3821_v47, %v5357_v22 }
 0x561   : > { %3828 = vrcp.f32 %v2084_v3  ;;  %v2175_v37 = vmul.f32 0.5, %v2159_v30 }
 0x562   : > { %2190 = vst [vmem:[%s5458_s23 + $0x48] sm:$0xff] %v2174_v33  ;;  %v2160_v59 = vadd.f32 %v2144_v43, %v5422_v18  ;;  %v2210_v5 = vpack.c.bf16 %v2144_v43, %v2143_v27 }
 0x563   : > { %2191 = vst [vmem:[%s5458_s23 + $0x50] sm:$0xff] %v2175_v37 }
 0x564   : > { %v3823_v7 = vpop.eup %3822  ;;  %v2176_v50 = vmul.f32 0.5, %v2160_v59  ;;  %3389 = vmatmul.mubr.bf16.gmra.mrb[88].mxu1 %v2210_v5 }
 0x565   : > { %v2145_v9 = vmul.f32 %v3823_v7, %v5360_v35 }
 0x566   : > { %2192 = vst [vmem:[%s5458_s23 + $0x58] sm:$0xff] %v2176_v50 }
 0x567   : > { %v3825_v23 = vpop.eup %3824  ;;  %v2161_v60 = vadd.f32 %v2145_v9, %v5429_v40 }
 0x568   : > { %v3827_v61 = vpop.eup %3826  ;;  %v2146_v22 = vmul.f32 %v3825_v23, %v5363_v14 }
 0x569   : > { %v2177_v39 = vmul.f32 0.5, %v2161_v60  ;;  %v2147_v18 = vmul.f32 %v3827_v61, %v5365_v25  ;;  %v3677_v25 = vld [vmem:[#allocation20 + $0x74] ss:$8 sps:$4 sm:$0xff]  }
 0x56a   : > { %v2162_v46 = vadd.f32 %v2146_v22, %v5432_v2  ;;  %v2211_v62 = vpack.c.bf16 %v2146_v22, %v2145_v9  ;;  %v3675_v2 = vld [vmem:[#allocation20 + $0x70] ss:$8 sps:$4 sm:$0xff]   ;;  %2673 = vmatprep.subr.bf16.mxu0 %v3677_v25 }
 0x56b   : > { %v3829_v63 = vpop.eup %3828  ;;  %2193 = vst [vmem:[%s5458_s23 + $0x60] sm:$0xff] %v2177_v39  ;;  %v2163_v35 = vadd.f32 %v2147_v18, %v5439_v20  ;;  %2674 = vmatpush1.bf16.msra.mxu0 %v3675_v2  ;;  %v3683_v20 = vld [vmem:[#allocation20 + $0x94] ss:$8 sps:$4 sm:$0xff]  }
 0x56c   : > { %v2178_v28 = vmul.f32 0.5, %v2162_v46  ;;  %3392 = vmatprep.mubr.bf16.mxu1 %v2211_v62  ;;  %v2148_v51 = vmul.f32 %v3829_v63, %v5369_v0  ;;  %2675 = vmatprep.subr.bf16.mxu0 %v3680_v38  ;;  %v3686_v0 = vld [vmem:[#allocation20 + $0xa4] ss:$8 sps:$4 sm:$0xff]  }
 0x56d   : > { %v2179_v40 = vmul.f32 0.5, %v2163_v35 }
 0x56e   : > { %2194 = vst [vmem:[%s5458_s23 + $0x68] sm:$0xff] %v2178_v28  ;;  %v2164_v44 = vadd.f32 %v2148_v51, %v5442_v15  ;;  %v2212_v14 = vpack.c.bf16 %v2148_v51, %v2147_v18  ;;  %v3689_v15 = vld [vmem:[#allocation20 + $0xb4] ss:$8 sps:$4 sm:$0xff]  }
 0x56f   : > { %2195 = vst [vmem:[%s5458_s23 + $0x70] sm:$0xff] %v2179_v40  ;;  %2676 = vmatpush1.bf16.msra.mxu0 %v3678_v53 }
 0x570   : > { %v2180_v42 = vmul.f32 0.5, %v2164_v44  ;;  %3393 = vmatmul.mubr.bf16.gmra.mrb[92].mxu1 %v2212_v14  ;;  %2677 = vmatprep.subr.bf16.mxu0 %v3683_v20 }
 0x572   : > { %2196 = vst [vmem:[%s5458_s23 + $0x78] sm:$0xff] %v2180_v42 }
 0x573   : > { %2678 = vmatpush1.bf16.msra.mxu0 %v3681_v48 }
 0x574   : > { %2679 = vmatprep.subr.bf16.mxu0 %v3686_v0 }
 0x577   : > { %2680 = vmatpush1.bf16.msra.mxu0 %v3684_v12 }
 0x578   : > { %2681 = vmatprep.subr.bf16.mxu0 %v3689_v15 }
 0x57b   : > { %2682 = vmatpush1.bf16.msra.mxu0 %v3687_v6 }
 0x57c   : > { %2683 = vmatprep.subr.bf16.mxu0 %v3692_v4 }
 0x57f   : > { %2684 = vmatpush1.bf16.msra.mxu0 %v3690_v26 }
 0x580   : > { %2685 = vmatprep.subr.bf16.mxu0 %v3695_v32 }
 0x583   : > { %2686 = vmatpush1.bf16.msra.mxu0 %v3693_v1 }
 0x584   : > { %2687 = vmatprep.subr.bf16.mxu0 %v3698_v57 }
 0x587   : > { %2688 = vmatpush1.bf16.msra.mxu0 %v3696_v45 }
 0x588   : > { %2689 = vmatprep.subr.bf16.mxu0 %v3701_v17 }
 0x58b   : > { %2690 = vmatpush1.bf16.msra.mxu0 %v3699_v8 }
 0x607   : > { %v3350_v11 = vpop.f32.mrb[64].mxu1 }
 0x608   : > { %v2247_v54 = vpop.f32.mrb[65].mxu1 }
 0x609   : > { %v3351_v34 = vpop.f32.mrb[66].mxu1 }
 0x60a   : > { %v2408_v13 = vpack.c.bf16 %v3351_v34, %v3350_v11  ;;  %v2250_v29 = vpop.f32.mrb[67].mxu1 }
 0x60b   : > { %v2407_v19 = vpack.c.bf16 %v2250_v29, %v2247_v54 }
 0x60f   : > { %v3354_v24 = vpop.f32.mrb[68].mxu1 }
 0x610   : > { %v2263_v31 = vpop.f32.mrb[69].mxu1 }
 0x611   : > { %v3355_v36 = vpop.f32.mrb[70].mxu1 }
 0x612   : > { %v2410_v56 = vpack.c.bf16 %v3355_v36, %v3354_v24  ;;  %v2266_v21 = vpop.f32.mrb[71].mxu1 }
 0x613   : > { %v2409_v49 = vpack.c.bf16 %v2266_v21, %v2263_v31 }
 0x617   : > { %v3358_v52 = vpop.f32.mrb[72].mxu1 }
 0x618   : > { %v2279_v58 = vpop.f32.mrb[73].mxu1 }
 0x619   : > { %v3359_v16 = vpop.f32.mrb[74].mxu1 }
 0x61a   : > { %v2412_v55 = vpack.c.bf16 %v3359_v16, %v3358_v52  ;;  %v2282_v27 = vpop.f32.mrb[75].mxu1 }
 0x61b   : > { %v2411_v10 = vpack.c.bf16 %v2282_v27, %v2279_v58 }
 0x61f   : > { %v3362_v41 = vpop.f32.mrb[76].mxu1 }
 0x620   : > { %v2295_v47 = vpop.f32.mrb[77].mxu1 }
 0x621   : > { %v3363_v30 = vpop.f32.mrb[78].mxu1 }
 0x622   : > { %v2414_v33 = vpack.c.bf16 %v3363_v30, %v3362_v41  ;;  %v2298_v3 = vpop.f32.mrb[79].mxu1 }
 0x623   : > { %v2413_v43 = vpack.c.bf16 %v2298_v3, %v2295_v47 }
 0x627   : > { %v3382_v37 = vpop.f32.mrb[80].mxu1 }
 0x628   : > { %v2344_v59 = vpop.f32.mrb[81].mxu1 }
 0x629   : > { %v3383_v5 = vpop.f32.mrb[82].mxu1 }
 0x62a   : > { %v2424_v7 = vpack.c.bf16 %v3383_v5, %v3382_v37  ;;  %v2347_v50 = vpop.f32.mrb[83].mxu1 }
 0x62b   : > { %v2423_v9 = vpack.c.bf16 %v2347_v50, %v2344_v59 }
 0x62d   : > { %2691 = vmatprep.mubr.bf16.mxu0 %v2423_v9 }
 0x62e   : > { %2692 = vmatmul.mubr.bf16.vlgmr.msra.gmra.mrb[64].mxu0 %v2407_v19 }
 0x62f   : > { %v3386_v23 = vpop.f32.mrb[84].mxu1  ;;  %2701 = vmatprep.mubr.bf16.mxu0 %v2424_v7 }
 0x630   : > { %v2360_v60 = vpop.f32.mrb[85].mxu1 }
 0x631   : > { %v3387_v61 = vpop.f32.mrb[86].mxu1 }
 0x632   : > { %v2426_v22 = vpack.c.bf16 %v3387_v61, %v3386_v23  ;;  %v2363_v39 = vpop.f32.mrb[87].mxu1 }
 0x633   : > { %v2425_v18 = vpack.c.bf16 %v2363_v39, %v2360_v60 }
 0x636   : > { %2702 = vmatmul.mubr.bf16.gmra.mrb[68].mxu0 %v2408_v13 }
 0x637   : > { %v3390_v46 = vpop.f32.mrb[88].mxu1  ;;  %2711 = vmatprep.mubr.bf16.mxu0 %v2425_v18 }
 0x638   : > { %v2376_v62 = vpop.f32.mrb[89].mxu1 }
 0x639   : > { %v3391_v63 = vpop.f32.mrb[90].mxu1 }
 0x63a   : > { %v2428_v35 = vpack.c.bf16 %v3391_v63, %v3390_v46  ;;  %v2379_v28 = vpop.f32.mrb[91].mxu1 }
 0x63b   : > { %v2427_v51 = vpack.c.bf16 %v2379_v28, %v2376_v62 }
 0x63e   : > { %2712 = vmatmul.mubr.bf16.gmra.mrb[72].mxu0 %v2409_v49 }
 0x63f   : > { %2721 = vmatprep.mubr.bf16.mxu0 %v2426_v22 }
 0x643   : > { %v3394_v40 = vpop.f32.mrb[92].mxu1 }
 0x644   : > { %v2392_v44 = vpop.f32.mrb[93].mxu1 }
 0x645   : > { %v3395_v14 = vpop.f32.mrb[94].mxu1 }
 0x646   : > { %v2430_v42 = vpack.c.bf16 %v3395_v14, %v3394_v40  ;;  %v2395_v25 = vpop.f32.mrb[95].mxu1  ;;  %2722 = vmatmul.mubr.bf16.gmra.mrb[76].mxu0 %v2410_v56 }
 0x647   : > { %v2429_v2 = vpack.c.bf16 %v2395_v25, %v2392_v44  ;;  %2731 = vmatprep.mubr.bf16.mxu0 %v2427_v51 }
 0x64e   : > { %2732 = vmatmul.mubr.bf16.gmra.mrb[80].mxu0 %v2411_v10 }
 0x64f   : > { %2741 = vmatprep.mubr.bf16.mxu0 %v2428_v35 }
 0x656   : > { %2742 = vmatmul.mubr.bf16.gmra.mrb[84].mxu0 %v2412_v55 }
 0x657   : > { %2751 = vmatprep.mubr.bf16.mxu0 %v2429_v2 }
 0x65e   : > { %2752 = vmatmul.mubr.bf16.gmra.mrb[88].mxu0 %v2413_v43 }
 0x65f   : > { %2761 = vmatprep.mubr.bf16.mxu0 %v2430_v42 }
 0x666   : > { %2762 = vmatmul.mubr.bf16.gmra.mrb[92].mxu0 %v2414_v33 }
 0x667   : > { %4127 = shalt.err (!%p4124_p3)
}
 0x668   : > { %s4128_s1 = scalar_lea.hbm %s5508_s3, 2048  ;;  %s4132_s20 = scalar_lea.hbm %s5763_s27, 4096 }
 0x669   : > { %p4129_p11 = scmp.ne.s32.totalorder %s5508_s3, %s4128_s1  ;;  %p4133_p13 = scmp.lt.u32.totalorder %s5508_s3, %s5763_s27 }
 0x66a   : > { %p4134_p4 = scmp.lt.u32.totalorder %s4132_s20, %s4128_s1  ;;  %p4136_p0 = scmp.lt.u32.totalorder %s4128_s1, %s5508_s3 }
 0x66b   : > { %p4130_p6 = pnand %p4129_p11, %p5764_p7 }
 0x66c   : > { %p4135_p9 = por %p4134_p4, %p4133_p13 }
 0x66d   : > { %p4131_p2 = pneg %p4130_p6 }
 0x66e   : > { %p4137_p5 = por %p4136_p0, %p4135_p9 }
 0x670   : > { %p4138_p1 = pnand %p4137_p5, %p4131_p2 }
 0x672   : > { %4141 = shalt.err (!%p4138_p1)
}
 0x673   : > { %s4270_s13 = smov 128   ;;  %s4271_s4 = smov 8   ;;  %v2487_v38 = vld [vmem:[#allocation21] sm:$0x3]  ;;  %v5765_v53 = vld [vmem:[#allocation37_spill] sm:$0xff]  ;;  %v5766_v48 = vld [vmem:[#allocation38_spill] sm:$0xff] }
 0x674   : > { %3433 = dma.vmem_to_hbm [thread:$0]  (%p5764_p7), %s5510_s0, 2048, %s5508_s3, %s2810_s2, %s4270_s13, %s4270_s13, %s4271_s4   ;;  %v5537_v20 = vrot.slane %v2487_v38, %v5765_v53  ;;  %v5540_v0 = vrot.slane %v2487_v38, %v5766_v48 }
 0x675   : > { %s5546_s14 = scalar_lea.vmem [#allocation23], %s3084_s10  ;;  %s3202_s10 = sshll.u32 %s5762_s11, 12 }
 0x676   : > { %s2826_s0 = sshll.u32 %s5546_s14, 4  ;;  %s5767_s12 = sld [smem:[#allocation51_spill]]  ;;  %s5613_s0 = int_to_ptr.vmem [resolvable:$true] %s2826_s0 }
 0x677   : > { %s2805_s11 = scalar_lea.sflag [#allocation8], %s4686_s29  ;;  %s4142_s26 = scalar_lea.vmem %s5613_s0, 4096 }
 0x678   : > { %p4143_p10 = scmp.ne.s32.totalorder %s5613_s0, %s4142_s26  ;;  %s4272_s15 = smov [#allocation23]  }
 0x679   : > { %s4146_s1 = sshll.u32 %s4272_s15, 4  ;;  %s4147_s1 = int_to_ptr.vmem [resolvable:$false] %s4146_s1 }
 0x67a   : > { %p4144_p12 = pnand %p4143_p10, %p5764_p7  ;;  %s4148_s6 = scalar_lea.vmem %s4147_s1, 8192 }
 0x67b   : > { %p4149_p3 = scmp.lt.s32.totalorder %s5613_s0, %s4147_s1  ;;  %p4150_p11 = scmp.lt.s32.totalorder %s4148_s6, %s4142_s26 }
 0x67c   : > { %s5611_s8 = scalar_lea.hbm %s5767_s12, %s3202_s10  ;;  %p4145_p8 = pneg %p4144_p12 }
 0x67d   : > { %p4151_p6 = por %p4150_p11, %p4149_p3 }
 0x67f   : > { %p4152_p2 = pnand %p4151_p6, %p4145_p8 }
 0x701   : > { %v2693_v12 = vpop.f32.mrb[64].mxu0 }
 0x702   : > { %v2694_v15 = vadd.f32 %v2693_v12, %v5537_v20  ;;  %v2695_v6 = vpop.f32.mrb[65].mxu0 }
 0x703   : > { %v2696_v4 = vadd.f32 %v2695_v6, %v5540_v0  ;;  %v2697_v26 = vpop.f32.mrb[66].mxu0 }
 0x704   : > { %2772 = vst [vmem:[%s5546_s14] sm:$0xff] %v2694_v15  ;;  %v2698_v32 = vadd.f32 %v2697_v26, %v5537_v20  ;;  %v2699_v1 = vpop.f32.mrb[67].mxu0 }
 0x705   : > { %2773 = vst [vmem:[%s5546_s14 + $0x8] sm:$0xff] %v2696_v4  ;;  %v2700_v57 = vadd.f32 %v2699_v1, %v5540_v0 }
 0x706   : > { %2774 = vst [vmem:[%s5546_s14 + $0x10] sm:$0xff] %v2698_v32 }
 0x707   : > { %2775 = vst [vmem:[%s5546_s14 + $0x18] sm:$0xff] %v2700_v57 }
 0x709   : > { %v2703_v45 = vpop.f32.mrb[68].mxu0 }
 0x70a   : > { %v2704_v17 = vadd.f32 %v2703_v45, %v5537_v20  ;;  %v2705_v8 = vpop.f32.mrb[69].mxu0 }
 0x70b   : > { %v2706_v11 = vadd.f32 %v2705_v8, %v5540_v0  ;;  %v2707_v54 = vpop.f32.mrb[70].mxu0 }
 0x70c   : > { %2776 = vst [vmem:[%s5546_s14 + $0x20] sm:$0xff] %v2704_v17  ;;  %v2708_v34 = vadd.f32 %v2707_v54, %v5537_v20  ;;  %v2709_v13 = vpop.f32.mrb[71].mxu0 }
 0x70d   : > { %2777 = vst [vmem:[%s5546_s14 + $0x28] sm:$0xff] %v2706_v11  ;;  %v2710_v29 = vadd.f32 %v2709_v13, %v5540_v0 }
 0x70e   : > { %2778 = vst [vmem:[%s5546_s14 + $0x30] sm:$0xff] %v2708_v34 }
 0x70f   : > { %2779 = vst [vmem:[%s5546_s14 + $0x38] sm:$0xff] %v2710_v29 }
 0x711   : > { %v2713_v19 = vpop.f32.mrb[72].mxu0 }
 0x712   : > { %v2714_v24 = vadd.f32 %v2713_v19, %v5537_v20  ;;  %v2715_v31 = vpop.f32.mrb[73].mxu0 }
 0x713   : > { %v2716_v36 = vadd.f32 %v2715_v31, %v5540_v0  ;;  %v2717_v56 = vpop.f32.mrb[74].mxu0 }
 0x714   : > { %2780 = vst [vmem:[%s5546_s14 + $0x40] sm:$0xff] %v2714_v24  ;;  %v2718_v21 = vadd.f32 %v2717_v56, %v5537_v20  ;;  %v2719_v49 = vpop.f32.mrb[75].mxu0 }
 0x715   : > { %2781 = vst [vmem:[%s5546_s14 + $0x48] sm:$0xff] %v2716_v36  ;;  %v2720_v52 = vadd.f32 %v2719_v49, %v5540_v0 }
 0x716   : > { %2782 = vst [vmem:[%s5546_s14 + $0x50] sm:$0xff] %v2718_v21 }
 0x717   : > { %2783 = vst [vmem:[%s5546_s14 + $0x58] sm:$0xff] %v2720_v52 }
 0x719   : > { %v2723_v58 = vpop.f32.mrb[76].mxu0 }
 0x71a   : > { %v2724_v16 = vadd.f32 %v2723_v58, %v5537_v20  ;;  %v2725_v55 = vpop.f32.mrb[77].mxu0 }
 0x71b   : > { %v2726_v27 = vadd.f32 %v2725_v55, %v5540_v0  ;;  %v2727_v10 = vpop.f32.mrb[78].mxu0 }
 0x71c   : > { %2784 = vst [vmem:[%s5546_s14 + $0x60] sm:$0xff] %v2724_v16  ;;  %v2728_v41 = vadd.f32 %v2727_v10, %v5537_v20  ;;  %v2729_v47 = vpop.f32.mrb[79].mxu0 }
 0x71d   : > { %2785 = vst [vmem:[%s5546_s14 + $0x68] sm:$0xff] %v2726_v27  ;;  %v2730_v30 = vadd.f32 %v2729_v47, %v5540_v0 }
 0x71e   : > { %2786 = vst [vmem:[%s5546_s14 + $0x70] sm:$0xff] %v2728_v41 }
 0x71f   : > { %2787 = vst [vmem:[%s5546_s14 + $0x78] sm:$0xff] %v2730_v30 }
 0x721   : > { %v2733_v33 = vpop.f32.mrb[80].mxu0 }
 0x722   : > { %v2734_v3 = vadd.f32 %v2733_v33, %v5537_v20  ;;  %v2735_v43 = vpop.f32.mrb[81].mxu0 }
 0x723   : > { %v2736_v37 = vadd.f32 %v2735_v43, %v5540_v0  ;;  %v2737_v59 = vpop.f32.mrb[82].mxu0 }
 0x724   : > { %2788 = vst [vmem:[%s5546_s14 + $0x80] sm:$0xff] %v2734_v3  ;;  %v2738_v5 = vadd.f32 %v2737_v59, %v5537_v20  ;;  %v2739_v7 = vpop.f32.mrb[83].mxu0 }
 0x725   : > { %2789 = vst [vmem:[%s5546_s14 + $0x88] sm:$0xff] %v2736_v37  ;;  %v2740_v50 = vadd.f32 %v2739_v7, %v5540_v0 }
 0x726   : > { %2790 = vst [vmem:[%s5546_s14 + $0x90] sm:$0xff] %v2738_v5 }
 0x727   : > { %2791 = vst [vmem:[%s5546_s14 + $0x98] sm:$0xff] %v2740_v50 }
 0x729   : > { %v2743_v9 = vpop.f32.mrb[84].mxu0 }
 0x72a   : > { %v2744_v23 = vadd.f32 %v2743_v9, %v5537_v20  ;;  %v2745_v60 = vpop.f32.mrb[85].mxu0 }
 0x72b   : > { %v2746_v61 = vadd.f32 %v2745_v60, %v5540_v0  ;;  %v2747_v22 = vpop.f32.mrb[86].mxu0 }
 0x72c   : > { %2792 = vst [vmem:[%s5546_s14 + $0xa0] sm:$0xff] %v2744_v23  ;;  %v2748_v39 = vadd.f32 %v2747_v22, %v5537_v20  ;;  %v2749_v18 = vpop.f32.mrb[87].mxu0 }
 0x72d   : > { %2793 = vst [vmem:[%s5546_s14 + $0xa8] sm:$0xff] %v2746_v61  ;;  %v2750_v46 = vadd.f32 %v2749_v18, %v5540_v0 }
 0x72e   : > { %2794 = vst [vmem:[%s5546_s14 + $0xb0] sm:$0xff] %v2748_v39 }
 0x72f   : > { %2795 = vst [vmem:[%s5546_s14 + $0xb8] sm:$0xff] %v2750_v46 }
 0x731   : > { %v2753_v62 = vpop.f32.mrb[88].mxu0 }
 0x732   : > { %v2754_v63 = vadd.f32 %v2753_v62, %v5537_v20  ;;  %v2755_v35 = vpop.f32.mrb[89].mxu0 }
 0x733   : > { %v2756_v28 = vadd.f32 %v2755_v35, %v5540_v0  ;;  %v2757_v51 = vpop.f32.mrb[90].mxu0 }
 0x734   : > { %2796 = vst [vmem:[%s5546_s14 + $0xc0] sm:$0xff] %v2754_v63  ;;  %v2758_v40 = vadd.f32 %v2757_v51, %v5537_v20  ;;  %v2759_v44 = vpop.f32.mrb[91].mxu0 }
 0x735   : > { %2797 = vst [vmem:[%s5546_s14 + $0xc8] sm:$0xff] %v2756_v28  ;;  %v2760_v14 = vadd.f32 %v2759_v44, %v5540_v0 }
 0x736   : > { %2798 = vst [vmem:[%s5546_s14 + $0xd0] sm:$0xff] %v2758_v40 }
 0x737   : > { %2799 = vst [vmem:[%s5546_s14 + $0xd8] sm:$0xff] %v2760_v14 }
 0x739   : > { %v2763_v42 = vpop.f32.mrb[92].mxu0 }
 0x73a   : > { %v2764_v25 = vadd.f32 %v2763_v42, %v5537_v20  ;;  %v2765_v2 = vpop.f32.mrb[93].mxu0 }
 0x73b   : > { %v2766_v38 = vadd.f32 %v2765_v2, %v5540_v0  ;;  %v2767_v53 = vpop.f32.mrb[94].mxu0 }
 0x73c   : > { %2800 = vst [vmem:[%s5546_s14 + $0xe0] sm:$0xff] %v2764_v25  ;;  %v2768_v48 = vadd.f32 %v2767_v53, %v5537_v20  ;;  %v2769_v12 = vpop.f32.mrb[95].mxu0 }
 0x73d   : > { %2801 = vst [vmem:[%s5546_s14 + $0xe8] sm:$0xff] %v2766_v38  ;;  %v2770_v15 = vadd.f32 %v2769_v12, %v5540_v0 }
 0x73e   : > { %2802 = vst [vmem:[%s5546_s14 + $0xf0] sm:$0xff] %v2768_v48 }
 0x73f   : > { %2803 = vst [vmem:[%s5546_s14 + $0xf8] sm:$0xff] %v2770_v15 }
 0x740   : > { %4155 = shalt.err (!%p4152_p2)
}
 0x741   : > { %s4156_s7 = scalar_lea.hbm %s5611_s8, 4096  ;;  %s4160_s23 = scalar_lea.hbm %s5767_s12, 8192 }
 0x742   : > { %p4157_p13 = scmp.ne.s32.totalorder %s5611_s8, %s4156_s7  ;;  %p4161_p0 = scmp.lt.u32.totalorder %s5611_s8, %s5767_s12 }
 0x743   : > { %p4162_p5 = scmp.lt.u32.totalorder %s4160_s23, %s4156_s7  ;;  %p4164_p10 = scmp.lt.u32.totalorder %s4156_s7, %s5611_s8 }
 0x744   : > { %p4158_p4 = pnand %p4157_p13, %p5764_p7 }
 0x745   : > { %p4163_p1 = por %p4162_p5, %p4161_p0 }
 0x746   : > { %p4159_p9 = pneg %p4158_p4 }
 0x747   : > { %p4165_p12 = por %p4164_p10, %p4163_p1 }
 0x749   : > { %p4166_p8 = pnand %p4165_p12, %p4159_p9 }
 0x74b   : > { %4169 = shalt.err (!%p4166_p8)
}
 0x74c   : > { %s4273_s14 = smov 256   ;;  %s4274_s10 = smov 16  }
 0x74d   : > { %3432 = dma.vmem_to_hbm [thread:$0]  (%p5764_p7), %s5613_s0, 4096, %s5611_s8, %s2805_s11, %s4273_s14, %s4273_s14, %s4274_s10  }
 0x74e PF: > { %s2859_s3 = sand.u32 1, %s4232_s17   ;;  %p5768_p3 = scmp.ne.s32.totalorder %s5722_s30, 0 }
 0x74f   : > { %p5769_p11 = scmp.ge.s32.totalorder %s4252_s22, 2  ;;  %s2860_s2 = scalar_lea.sflag [#allocation8], %s2859_s3 }
 0x751   : > { %p3469_p6 = pnand %p5769_p11, %p5768_p3 }
 0x753   : > { %4223 = dma.done.wait (!%p3469_p6), %s2860_s2, 4096  }
 0x754   : > { %4225 = vsyncadd (!%p3469_p6), %s2860_s2, 4294963200  ;;  %s2869_s26 = scalar_lea.sflag [#allocation25], %s2859_s3 }
 0x755   : > { %4227 = dma.done.wait (!%p3469_p6), %s2869_s26, 2048  }
 0x756   : > { %4229 = vsyncadd (!%p3469_p6), %s2869_s26, 4294965248  ;;  %s38_s22 = sadd.s32 1, %s4252_s22   ;;  %s5770_s17 = smov %s4236_s18 }
 0x757   : > { %p35_p2 = scmp.ge.s32.totalorder %s38_s22, 4   ;;  %s5771_s18 = smov %s4240_s19 }
 0x758   : > { %s5772_s19 = smov %s4591_s28  ;;  %s5773_s20 = smov %s4248_s21 }
 0x759   : > { %s5774_s21 = smov %s5776_s16  ;;  %37 = sbr.rel (!%p35_p2) target bundleno = 26 (0x1a), region = 174 }
 0x760   :  { %2874 = vsyncpa [#allocation7], 1 }
 0x761   :  { %2876 = vsyncpa [#allocation7 + $0x1], 1 }
 0x762   :  { %2877 = vsyncpa [#allocation10], 1 }
 0x763   :  { %2879 = vsyncpa [#allocation10 + $0x1], 1 }
 0x764   :  { %2880 = vsyncpa [#allocation13], 1 }
 0x765   :  { %2881 = vsyncpa [#allocation16], 1 }
 0x766   :  { %2882 = vsyncpa [#allocation19], 1 }
 0x767   :  { %2883 = vsyncpa [#allocation22], 1 }
 0x768   :  { %2884 = vsyncpa [#allocation8], 1 }
 0x769   :  { %2886 = vsyncpa [#allocation8 + $0x1], 1 }
 0x76a   :  { %2887 = vsyncpa [#allocation25], 1 }
 0x76b   :  { %2889 = vsyncpa [#allocation25 + $0x1], 1 }

</bundles_post_ra>
